<compile_context>
chip_gen: v7x
topology: tpu7x:2x2x1
jax: 0.10.0
libtpu: 0.0.40
codegen_flags: <defaults>
</compile_context>

<pallas_src>
import functools

import jax
import jax.numpy as jnp
from jax.experimental import pallas as pl
from jax.experimental.pallas import tpu as pltpu


# ----------------------------------------------------------------------------- config
C_IN = 3
C_STEM = 32
EXPAND = 4
C_EXP = C_STEM * EXPAND          # 128
C_SE = 8
OUT_FEATS = 256                  # stand-in for global_config.EfficientNet_OutFeats
NUM_CLASSES = 4                  # the customized _fc head
BN_EPS = 1e-3
K_STEM = 9 * C_IN                # 27
K_STEM_PAD = 32                  # pad K to a multiple of 8 for the MXU

TILE_M_TARGET = 256              # row tile for the fused stem/expand matmul kernel
TILE_HW_TARGET = 128             # per-sample spatial tile for proj/head/pool kernel
VMEM_LIMIT = 32 * 1024 * 1024    # explicit scoped-VMEM budget (safe on v5e/v6e/v7x)


# ----------------------------------------------------------------------------- helpers

def _pick_tile(total, target, multiple=8):
    """Largest divisor of `total` that is <= target and a multiple of `multiple`."""
    t = min(target, total)
    t -= t % multiple
    while t >= multiple and total % t != 0:
        t -= multiple
    return t if t >= multiple else total


def nchw_to_nhwc(x):
    return jnp.transpose(x, (0, 2, 3, 1))


def extract_patches(x, k, stride, pad):
    """x: (N,H,W,C) NHWC -> (N,Ho,Wo,k*k,C) patch tensor (JAX glue, stem only)."""
    n, h, w, c = x.shape
    xp = jnp.pad(x, ((0, 0), (pad, pad), (pad, pad), (0, 0)))
    ho = (h + 2 * pad - k) // stride + 1
    wo = (w + 2 * pad - k) // stride + 1
    taps = []
    for di in range(k):
        for dj in range(k):
            taps.append(
                xp[:, di:di + stride * (ho - 1) + 1:stride,
                      dj:dj + stride * (wo - 1) + 1:stride, :])
    return jnp.stack(taps, axis=3), ho, wo


# ----------------------------------------------------------------------------- kernels

def _stem_expand_kernel(x_ref, sw_ref, ssh_ref, ew_ref, esh_ref,
                        stem_ref, exp_ref):
    # stem conv-as-matmul (BN scale folded into W) + swish, fused with 1x1 expand.
    h = jnp.dot(x_ref[...], sw_ref[...], preferred_element_type=jnp.float32)
    h = h + ssh_ref[...]
    h = h * jax.nn.sigmoid(h)                         # swish (f32 epilogue)
    stem_ref[...] = h                                 # kept for the MBConv residual
    e = jnp.dot(h.astype(jnp.bfloat16), ew_ref[...],
                preferred_element_type=jnp.float32)
    e = e + esh_ref[...]
    e = e * jax.nn.sigmoid(e)
    exp_ref[...] = e.astype(exp_ref.dtype)


def _dwconv_se_kernel(xp_ref, dww_ref, dwsh_ref, w1_ref, b1_ref, w2_ref, b2_ref,
                      o_ref, *, ho, wo):
    # One sample per grid step: depthwise 3x3 built tap-by-tap from shifted VMEM
    # slices of the halo-padded tile, folded-BN shift + swish, full squeeze-excite.
    xp = xp_ref[0].astype(jnp.float32)                # (ho+2, wo+2, C)
    c = xp.shape[-1]
    dww = dww_ref[...]                                # (9, C), BN scale pre-folded
    acc = jnp.zeros((ho, wo, c), jnp.float32)
    for k_tap in range(9):                            # static unrolled taps
        di, dj = k_tap // 3, k_tap % 3
        acc = acc + xp[di:di + ho, dj:dj + wo, :] * dww[k_tap:k_tap + 1, :]
    y = acc + dwsh_ref[...]
    y = y * jax.nn.sigmoid(y)                         # swish
    yflat = y.reshape(ho * wo, c)                     # (HW, C)

    # squeeze-excite: global mean -> FC/swish -> FC/sigmoid -> channel gate
    pooled = jnp.mean(yflat, axis=0, keepdims=True)   # (1, C)
    h = jnp.dot(pooled, w1_ref[...], preferred_element_type=jnp.float32) + b1_ref[...]
    h = h * jax.nn.sigmoid(h)
    g = jnp.dot(h, w2_ref[...], preferred_element_type=jnp.float32) + b2_ref[...]
    g = jax.nn.sigmoid(g)                             # (1, C)
    o_ref[0] = (yflat * g).astype(o_ref.dtype)        # gated activation, single write


def _proj_head_pool_fc_kernel(dw_ref, stem_ref, pw_ref, psh_ref,
                              headw_ref, headsh_ref, fcw_ref, fcb_ref,
                              o_ref, pool_acc, *, inv_hw):
    t = pl.program_id(1)

    @pl.when(t == 0)
    def _():
        pool_acc[...] = jnp.zeros_like(pool_acc)

    # projection 1x1 conv + folded BN + residual (no activation)
    proj = jnp.dot(dw_ref[0], pw_ref[...], preferred_element_type=jnp.float32)
    proj = proj + psh_ref[...] + stem_ref[0]
    # head 1x1 conv + folded BN + swish (never written to HBM)
    head = jnp.dot(proj.astype(jnp.bfloat16), headw_ref[...],
                   preferred_element_type=jnp.float32)
    head = head + headsh_ref[...]
    head = head * jax.nn.sigmoid(head)
    # global average pool accumulated across HW tiles in VMEM scratch
    pool_acc[...] += jnp.sum(head, axis=0, keepdims=True)

    @pl.when(t == pl.num_programs(1) - 1)
    def _():
        pooled = pool_acc[...] * inv_hw               # (1, OUT_FEATS)
        logits = jnp.dot(pooled, fcw_ref[...],
                         preferred_element_type=jnp.float32) + fcb_ref[...]
        o_ref[0] = logits                             # (1, NUM_CLASSES)


# ----------------------------------------------------------------------------- wrappers

def stem_expand(patches, stem_w, stem_shift, exp_w, exp_shift):
    m, k = patches.shape
    tm = _pick_tile(m, TILE_M_TARGET)
    return pl.pallas_call(
        _stem_expand_kernel,
        grid=(m // tm,),
        out_shape=(jax.ShapeDtypeStruct((m, C_STEM), jnp.float32),
                   jax.ShapeDtypeStruct((m, C_EXP), jnp.bfloat16)),
        in_specs=[pl.BlockSpec((tm, k), lambda i: (i, 0)),
                  pl.BlockSpec((k, C_STEM), lambda i: (0, 0)),
                  pl.BlockSpec((1, C_STEM), lambda i: (0, 0)),
                  pl.BlockSpec((C_STEM, C_EXP), lambda i: (0, 0)),
                  pl.BlockSpec((1, C_EXP), lambda i: (0, 0))],
        out_specs=(pl.BlockSpec((tm, C_STEM), lambda i: (i, 0)),
                   pl.BlockSpec((tm, C_EXP), lambda i: (i, 0))),
        compiler_params=pltpu.CompilerParams(
            dimension_semantics=("parallel",),
            vmem_limit_bytes=VMEM_LIMIT),
    )(patches, stem_w, stem_shift, exp_w, exp_shift)


def dwconv_se(exp_pad, dw_w, dw_shift, se_w1, se_b1, se_w2, se_b2, ho, wo):
    n = exp_pad.shape[0]
    c = exp_pad.shape[-1]
    hw = ho * wo
    return pl.pallas_call(
        functools.partial(_dwconv_se_kernel, ho=ho, wo=wo),
        grid=(n,),
        out_shape=jax.ShapeDtypeStruct((n, hw, c), jnp.bfloat16),
        in_specs=[pl.BlockSpec((1, ho + 2, wo + 2, c), lambda i: (i, 0, 0, 0)),
                  pl.BlockSpec((9, c), lambda i: (0, 0)),
                  pl.BlockSpec((1, c), lambda i: (0, 0)),
                  pl.BlockSpec((c, C_SE), lambda i: (0, 0)),
                  pl.BlockSpec((1, C_SE), lambda i: (0, 0)),
                  pl.BlockSpec((C_SE, c), lambda i: (0, 0)),
                  pl.BlockSpec((1, c), lambda i: (0, 0))],
        out_specs=pl.BlockSpec((1, hw, c), lambda i: (i, 0, 0)),
        compiler_params=pltpu.CompilerParams(
            dimension_semantics=("parallel",),
            vmem_limit_bytes=VMEM_LIMIT),
    )(exp_pad, dw_w, dw_shift, se_w1, se_b1, se_w2, se_b2)


def proj_head_pool_fc(dw, stem, proj_w, proj_shift, head_w, head_shift, fc_w, fc_b):
    n, hw, c_exp = dw.shape
    thw = _pick_tile(hw, TILE_HW_TARGET)
    out = pl.pallas_call(
        functools.partial(_proj_head_pool_fc_kernel, inv_hw=1.0 / float(hw)),
        grid=(n, hw // thw),
        out_shape=jax.ShapeDtypeStruct((n, 1, NUM_CLASSES), jnp.float32),
        in_specs=[pl.BlockSpec((1, thw, c_exp), lambda i, t: (i, t, 0)),
                  pl.BlockSpec((1, thw, C_STEM), lambda i, t: (i, t, 0)),
                  pl.BlockSpec((c_exp, C_STEM), lambda i, t: (0, 0)),
                  pl.BlockSpec((1, C_STEM), lambda i, t: (0, 0)),
                  pl.BlockSpec((C_STEM, OUT_FEATS), lambda i, t: (0, 0)),
                  pl.BlockSpec((1, OUT_FEATS), lambda i, t: (0, 0)),
                  pl.BlockSpec((OUT_FEATS, NUM_CLASSES), lambda i, t: (0, 0)),
                  pl.BlockSpec((1, NUM_CLASSES), lambda i, t: (0, 0))],
        out_specs=pl.BlockSpec((1, 1, NUM_CLASSES), lambda i, t: (i, 0, 0)),
        scratch_shapes=[pltpu.VMEM((1, OUT_FEATS), jnp.float32)],
        compiler_params=pltpu.CompilerParams(
            dimension_semantics=("parallel", "arbitrary"),
            vmem_limit_bytes=VMEM_LIMIT),
    )(dw, stem, proj_w, proj_shift, head_w, head_shift, fc_w, fc_b)
    return out.reshape(n, NUM_CLASSES)


# ----------------------------------------------------------------------------- params

def _bn_fold(key, c):
    kg, kb = jax.random.split(key)
    gamma = 1.0 + 0.01 * jax.random.normal(kg, (c,), jnp.float32)
    beta = 0.01 * jax.random.normal(kb, (c,), jnp.float32)
    mean = jnp.zeros((c,), jnp.float32)
    var = jnp.ones((c,), jnp.float32)
    scale = gamma / jnp.sqrt(var + BN_EPS)
    shift = beta - mean * scale
    return scale, shift


def init_params(key):
    ks = jax.random.split(key, 16)
    p = {}
    # BN scale is folded into the conv weights; kernels only apply a shift.
    stem_w = jax.random.normal(ks[0], (K_STEM, C_STEM), jnp.float32) / jnp.sqrt(K_STEM)
    s_scale, s_shift = _bn_fold(ks[1], C_STEM)
    stem_w = stem_w * s_scale[None, :]
    p["stem_w"] = jnp.pad(stem_w, ((0, K_STEM_PAD - K_STEM), (0, 0))).astype(jnp.bfloat16)
    p["stem_shift"] = s_shift.reshape(1, C_STEM)

    exp_w = jax.random.normal(ks[2], (C_STEM, C_EXP), jnp.float32) / jnp.sqrt(C_STEM)
    e_scale, e_shift = _bn_fold(ks[3], C_EXP)
    p["exp_w"] = (exp_w * e_scale[None, :]).astype(jnp.bfloat16)
    p["exp_shift"] = e_shift.reshape(1, C_EXP)

    dw_w = jax.random.normal(ks[4], (9, C_EXP), jnp.float32) / 3.0
    d_scale, d_shift = _bn_fold(ks[5], C_EXP)
    p["dw_w"] = dw_w * d_scale[None, :]                       # VPU path stays f32
    p["dw_shift"] = d_shift.reshape(1, C_EXP)

    p["se_w1"] = jax.random.normal(ks[6], (C_EXP, C_SE), jnp.float32) / jnp.sqrt(C_EXP)
    p["se_b1"] = jnp.zeros((1, C_SE), jnp.float32)
    p["se_w2"] = jax.random.normal(ks[7], (C_SE, C_EXP), jnp.float32) / jnp.sqrt(C_SE)
    p["se_b2"] = jnp.zeros((1, C_EXP), jnp.float32)

    proj_w = jax.random.normal(ks[8], (C_EXP, C_STEM), jnp.float32) / jnp.sqrt(C_EXP)
    pj_scale, pj_shift = _bn_fold(ks[9], C_STEM)
    p["proj_w"] = (proj_w * pj_scale[None, :]).astype(jnp.bfloat16)
    p["proj_shift"] = pj_shift.reshape(1, C_STEM)

    head_w = jax.random.normal(ks[10], (C_STEM, OUT_FEATS), jnp.float32) / jnp.sqrt(C_STEM)
    h_scale, h_shift = _bn_fold(ks[11], OUT_FEATS)
    p["head_w"] = (head_w * h_scale[None, :]).astype(jnp.bfloat16)
    p["head_shift"] = h_shift.reshape(1, OUT_FEATS)

    p["fc_w"] = jax.random.normal(ks[12], (OUT_FEATS, NUM_CLASSES), jnp.float32) / jnp.sqrt(OUT_FEATS)
    p["fc_b"] = (0.01 * jax.random.normal(ks[13], (NUM_CLASSES,), jnp.float32)).reshape(1, NUM_CLASSES)
    return p


# ----------------------------------------------------------------------------- forward

@jax.jit
def customized_ens_forward(params, x_nchw):
    x = nchw_to_nhwc(x_nchw.astype(jnp.float32))                 # (N, H, W, 3)
    n = x.shape[0]

    # stem im2col (3x3 stride 2, pad 1); K padded 27 -> 32 for MXU alignment.
    # TODO(synk): Conv2dStaticSamePadding uses asymmetric padding; symmetric pad=1 used.
    patches, ho, wo = extract_patches(x, k=3, stride=2, pad=1)   # (N,Ho,Wo,9,3)
    m = n * ho * wo
    pat = patches.reshape(m, K_STEM)
    pat = jnp.pad(pat, ((0, 0), (0, K_STEM_PAD - K_STEM))).astype(jnp.bfloat16)

    # Kernel A: fused stem conv + BN + swish -> 1x1 expand + BN + swish
    stem, exp = stem_expand(pat, params["stem_w"], params["stem_shift"],
                            params["exp_w"], params["exp_shift"])

    # Kernel B: depthwise 3x3 + BN + swish + squeeze-excite gate (halo-padded samples)
    exp_pad = jnp.pad(exp.reshape(n, ho, wo, C_EXP), ((0, 0), (1, 1), (1, 1), (0, 0)))
    dw_gated = dwconv_se(exp_pad, params["dw_w"], params["dw_shift"],
                         params["se_w1"], params["se_b1"],
                         params["se_w2"], params["se_b2"], ho, wo)   # (N, HW, 128)

    # Kernel C: projection + BN + residual -> head conv + BN + swish -> pool -> FC(4)
    stem_img = stem.reshape(n, ho * wo, C_STEM)
    logits = proj_head_pool_fc(dw_gated, stem_img,
                               params["proj_w"], params["proj_shift"],
                               params["head_w"], params["head_shift"],
                               params["fc_w"], params["fc_b"])       # (N, 4)
    return logits


if __name__ == "__main__":
    key = jax.random.PRNGKey(0)
    x = jax.random.normal(key, (2, C_IN, 32, 32), jnp.float32)   # NCHW like PyTorch
    params = init_params(jax.random.PRNGKey(42))
    out = customized_ens_forward(params, x)
    out = jax.block_until_ready(out)
    assert out.shape == (2, NUM_CLASSES)
    assert bool(jnp.all(jnp.isfinite(out)))
    print("KERNEL_OK")
</pallas_src>

<mosaic_0001>
module attributes {stable_mosaic.version = 11 : i64} {
  func.func @_stem_expand_kernel(%arg0: i32, %arg1: memref<256x32xbf16, #tpu.memory_space<vmem>>, %arg2: memref<32x32xbf16, #tpu.memory_space<vmem>>, %arg3: memref<1x32xf32, #tpu.memory_space<vmem>>, %arg4: memref<32x128xbf16, #tpu.memory_space<vmem>>, %arg5: memref<1x128xf32, #tpu.memory_space<vmem>>, %arg6: memref<256x32xf32, #tpu.memory_space<vmem>>, %arg7: memref<256x128xbf16, #tpu.memory_space<vmem>>) attributes {dimension_semantics = [#tpu.dimension_semantics<parallel>], iteration_bounds = array<i64: 2>, scalar_prefetch = 0 : i64, scratch_operands = 0 : i64, tpu.core_type = #tpu.core_type<tc>, window_params = [{transform_indices = @transform_0, window_bounds = array<i64: 256, 32>}, {pipeline_mode = #tpu.pipeline_mode<synchronous>, transform_indices = @transform_1, window_bounds = array<i64: 32, 32>}, {pipeline_mode = #tpu.pipeline_mode<synchronous>, transform_indices = @transform_2, window_bounds = array<i64: 1, 32>}, {pipeline_mode = #tpu.pipeline_mode<synchronous>, transform_indices = @transform_3, window_bounds = array<i64: 32, 128>}, {pipeline_mode = #tpu.pipeline_mode<synchronous>, transform_indices = @transform_4, window_bounds = array<i64: 1, 128>}, {transform_indices = @transform_5, window_bounds = array<i64: 256, 32>}, {transform_indices = @transform_6, window_bounds = array<i64: 256, 128>}]} {
    %c0 = arith.constant 0 : index
    %c0_0 = arith.constant 0 : index
    %0 = vector.load %arg1[%c0, %c0_0] : memref<256x32xbf16, #tpu.memory_space<vmem>>, vector<256x32xbf16>
    %c0_1 = arith.constant 0 : index
    %c0_2 = arith.constant 0 : index
    %1 = vector.load %arg2[%c0_1, %c0_2] : memref<32x32xbf16, #tpu.memory_space<vmem>>, vector<32x32xbf16>
    %cst = arith.constant dense<0.000000e+00> : vector<256x32xf32>
    %2 = tpu.matmul %0, %1, %cst {dimension_numbers = #tpu.dot_dimension_numbers<[1], [0], [0], [1], [0, 0, 1, 1], [], []>} : vector<256x32xbf16>, vector<32x32xbf16>, vector<256x32xf32> -> vector<256x32xf32>
    %c0_3 = arith.constant 0 : index
    %c0_4 = arith.constant 0 : index
    %3 = vector.load %arg3[%c0_3, %c0_4] : memref<1x32xf32, #tpu.memory_space<vmem>>, vector<1x32xf32>
    %4 = vector.broadcast %3 : vector<1x32xf32> to vector<256x32xf32>
    %5 = arith.addf %2, %4 : vector<256x32xf32>
    %6 = arith.negf %5 : vector<256x32xf32>
    %7 = math.exp %6 : vector<256x32xf32>
    %cst_5 = arith.constant 1.000000e+00 : f32
    %8 = vector.broadcast %cst_5 : f32 to vector<256x32xf32>
    %9 = arith.addf %8, %7 : vector<256x32xf32>
    %10 = arith.divf %8, %9 : vector<256x32xf32>
    %11 = arith.mulf %5, %10 : vector<256x32xf32>
    %c0_6 = arith.constant 0 : index
    %c0_7 = arith.constant 0 : index
    %12 = vector.load %arg6[%c0_6, %c0_7] : memref<256x32xf32, #tpu.memory_space<vmem>>, vector<256x32xf32>
    tpu.vector_store %arg6[%c0_6, %c0_7], %11 {strides = array<i32>} : memref<256x32xf32, #tpu.memory_space<vmem>>, vector<256x32xf32>,
    %13 = arith.truncf %11 : vector<256x32xf32> to vector<256x32xbf16>
    %c0_8 = arith.constant 0 : index
    %c0_9 = arith.constant 0 : index
    %14 = vector.load %arg4[%c0_8, %c0_9] : memref<32x128xbf16, #tpu.memory_space<vmem>>, vector<32x128xbf16>
    %cst_10 = arith.constant dense<0.000000e+00> : vector<256x128xf32>
    %15 = tpu.matmul %13, %14, %cst_10 {dimension_numbers = #tpu.dot_dimension_numbers<[1], [0], [0], [1], [0, 0, 1, 1], [], []>} : vector<256x32xbf16>, vector<32x128xbf16>, vector<256x128xf32> -> vector<256x128xf32>
    %c0_11 = arith.constant 0 : index
    %c0_12 = arith.constant 0 : index
    %16 = vector.load %arg5[%c0_11, %c0_12] : memref<1x128xf32, #tpu.memory_space<vmem>>, vector<1x128xf32>
    %17 = vector.broadcast %16 : vector<1x128xf32> to vector<256x128xf32>
    %18 = arith.addf %15, %17 : vector<256x128xf32>
    %19 = arith.negf %18 : vector<256x128xf32>
    %20 = math.exp %19 : vector<256x128xf32>
    %cst_13 = arith.constant 1.000000e+00 : f32
    %21 = vector.broadcast %cst_13 : f32 to vector<256x128xf32>
    %22 = arith.addf %21, %20 : vector<256x128xf32>
    %23 = arith.divf %21, %22 : vector<256x128xf32>
    %24 = arith.mulf %18, %23 : vector<256x128xf32>
    %25 = arith.truncf %24 : vector<256x128xf32> to vector<256x128xbf16>
    %c0_14 = arith.constant 0 : index
    %c0_15 = arith.constant 0 : index
    %26 = vector.load %arg7[%c0_14, %c0_15] : memref<256x128xbf16, #tpu.memory_space<vmem>>, vector<256x128xbf16>
    tpu.vector_store %arg7[%c0_14, %c0_15], %25 {strides = array<i32>} : memref<256x128xbf16, #tpu.memory_space<vmem>>, vector<256x128xbf16>,
    return
  }
  func.func @transform_0(%arg0: i32) -> (i32, i32) {
    %c0_i32 = arith.constant 0 : i32
    %c0_i32_0 = arith.constant 0 : i32
    return %arg0, %c0_i32 : i32, i32
  }
  func.func @transform_1(%arg0: i32) -> (i32, i32) {
    %c0_i32 = arith.constant 0 : i32
    %c0_i32_0 = arith.constant 0 : i32
    %c0_i32_1 = arith.constant 0 : i32
    return %c0_i32, %c0_i32_0 : i32, i32
  }
  func.func @transform_2(%arg0: i32) -> (i32, i32) {
    %c0_i32 = arith.constant 0 : i32
    %c0_i32_0 = arith.constant 0 : i32
    %c0_i32_1 = arith.constant 0 : i32
    return %c0_i32, %c0_i32_0 : i32, i32
  }
  func.func @transform_3(%arg0: i32) -> (i32, i32) {
    %c0_i32 = arith.constant 0 : i32
    %c0_i32_0 = arith.constant 0 : i32
    %c0_i32_1 = arith.constant 0 : i32
    return %c0_i32, %c0_i32_0 : i32, i32
  }
  func.func @transform_4(%arg0: i32) -> (i32, i32) {
    %c0_i32 = arith.constant 0 : i32
    %c0_i32_0 = arith.constant 0 : i32
    %c0_i32_1 = arith.constant 0 : i32
    return %c0_i32, %c0_i32_0 : i32, i32
  }
  func.func @transform_5(%arg0: i32) -> (i32, i32) {
    %c0_i32 = arith.constant 0 : i32
    %c0_i32_0 = arith.constant 0 : i32
    return %arg0, %c0_i32 : i32, i32
  }
  func.func @transform_6(%arg0: i32) -> (i32, i32) {
    %c0_i32 = arith.constant 0 : i32
    %c0_i32_0 = arith.constant 0 : i32
    return %arg0, %c0_i32 : i32, i32
  }
}

module attributes {stable_mosaic.version = 11 : i64} {
  func.func @_dwconv_se_kernel(%arg0: i32, %arg1: memref<1x18x18x128xbf16, #tpu.memory_space<vmem>>, %arg2: memref<9x128xf32, #tpu.memory_space<vmem>>, %arg3: memref<1x128xf32, #tpu.memory_space<vmem>>, %arg4: memref<128x8xf32, #tpu.memory_space<vmem>>, %arg5: memref<1x8xf32, #tpu.memory_space<vmem>>, %arg6: memref<8x128xf32, #tpu.memory_space<vmem>>, %arg7: memref<1x128xf32, #tpu.memory_space<vmem>>, %arg8: memref<1x256x128xbf16, #tpu.memory_space<vmem>>) attributes {dimension_semantics = [#tpu.dimension_semantics<parallel>], iteration_bounds = array<i64: 2>, scalar_prefetch = 0 : i64, scratch_operands = 0 : i64, tpu.core_type = #tpu.core_type<tc>, window_params = [{transform_indices = @transform_0, window_bounds = array<i64: 1, 18, 18, 128>}, {pipeline_mode = #tpu.pipeline_mode<synchronous>, transform_indices = @transform_1, window_bounds = array<i64: 9, 128>}, {pipeline_mode = #tpu.pipeline_mode<synchronous>, transform_indices = @transform_2, window_bounds = array<i64: 1, 128>}, {pipeline_mode = #tpu.pipeline_mode<synchronous>, transform_indices = @transform_3, window_bounds = array<i64: 128, 8>}, {pipeline_mode = #tpu.pipeline_mode<synchronous>, transform_indices = @transform_4, window_bounds = array<i64: 1, 8>}, {pipeline_mode = #tpu.pipeline_mode<synchronous>, transform_indices = @transform_5, window_bounds = array<i64: 8, 128>}, {pipeline_mode = #tpu.pipeline_mode<synchronous>, transform_indices = @transform_6, window_bounds = array<i64: 1, 128>}, {transform_indices = @transform_7, window_bounds = array<i64: 1, 256, 128>}]} {
    %c0 = arith.constant 0 : index
    %c0_0 = arith.constant 0 : index
    %c0_1 = arith.constant 0 : index
    %c0_2 = arith.constant 0 : index
    %0 = vector.load %arg1[%c0, %c0_0, %c0_1, %c0_2] : memref<1x18x18x128xbf16, #tpu.memory_space<vmem>>, vector<1x18x18x128xbf16>
    %1 = vector.shape_cast %0 : vector<1x18x18x128xbf16> to vector<18x18x128xbf16>
    %2 = arith.extf %1 : vector<18x18x128xbf16> to vector<18x18x128xf32>
    %c0_3 = arith.constant 0 : index
    %c0_4 = arith.constant 0 : index
    %3 = vector.load %arg2[%c0_3, %c0_4] : memref<9x128xf32, #tpu.memory_space<vmem>>, vector<9x128xf32>
    %cst = arith.constant 0.000000e+00 : f32
    %4 = vector.broadcast %cst : f32 to vector<16x16x128xf32>
    %5 = vector.extract_strided_slice %2 {offsets = [0, 0, 0], sizes = [16, 16, 128], strides = [1, 1, 1]} : vector<18x18x128xf32> to vector<16x16x128xf32>
    %6 = vector.extract_strided_slice %3 {offsets = [0, 0], sizes = [1, 128], strides = [1, 1]} : vector<9x128xf32> to vector<1x128xf32>
    %7 = vector.shape_cast %6 : vector<1x128xf32> to vector<1x1x128xf32>
    %8 = vector.broadcast %7 : vector<1x1x128xf32> to vector<16x16x128xf32>
    %9 = arith.mulf %5, %8 : vector<16x16x128xf32>
    %10 = arith.addf %4, %9 : vector<16x16x128xf32>
    %11 = vector.extract_strided_slice %2 {offsets = [0, 1, 0], sizes = [16, 16, 128], strides = [1, 1, 1]} : vector<18x18x128xf32> to vector<16x16x128xf32>
    %12 = vector.extract_strided_slice %3 {offsets = [1, 0], sizes = [1, 128], strides = [1, 1]} : vector<9x128xf32> to vector<1x128xf32>
    %13 = vector.shape_cast %12 : vector<1x128xf32> to vector<1x1x128xf32>
    %14 = vector.broadcast %13 : vector<1x1x128xf32> to vector<16x16x128xf32>
    %15 = arith.mulf %11, %14 : vector<16x16x128xf32>
    %16 = arith.addf %10, %15 : vector<16x16x128xf32>
    %17 = vector.extract_strided_slice %2 {offsets = [0, 2, 0], sizes = [16, 16, 128], strides = [1, 1, 1]} : vector<18x18x128xf32> to vector<16x16x128xf32>
    %18 = vector.extract_strided_slice %3 {offsets = [2, 0], sizes = [1, 128], strides = [1, 1]} : vector<9x128xf32> to vector<1x128xf32>
    %19 = vector.shape_cast %18 : vector<1x128xf32> to vector<1x1x128xf32>
    %20 = vector.broadcast %19 : vector<1x1x128xf32> to vector<16x16x128xf32>
    %21 = arith.mulf %17, %20 : vector<16x16x128xf32>
    %22 = arith.addf %16, %21 : vector<16x16x128xf32>
    %23 = vector.extract_strided_slice %2 {offsets = [1, 0, 0], sizes = [16, 16, 128], strides = [1, 1, 1]} : vector<18x18x128xf32> to vector<16x16x128xf32>
    %24 = vector.extract_strided_slice %3 {offsets = [3, 0], sizes = [1, 128], strides = [1, 1]} : vector<9x128xf32> to vector<1x128xf32>
    %25 = vector.shape_cast %24 : vector<1x128xf32> to vector<1x1x128xf32>
    %26 = vector.broadcast %25 : vector<1x1x128xf32> to vector<16x16x128xf32>
    %27 = arith.mulf %23, %26 : vector<16x16x128xf32>
    %28 = arith.addf %22, %27 : vector<16x16x128xf32>
    %29 = vector.extract_strided_slice %2 {offsets = [1, 1, 0], sizes = [16, 16, 128], strides = [1, 1, 1]} : vector<18x18x128xf32> to vector<16x16x128xf32>
    %30 = vector.extract_strided_slice %3 {offsets = [4, 0], sizes = [1, 128], strides = [1, 1]} : vector<9x128xf32> to vector<1x128xf32>
    %31 = vector.shape_cast %30 : vector<1x128xf32> to vector<1x1x128xf32>
    %32 = vector.broadcast %31 : vector<1x1x128xf32> to vector<16x16x128xf32>
    %33 = arith.mulf %29, %32 : vector<16x16x128xf32>
    %34 = arith.addf %28, %33 : vector<16x16x128xf32>
    %35 = vector.extract_strided_slice %2 {offsets = [1, 2, 0], sizes = [16, 16, 128], strides = [1, 1, 1]} : vector<18x18x128xf32> to vector<16x16x128xf32>
    %36 = vector.extract_strided_slice %3 {offsets = [5, 0], sizes = [1, 128], strides = [1, 1]} : vector<9x128xf32> to vector<1x128xf32>
    %37 = vector.shape_cast %36 : vector<1x128xf32> to vector<1x1x128xf32>
    %38 = vector.broadcast %37 : vector<1x1x128xf32> to vector<16x16x128xf32>
    %39 = arith.mulf %35, %38 : vector<16x16x128xf32>
    %40 = arith.addf %34, %39 : vector<16x16x128xf32>
    %41 = vector.extract_strided_slice %2 {offsets = [2, 0, 0], sizes = [16, 16, 128], strides = [1, 1, 1]} : vector<18x18x128xf32> to vector<16x16x128xf32>
    %42 = vector.extract_strided_slice %3 {offsets = [6, 0], sizes = [1, 128], strides = [1, 1]} : vector<9x128xf32> to vector<1x128xf32>
    %43 = vector.shape_cast %42 : vector<1x128xf32> to vector<1x1x128xf32>
    %44 = vector.broadcast %43 : vector<1x1x128xf32> to vector<16x16x128xf32>
    %45 = arith.mulf %41, %44 : vector<16x16x128xf32>
    %46 = arith.addf %40, %45 : vector<16x16x128xf32>
    %47 = vector.extract_strided_slice %2 {offsets = [2, 1, 0], sizes = [16, 16, 128], strides = [1, 1, 1]} : vector<18x18x128xf32> to vector<16x16x128xf32>
    %48 = vector.extract_strided_slice %3 {offsets = [7, 0], sizes = [1, 128], strides = [1, 1]} : vector<9x128xf32> to vector<1x128xf32>
    %49 = vector.shape_cast %48 : vector<1x128xf32> to vector<1x1x128xf32>
    %50 = vector.broadcast %49 : vector<1x1x128xf32> to vector<16x16x128xf32>
    %51 = arith.mulf %47, %50 : vector<16x16x128xf32>
    %52 = arith.addf %46, %51 : vector<16x16x128xf32>
    %53 = vector.extract_strided_slice %2 {offsets = [2, 2, 0], sizes = [16, 16, 128], strides = [1, 1, 1]} : vector<18x18x128xf32> to vector<16x16x128xf32>
    %54 = vector.extract_strided_slice %3 {offsets = [8, 0], sizes = [1, 128], strides = [1, 1]} : vector<9x128xf32> to vector<1x128xf32>
    %55 = vector.shape_cast %54 : vector<1x128xf32> to vector<1x1x128xf32>
    %56 = vector.broadcast %55 : vector<1x1x128xf32> to vector<16x16x128xf32>
    %57 = arith.mulf %53, %56 : vector<16x16x128xf32>
    %58 = arith.addf %52, %57 : vector<16x16x128xf32>
    %c0_5 = arith.constant 0 : index
    %c0_6 = arith.constant 0 : index
    %59 = vector.load %arg3[%c0_5, %c0_6] : memref<1x128xf32, #tpu.memory_space<vmem>>, vector<1x128xf32>
    %60 = vector.shape_cast %59 : vector<1x128xf32> to vector<1x1x128xf32>
    %61 = vector.broadcast %60 : vector<1x1x128xf32> to vector<16x16x128xf32>
    %62 = arith.addf %58, %61 : vector<16x16x128xf32>
    %63 = arith.negf %62 : vector<16x16x128xf32>
    %64 = math.exp %63 : vector<16x16x128xf32>
    %cst_7 = arith.constant 1.000000e+00 : f32
    %65 = vector.broadcast %cst_7 : f32 to vector<16x16x128xf32>
    %66 = arith.addf %65, %64 : vector<16x16x128xf32>
    %67 = arith.divf %65, %66 : vector<16x16x128xf32>
    %68 = arith.mulf %62, %67 : vector<16x16x128xf32>
    %69 = vector.shape_cast %68 : vector<16x16x128xf32> to vector<256x128xf32>
    %cst_8 = arith.constant dense<0.000000e+00> : vector<128xf32>
    %70 = vector.multi_reduction <add>, %69, %cst_8 [0] : vector<256x128xf32> to vector<128xf32>
    %71 = vector.shape_cast %70 : vector<128xf32> to vector<1x128xf32>
    %cst_9 = arith.constant 2.560000e+02 : f32
    %72 = vector.broadcast %cst_9 : f32 to vector<1x128xf32>
    %73 = arith.divf %71, %72 : vector<1x128xf32>
    %c0_10 = arith.constant 0 : index
    %c0_11 = arith.constant 0 : index
    %74 = vector.load %arg4[%c0_10, %c0_11] : memref<128x8xf32, #tpu.memory_space<vmem>>, vector<128x8xf32>
    %cst_12 = arith.constant dense<0.000000e+00> : vector<1x8xf32>
    %75 = tpu.matmul %73, %74, %cst_12 {dimension_numbers = #tpu.dot_dimension_numbers<[1], [0], [0], [1], [0, 0, 1, 1], [], []>} : vector<1x128xf32>, vector<128x8xf32>, vector<1x8xf32> -> vector<1x8xf32>
    %c0_13 = arith.constant 0 : index
    %c0_14 = arith.constant 0 : index
    %76 = vector.load %arg5[%c0_13, %c0_14] : memref<1x8xf32, #tpu.memory_space<vmem>>, vector<1x8xf32>
    %77 = arith.addf %75, %76 : vector<1x8xf32>
    %78 = arith.negf %77 : vector<1x8xf32>
    %79 = math.exp %78 : vector<1x8xf32>
    %cst_15 = arith.constant 1.000000e+00 : f32
    %80 = vector.broadcast %cst_15 : f32 to vector<1x8xf32>
    %81 = arith.addf %80, %79 : vector<1x8xf32>
    %82 = arith.divf %80, %81 : vector<1x8xf32>
    %83 = arith.mulf %77, %82 : vector<1x8xf32>
    %c0_16 = arith.constant 0 : index
    %c0_17 = arith.constant 0 : index
    %84 = vector.load %arg6[%c0_16, %c0_17] : memref<8x128xf32, #tpu.memory_space<vmem>>, vector<8x128xf32>
    %cst_18 = arith.constant dense<0.000000e+00> : vector<1x128xf32>
    %85 = tpu.matmul %83, %84, %cst_18 {dimension_numbers = #tpu.dot_dimension_numbers<[1], [0], [0], [1], [0, 0, 1, 1], [], []>} : vector<1x8xf32>, vector<8x128xf32>, vector<1x128xf32> -> vector<1x128xf32>
    %c0_19 = arith.constant 0 : index
    %c0_20 = arith.constant 0 : index
    %86 = vector.load %arg7[%c0_19, %c0_20] : memref<1x128xf32, #tpu.memory_space<vmem>>, vector<1x128xf32>
    %87 = arith.addf %85, %86 : vector<1x128xf32>
    %88 = arith.negf %87 : vector<1x128xf32>
    %89 = math.exp %88 : vector<1x128xf32>
    %cst_21 = arith.constant 1.000000e+00 : f32
    %90 = vector.broadcast %cst_21 : f32 to vector<1x128xf32>
    %91 = arith.addf %90, %89 : vector<1x128xf32>
    %92 = arith.divf %90, %91 : vector<1x128xf32>
    %93 = vector.broadcast %92 : vector<1x128xf32> to vector<256x128xf32>
    %94 = arith.mulf %69, %93 : vector<256x128xf32>
    %95 = arith.truncf %94 : vector<256x128xf32> to vector<256x128xbf16>
    %c0_22 = arith.constant 0 : index
    %c0_23 = arith.constant 0 : index
    %c0_24 = arith.constant 0 : index
    %96 = vector.load %arg8[%c0_22, %c0_23, %c0_24] : memref<1x256x128xbf16, #tpu.memory_space<vmem>>, vector<1x256x128xbf16>
    %97 = vector.shape_cast %96 : vector<1x256x128xbf16> to vector<256x128xbf16>
    %98 = vector.shape_cast %95 : vector<256x128xbf16> to vector<1x256x128xbf16>
    tpu.vector_store %arg8[%c0_22, %c0_23, %c0_24], %98 {strides = array<i32>} : memref<1x256x128xbf16, #tpu.memory_space<vmem>>, vector<1x256x128xbf16>,
    return
  }
  func.func @transform_0(%arg0: i32) -> (i32, i32, i32, i32) {
    %c0_i32 = arith.constant 0 : i32
    %c0_i32_0 = arith.constant 0 : i32
    %c0_i32_1 = arith.constant 0 : i32
    %c0_i32_2 = arith.constant 0 : i32
    return %arg0, %c0_i32, %c0_i32_0, %c0_i32_1 : i32, i32, i32, i32
  }
  func.func @transform_1(%arg0: i32) -> (i32, i32) {
    %c0_i32 = arith.constant 0 : i32
    %c0_i32_0 = arith.constant 0 : i32
    %c0_i32_1 = arith.constant 0 : i32
    return %c0_i32, %c0_i32_0 : i32, i32
  }
  func.func @transform_2(%arg0: i32) -> (i32, i32) {
    %c0_i32 = arith.constant 0 : i32
    %c0_i32_0 = arith.constant 0 : i32
    %c0_i32_1 = arith.constant 0 : i32
    return %c0_i32, %c0_i32_0 : i32, i32
  }
  func.func @transform_3(%arg0: i32) -> (i32, i32) {
    %c0_i32 = arith.constant 0 : i32
    %c0_i32_0 = arith.constant 0 : i32
    %c0_i32_1 = arith.constant 0 : i32
    return %c0_i32, %c0_i32_0 : i32, i32
  }
  func.func @transform_4(%arg0: i32) -> (i32, i32) {
    %c0_i32 = arith.constant 0 : i32
    %c0_i32_0 = arith.constant 0 : i32
    %c0_i32_1 = arith.constant 0 : i32
    return %c0_i32, %c0_i32_0 : i32, i32
  }
  func.func @transform_5(%arg0: i32) -> (i32, i32) {
    %c0_i32 = arith.constant 0 : i32
    %c0_i32_0 = arith.constant 0 : i32
    %c0_i32_1 = arith.constant 0 : i32
    return %c0_i32, %c0_i32_0 : i32, i32
  }
  func.func @transform_6(%arg0: i32) -> (i32, i32) {
    %c0_i32 = arith.constant 0 : i32
    %c0_i32_0 = arith.constant 0 : i32
    %c0_i32_1 = arith.constant 0 : i32
    return %c0_i32, %c0_i32_0 : i32, i32
  }
  func.func @transform_7(%arg0: i32) -> (i32, i32, i32) {
    %c0_i32 = arith.constant 0 : i32
    %c0_i32_0 = arith.constant 0 : i32
    %c0_i32_1 = arith.constant 0 : i32
    return %arg0, %c0_i32, %c0_i32_0 : i32, i32, i32
  }
}

module attributes {stable_mosaic.version = 11 : i64} {
  func.func @_proj_head_pool_fc_kernel(%arg0: i32, %arg1: i32, %arg2: memref<1x128x128xbf16, #tpu.memory_space<vmem>>, %arg3: memref<1x128x32xf32, #tpu.memory_space<vmem>>, %arg4: memref<128x32xbf16, #tpu.memory_space<vmem>>, %arg5: memref<1x32xf32, #tpu.memory_space<vmem>>, %arg6: memref<32x256xbf16, #tpu.memory_space<vmem>>, %arg7: memref<1x256xf32, #tpu.memory_space<vmem>>, %arg8: memref<256x4xf32, #tpu.memory_space<vmem>>, %arg9: memref<1x4xf32, #tpu.memory_space<vmem>>, %arg10: memref<1x1x4xf32, #tpu.memory_space<vmem>>, %arg11: memref<1x256xf32, #tpu.memory_space<vmem>>) attributes {dimension_semantics = [#tpu.dimension_semantics<parallel>, #tpu.dimension_semantics<arbitrary>], iteration_bounds = array<i64: 2, 2>, scalar_prefetch = 0 : i64, scratch_operands = 1 : i64, tpu.core_type = #tpu.core_type<tc>, window_params = [{transform_indices = @transform_0, window_bounds = array<i64: 1, 128, 128>}, {transform_indices = @transform_1, window_bounds = array<i64: 1, 128, 32>}, {pipeline_mode = #tpu.pipeline_mode<synchronous>, transform_indices = @transform_2, window_bounds = array<i64: 128, 32>}, {pipeline_mode = #tpu.pipeline_mode<synchronous>, transform_indices = @transform_3, window_bounds = array<i64: 1, 32>}, {pipeline_mode = #tpu.pipeline_mode<synchronous>, transform_indices = @transform_4, window_bounds = array<i64: 32, 256>}, {pipeline_mode = #tpu.pipeline_mode<synchronous>, transform_indices = @transform_5, window_bounds = array<i64: 1, 256>}, {pipeline_mode = #tpu.pipeline_mode<synchronous>, transform_indices = @transform_6, window_bounds = array<i64: 256, 4>}, {pipeline_mode = #tpu.pipeline_mode<synchronous>, transform_indices = @transform_7, window_bounds = array<i64: 1, 4>}, {transform_indices = @transform_8, window_bounds = array<i64: 1, 1, 4>}]} {
    %c0_i32 = arith.constant 0 : i32
    %0 = arith.cmpi eq, %arg1, %c0_i32 : i32
    %1 = arith.extui %0 : i1 to i32
    %c0_i32_0 = arith.constant 0 : i32
    %2 = arith.cmpi ne, %1, %c0_i32_0 : i32
    scf.if %2 {
      %cst_22 = arith.constant 0.000000e+00 : f32
      %33 = vector.broadcast %cst_22 : f32 to vector<1x256xf32>
      %c0_23 = arith.constant 0 : index
      %c0_24 = arith.constant 0 : index
      %34 = vector.load %arg11[%c0_23, %c0_24] : memref<1x256xf32, #tpu.memory_space<vmem>>, vector<1x256xf32>
      tpu.vector_store %arg11[%c0_23, %c0_24], %33 {strides = array<i32>} : memref<1x256xf32, #tpu.memory_space<vmem>>, vector<1x256xf32>,
    } else {
    }
    %c0 = arith.constant 0 : index
    %c0_1 = arith.constant 0 : index
    %c0_2 = arith.constant 0 : index
    %3 = vector.load %arg2[%c0, %c0_1, %c0_2] : memref<1x128x128xbf16, #tpu.memory_space<vmem>>, vector<1x128x128xbf16>
    %4 = vector.shape_cast %3 : vector<1x128x128xbf16> to vector<128x128xbf16>
    %c0_3 = arith.constant 0 : index
    %c0_4 = arith.constant 0 : index
    %5 = vector.load %arg4[%c0_3, %c0_4] : memref<128x32xbf16, #tpu.memory_space<vmem>>, vector<128x32xbf16>
    %cst = arith.constant dense<0.000000e+00> : vector<128x32xf32>
    %6 = tpu.matmul %4, %5, %cst {dimension_numbers = #tpu.dot_dimension_numbers<[1], [0], [0], [1], [0, 0, 1, 1], [], []>} : vector<128x128xbf16>, vector<128x32xbf16>, vector<128x32xf32> -> vector<128x32xf32>
    %c0_5 = arith.constant 0 : index
    %c0_6 = arith.constant 0 : index
    %7 = vector.load %arg5[%c0_5, %c0_6] : memref<1x32xf32, #tpu.memory_space<vmem>>, vector<1x32xf32>
    %8 = vector.broadcast %7 : vector<1x32xf32> to vector<128x32xf32>
    %9 = arith.addf %6, %8 : vector<128x32xf32>
    %c0_7 = arith.constant 0 : index
    %c0_8 = arith.constant 0 : index
    %c0_9 = arith.constant 0 : index
    %10 = vector.load %arg3[%c0_7, %c0_8, %c0_9] : memref<1x128x32xf32, #tpu.memory_space<vmem>>, vector<1x128x32xf32>
    %11 = vector.shape_cast %10 : vector<1x128x32xf32> to vector<128x32xf32>
    %12 = arith.addf %9, %11 : vector<128x32xf32>
    %13 = arith.truncf %12 : vector<128x32xf32> to vector<128x32xbf16>
    %c0_10 = arith.constant 0 : index
    %c0_11 = arith.constant 0 : index
    %14 = vector.load %arg6[%c0_10, %c0_11] : memref<32x256xbf16, #tpu.memory_space<vmem>>, vector<32x256xbf16>
    %cst_12 = arith.constant dense<0.000000e+00> : vector<128x256xf32>
    %15 = tpu.matmul %13, %14, %cst_12 {dimension_numbers = #tpu.dot_dimension_numbers<[1], [0], [0], [1], [0, 0, 1, 1], [], []>} : vector<128x32xbf16>, vector<32x256xbf16>, vector<128x256xf32> -> vector<128x256xf32>
    %c0_13 = arith.constant 0 : index
    %c0_14 = arith.constant 0 : index
    %16 = vector.load %arg7[%c0_13, %c0_14] : memref<1x256xf32, #tpu.memory_space<vmem>>, vector<1x256xf32>
    %17 = vector.broadcast %16 : vector<1x256xf32> to vector<128x256xf32>
    %18 = arith.addf %15, %17 : vector<128x256xf32>
    %19 = arith.negf %18 : vector<128x256xf32>
    %20 = math.exp %19 : vector<128x256xf32>
    %cst_15 = arith.constant 1.000000e+00 : f32
    %21 = vector.broadcast %cst_15 : f32 to vector<128x256xf32>
    %22 = arith.addf %21, %20 : vector<128x256xf32>
    %23 = arith.divf %21, %22 : vector<128x256xf32>
    %24 = arith.mulf %18, %23 : vector<128x256xf32>
    %c0_16 = arith.constant 0 : index
    %c0_17 = arith.constant 0 : index
    %25 = vector.load %arg11[%c0_16, %c0_17] : memref<1x256xf32, #tpu.memory_space<vmem>>, vector<1x256xf32>
    %cst_18 = arith.constant dense<0.000000e+00> : vector<256xf32>
    %26 = vector.multi_reduction <add>, %24, %cst_18 [0] : vector<128x256xf32> to vector<256xf32>
    %27 = vector.shape_cast %26 : vector<256xf32> to vector<1x256xf32>
    %28 = arith.addf %25, %27 : vector<1x256xf32>
    %c0_19 = arith.constant 0 : index
    %c0_20 = arith.constant 0 : index
    %29 = vector.load %arg11[%c0_19, %c0_20] : memref<1x256xf32, #tpu.memory_space<vmem>>, vector<1x256xf32>
    tpu.vector_store %arg11[%c0_19, %c0_20], %28 {strides = array<i32>} : memref<1x256xf32, #tpu.memory_space<vmem>>, vector<1x256xf32>,
    %c1_i32 = arith.constant 1 : i32
    %30 = arith.cmpi eq, %arg1, %c1_i32 : i32
    %31 = arith.extui %30 : i1 to i32
    %c0_i32_21 = arith.constant 0 : i32
    %32 = arith.cmpi ne, %31, %c0_i32_21 : i32
    scf.if %32 {
      %c0_22 = arith.constant 0 : index
      %c0_23 = arith.constant 0 : index
      %33 = vector.load %arg11[%c0_22, %c0_23] : memref<1x256xf32, #tpu.memory_space<vmem>>, vector<1x256xf32>
      %cst_24 = arith.constant 3.906250e-03 : f32
      %34 = vector.broadcast %cst_24 : f32 to vector<1x256xf32>
      %35 = arith.mulf %33, %34 : vector<1x256xf32>
      %c0_25 = arith.constant 0 : index
      %c0_26 = arith.constant 0 : index
      %36 = vector.load %arg8[%c0_25, %c0_26] : memref<256x4xf32, #tpu.memory_space<vmem>>, vector<256x4xf32>
      %cst_27 = arith.constant dense<0.000000e+00> : vector<1x4xf32>
      %37 = tpu.matmul %35, %36, %cst_27 {dimension_numbers = #tpu.dot_dimension_numbers<[1], [0], [0], [1], [0, 0, 1, 1], [], []>} : vector<1x256xf32>, vector<256x4xf32>, vector<1x4xf32> -> vector<1x4xf32>
      %c0_28 = arith.constant 0 : index
      %c0_29 = arith.constant 0 : index
      %38 = vector.load %arg9[%c0_28, %c0_29] : memref<1x4xf32, #tpu.memory_space<vmem>>, vector<1x4xf32>
      %39 = arith.addf %37, %38 : vector<1x4xf32>
      %c0_30 = arith.constant 0 : index
      %c0_31 = arith.constant 0 : index
      %c0_32 = arith.constant 0 : index
      %40 = vector.load %arg10[%c0_30, %c0_31, %c0_32] : memref<1x1x4xf32, #tpu.memory_space<vmem>>, vector<1x1x4xf32>
      %41 = vector.shape_cast %40 : vector<1x1x4xf32> to vector<1x4xf32>
      %42 = vector.shape_cast %39 : vector<1x4xf32> to vector<1x1x4xf32>
      tpu.vector_store %arg10[%c0_30, %c0_31, %c0_32], %42 {strides = array<i32>} : memref<1x1x4xf32, #tpu.memory_space<vmem>>, vector<1x1x4xf32>,
    } else {
    }
    return
  }
  func.func @transform_0(%arg0: i32, %arg1: i32) -> (i32, i32, i32) {
    %c0_i32 = arith.constant 0 : i32
    %c0_i32_0 = arith.constant 0 : i32
    return %arg0, %arg1, %c0_i32 : i32, i32, i32
  }
  func.func @transform_1(%arg0: i32, %arg1: i32) -> (i32, i32, i32) {
    %c0_i32 = arith.constant 0 : i32
    %c0_i32_0 = arith.constant 0 : i32
    return %arg0, %arg1, %c0_i32 : i32, i32, i32
  }
  func.func @transform_2(%arg0: i32, %arg1: i32) -> (i32, i32) {
    %c0_i32 = arith.constant 0 : i32
    %c0_i32_0 = arith.constant 0 : i32
    %c0_i32_1 = arith.constant 0 : i32
    return %c0_i32, %c0_i32_0 : i32, i32
  }
  func.func @transform_3(%arg0: i32, %arg1: i32) -> (i32, i32) {
    %c0_i32 = arith.constant 0 : i32
    %c0_i32_0 = arith.constant 0 : i32
    %c0_i32_1 = arith.constant 0 : i32
    return %c0_i32, %c0_i32_0 : i32, i32
  }
  func.func @transform_4(%arg0: i32, %arg1: i32) -> (i32, i32) {
    %c0_i32 = arith.constant 0 : i32
    %c0_i32_0 = arith.constant 0 : i32
    %c0_i32_1 = arith.constant 0 : i32
    return %c0_i32, %c0_i32_0 : i32, i32
  }
  func.func @transform_5(%arg0: i32, %arg1: i32) -> (i32, i32) {
    %c0_i32 = arith.constant 0 : i32
    %c0_i32_0 = arith.constant 0 : i32
    %c0_i32_1 = arith.constant 0 : i32
    return %c0_i32, %c0_i32_0 : i32, i32
  }
  func.func @transform_6(%arg0: i32, %arg1: i32) -> (i32, i32) {
    %c0_i32 = arith.constant 0 : i32
    %c0_i32_0 = arith.constant 0 : i32
    %c0_i32_1 = arith.constant 0 : i32
    return %c0_i32, %c0_i32_0 : i32, i32
  }
  func.func @transform_7(%arg0: i32, %arg1: i32) -> (i32, i32) {
    %c0_i32 = arith.constant 0 : i32
    %c0_i32_0 = arith.constant 0 : i32
    %c0_i32_1 = arith.constant 0 : i32
    return %c0_i32, %c0_i32_0 : i32, i32
  }
  func.func @transform_8(%arg0: i32, %arg1: i32) -> (i32, i32, i32) {
    %c0_i32 = arith.constant 0 : i32
    %c0_i32_0 = arith.constant 0 : i32
    %c0_i32_1 = arith.constant 0 : i32
    return %arg0, %c0_i32, %c0_i32_0 : i32, i32, i32
  }
}

</mosaic_0001>

<bundles_post_ra>
// kernel: customized_ens_forward.3
= control target key start
LH: loop header
LB: loop body
LE: loop exit
PB: predicated region body
PF: predicated region fallthrough
CT: control target
= control target key end

     0   :  { %s2318_s21 = smov 0   ;;  %s2822_s0 = inlined_call_operand.vmem [shape: bf16[512,32], index: 0, kind: input, shape index: {}]   ;;  %s2823_s1 = inlined_call_operand.vmem [shape: bf16[32,32], index: 1, kind: input, shape index: {}]   ;;  %s2824_s2 = inlined_call_operand.vmem [shape: f32[1,32], index: 2, kind: input, shape index: {}]   ;;  %s2825_s3 = inlined_call_operand.vmem [shape: bf16[32,128], index: 3, kind: input, shape index: {}]   ;;  %s2826_s4 = inlined_call_operand.vmem [shape: f32[1,128], index: 4, kind: input, shape index: {}]   ;;  %s2827_s5 = inlined_call_operand.vmem [shape: f32[512,32], index: 5, kind: output, shape index: {0}]   ;;  %s2828_s6 = inlined_call_operand.vmem [shape: bf16[512,128], index: 6, kind: output, shape index: {1}]  }
   0x1 LB: > { %s1593_s22 = sadd.s32 4294967295, %s2281_s21   ;;  %p1597_p0 = scmp.ge.s32.totalorder %s2281_s21, 1  ;;  %s2281_s21 = sphi %s2318_s21, %s17_s21  }
   0x2   : > { %p216_p1 = scmp.lt.s32.totalorder %s2281_s21, 3 }
   0x4   : > { %p217_p2 = pnand %p1597_p0, %p216_p1 }
   0x5   : > { %v1999_v0 = vld [vmem:[%s2823_s1] sm:$0xff] (!%p217_p2)   ;;  %s1598_s25 = sshll.u32 (!%p217_p2), %s1593_s22, 5  ;;  %v2000_v1 = vld [vmem:[%s2823_s1 + $0x8] sm:$0xff] (!%p217_p2)   ;;  %vm405_vm0 = vcmask (!%p217_p2), 261120  }
   0x6   : > { %220 = sbr.rel (%p217_p2) target bundleno = 573 (0x23d), region = 40  ;;  %p252_p3 = scmp.lt.s32.totalorder (!%p217_p2), %s1598_s25, 63  ;;  %1919 = vmatprep.subr.bf16.mxu0 (!%p217_p2), %v1999_v0  ;;  %v2017_v18 = vld [vmem:[%s2825_s3] sm:$0xff] (!%p217_p2)   ;;  %v2018_v19 = vld [vmem:[%s2825_s3 + $0x8] sm:$0xff] (!%p217_p2)  }
   0x7   : > { %1920 = vmatpush3.bf16.msra.mxu0 (!%p217_p2), %v1999_v0  ;;  %1955 = vmatprep.subr.bf16.mxu1 (!%p217_p2), %v2017_v18  ;;  %v2383_v20 = vld [vmem:[%s2824_s2] ss:$0 sm:$0xff] (!%p217_p2) }
   0x8   : > { %1921 = vmatprep.subr.bf16.mxu0 (!%p217_p2), %v2000_v1  ;;  %1956 = vmatpush3.bf16.msra.mxu1 (!%p217_p2), %v2017_v18 }
   0x9   : > { %1957 = vmatprep.subr.bf16.mxu1 (!%p217_p2), %v2018_v19 }
   0xb   : > { %1922 = vmatpush3.bf16.msra.mxu0 (!%p217_p2), %v2000_v1 }
   0xc   : > { %1958 = vmatpush3.bf16.msra.mxu1 (!%p217_p2), %v2018_v19 }
   0xd   : > { %s2830_s25 = smov (!%p252_p3, %s1598_s25), 63 }
   0xe   : > { %s1599_s28 = sshll.u32 %s2830_s25, 2  ;;  %s1601_s14 = sshll.u32 %s2830_s25, 3 }
   0xf   : > { %s2340_s7 = scalar_lea.vmem %s2822_s0, %s1599_s28  ;;  %s2447_s17 = scalar_lea.vmem %s2827_s5, %s1601_s14 }
  0x10   : > { %v2001_v2 = vld [vmem:[%s2340_s7] sm:$0xff]   ;;  %v2002_v3 = vld [vmem:[%s2340_s7 + $0x8] sm:$0xff]   ;;  %v2003_v4 = vld [vmem:[%s2340_s7 + $0x10] sm:$0xff]   ;;  %s2708_s23 = scalar_lea.vmem %s2828_s6, %s1599_s28 }
  0x11   : > { %1923 = vmatprep.mubr.msk.bf16.mxu0 %vm405_vm0, %v2001_v2  ;;  %v2004_v5 = vld [vmem:[%s2340_s7 + $0x18] sm:$0xff]   ;;  %v2005_v6 = vld [vmem:[%s2340_s7 + $0x20] sm:$0xff]   ;;  %v2006_v7 = vld [vmem:[%s2340_s7 + $0x28] sm:$0xff]  }
  0x12   : > { %1924 = vmatmul.mubr.msk.bf16.vlgmr.msra.gmra.mrb[0].mxu0 %vm405_vm0, %v2002_v3  ;;  %v2007_v8 = vld [vmem:[%s2340_s7 + $0x30] sm:$0xff]   ;;  %v2008_v9 = vld [vmem:[%s2340_s7 + $0x38] sm:$0xff]   ;;  %v2009_v10 = vld [vmem:[%s2340_s7 + $0x40] sm:$0xff]  }
  0x13   : > { %1927 = vmatprep.mubr.msk.bf16.mxu0 %vm405_vm0, %v2003_v4  ;;  %v2010_v11 = vld [vmem:[%s2340_s7 + $0x48] sm:$0xff]   ;;  %v2011_v12 = vld [vmem:[%s2340_s7 + $0x50] sm:$0xff]   ;;  %v2012_v13 = vld [vmem:[%s2340_s7 + $0x58] sm:$0xff]  }
  0x14   : > { %v2013_v14 = vld [vmem:[%s2340_s7 + $0x60] sm:$0xff]   ;;  %v2014_v15 = vld [vmem:[%s2340_s7 + $0x68] sm:$0xff]   ;;  %v2015_v16 = vld [vmem:[%s2340_s7 + $0x70] sm:$0xff]  }
  0x15   : > { %v2016_v17 = vld [vmem:[%s2340_s7 + $0x78] sm:$0xff]  }
  0x1a   : > { %1928 = vmatmul.mubr.msk.bf16.gmra.mrb[4].mxu0 %vm405_vm0, %v2004_v5 }
  0x1b   : > { %1931 = vmatprep.mubr.msk.bf16.mxu0 %vm405_vm0, %v2005_v6 }
  0x22   : > { %1932 = vmatmul.mubr.msk.bf16.gmra.mrb[8].mxu0 %vm405_vm0, %v2006_v7 }
  0x23   : > { %1935 = vmatprep.mubr.msk.bf16.mxu0 %vm405_vm0, %v2007_v8 }
  0x2a   : > { %1936 = vmatmul.mubr.msk.bf16.gmra.mrb[12].mxu0 %vm405_vm0, %v2008_v9 }
  0x2b   : > { %1939 = vmatprep.mubr.msk.bf16.mxu0 %vm405_vm0, %v2009_v10 }
  0x32   : > { %1940 = vmatmul.mubr.msk.bf16.gmra.mrb[16].mxu0 %vm405_vm0, %v2010_v11 }
  0x33   : > { %1943 = vmatprep.mubr.msk.bf16.mxu0 %vm405_vm0, %v2011_v12 }
  0x3a   : > { %1944 = vmatmul.mubr.msk.bf16.gmra.mrb[20].mxu0 %vm405_vm0, %v2012_v13 }
  0x3b   : > { %1947 = vmatprep.mubr.msk.bf16.mxu0 %vm405_vm0, %v2013_v14 }
  0x42   : > { %1948 = vmatmul.mubr.msk.bf16.gmra.mrb[24].mxu0 %vm405_vm0, %v2014_v15 }
  0x43   : > { %1951 = vmatprep.mubr.msk.bf16.mxu0 %vm405_vm0, %v2015_v16 }
  0x4a   : > { %1952 = vmatmul.mubr.msk.bf16.gmra.mrb[28].mxu0 %vm405_vm0, %v2016_v17 }
  0xe5   : > { %v1925_v21 = vpop.f32.mrb[0].mxu0 }
  0xe6   : > { %v2386_v22 = vadd.f32 %v1925_v21, %v2383_v20  ;;  %v488_v23 = vpop.f32.mrb[1].mxu0 }
  0xe7   : > { %v2389_v24 = vadd.f32 %v2383_v20, %v488_v23  ;;  %v1926_v25 = vpop.f32.mrb[2].mxu0 }
  0xe8   : > { %v1641_v26 = vmul.f32 -1.442695, %v2386_v22  ;;  %v2393_v27 = vadd.f32 %v1926_v25, %v2383_v20  ;;  %v491_v28 = vpop.f32.mrb[3].mxu0 }
  0xe9   : > { %v1639_v29 = vmul.f32 -1.442695, %v2389_v24  ;;  %v2397_v30 = vadd.f32 %v2383_v20, %v491_v28 }
  0xea   : > { %2019 = vpow2.f32 %v1641_v26  ;;  %v1642_v31 = vmul.f32 -1.442695, %v2393_v27 }
  0xeb   : > { %2021 = vpow2.f32 %v1639_v29  ;;  %v1640_v32 = vmul.f32 -1.442695, %v2397_v30 }
  0xec   : > { %2023 = vpow2.f32 %v1642_v31 }
  0xed   : > { %2025 = vpow2.f32 %v1640_v32  ;;  %v1929_v33 = vpop.f32.mrb[4].mxu0 }
  0xee   : > { %v2402_v34 = vadd.f32 %v1929_v33, %v2383_v20  ;;  %v504_v35 = vpop.f32.mrb[5].mxu0 }
  0xef   : > { %v2405_v36 = vadd.f32 %v2383_v20, %v504_v35  ;;  %v1930_v37 = vpop.f32.mrb[6].mxu0 }
  0xf0   : > { %v1645_v38 = vmul.f32 -1.442695, %v2402_v34  ;;  %v2409_v39 = vadd.f32 %v1930_v37, %v2383_v20  ;;  %v507_v40 = vpop.f32.mrb[7].mxu0 }
  0xf1   : > { %v1643_v41 = vmul.f32 -1.442695, %v2405_v36  ;;  %v2413_v42 = vadd.f32 %v2383_v20, %v507_v40 }
  0xf2   : > { %2027 = vpow2.f32 %v1645_v38  ;;  %v1646_v43 = vmul.f32 -1.442695, %v2409_v39 }
  0xf3   : > { %2029 = vpow2.f32 %v1643_v41  ;;  %v1644_v44 = vmul.f32 -1.442695, %v2413_v42 }
  0xf4   : > { %v2020_v45 = vpop.eup %2019  ;;  %2031 = vpow2.f32 %v1646_v43 }
  0xf5   : > { %v2022_v46 = vpop.eup %2021  ;;  %v713_v47 = vadd.f32 1.0, %v2020_v45  ;;  %2033 = vpow2.f32 %v1644_v44  ;;  %v1933_v48 = vpop.f32.mrb[8].mxu0 }
  0xf6   : > { %v2024_v49 = vpop.eup %2023  ;;  %v711_v50 = vadd.f32 1.0, %v2022_v46  ;;  %v2418_v51 = vadd.f32 %v1933_v48, %v2383_v20  ;;  %v520_v52 = vpop.f32.mrb[9].mxu0 }
  0xf7   : > { %v2026_v53 = vpop.eup %2025  ;;  %2035 = vrcp.f32 %v713_v47  ;;  %v714_v54 = vadd.f32 1.0, %v2024_v49  ;;  %v2421_v55 = vadd.f32 %v2383_v20, %v520_v52  ;;  %v1934_v56 = vpop.f32.mrb[10].mxu0 }
  0xf8   : > { %2037 = vrcp.f32 %v711_v50  ;;  %v712_v57 = vadd.f32 1.0, %v2026_v53  ;;  %v1649_v58 = vmul.f32 -1.442695, %v2418_v51  ;;  %v2425_v59 = vadd.f32 %v1934_v56, %v2383_v20  ;;  %v523_v60 = vpop.f32.mrb[11].mxu0 }
  0xf9   : > { %2039 = vrcp.f32 %v714_v54  ;;  %v1647_v61 = vmul.f32 -1.442695, %v2421_v55  ;;  %v2429_v62 = vadd.f32 %v2383_v20, %v523_v60 }
  0xfa   : > { %2041 = vrcp.f32 %v712_v57  ;;  %v1650_v63 = vmul.f32 -1.442695, %v2425_v59 }
  0xfb   : > { %2043 = vpow2.f32 %v1649_v58  ;;  %v1648_v0 = vmul.f32 -1.442695, %v2429_v62 }
  0xfc   : > { %v2028_v1 = vpop.eup %2027  ;;  %2045 = vpow2.f32 %v1647_v61 }
  0xfd   : > { %v2030_v2 = vpop.eup %2029  ;;  %v717_v3 = vadd.f32 1.0, %v2028_v1  ;;  %2047 = vpow2.f32 %v1650_v63  ;;  %v1937_v4 = vpop.f32.mrb[12].mxu0 }
  0xfe   : > { %v2032_v5 = vpop.eup %2031  ;;  %v715_v6 = vadd.f32 1.0, %v2030_v2  ;;  %2049 = vpow2.f32 %v1648_v0  ;;  %v2435_v7 = vadd.f32 %v1937_v4, %v2383_v20  ;;  %v536_v8 = vpop.f32.mrb[13].mxu0 }
  0xff   : > { %v2034_v9 = vpop.eup %2033  ;;  %2051 = vrcp.f32 %v717_v3  ;;  %v718_v10 = vadd.f32 1.0, %v2032_v5  ;;  %v2438_v11 = vadd.f32 %v2383_v20, %v536_v8  ;;  %v1938_v12 = vpop.f32.mrb[14].mxu0 }
 0x100   : > { %2053 = vrcp.f32 %v715_v6  ;;  %v716_v13 = vadd.f32 1.0, %v2034_v9  ;;  %v1653_v14 = vmul.f32 -1.442695, %v2435_v7  ;;  %v2442_v15 = vadd.f32 %v1938_v12, %v2383_v20  ;;  %v539_v16 = vpop.f32.mrb[15].mxu0 }
 0x101   : > { %v2036_v17 = vpop.eup %2035  ;;  %2055 = vrcp.f32 %v718_v10  ;;  %v1651_v18 = vmul.f32 -1.442695, %v2438_v11  ;;  %v2451_v19 = vadd.f32 %v2383_v20, %v539_v16 }
 0x102   : > { %v2038_v21 = vpop.eup %2037  ;;  %v809_v23 = vmul.f32 %v2036_v17, %v2386_v22  ;;  %2057 = vrcp.f32 %v716_v13  ;;  %v1654_v25 = vmul.f32 -1.442695, %v2442_v15 }
 0x103   : > { %v2040_v26 = vpop.eup %2039  ;;  %v807_v28 = vmul.f32 %v2038_v21, %v2389_v24  ;;  %2059 = vpow2.f32 %v1653_v14  ;;  %v1652_v29 = vmul.f32 -1.442695, %v2451_v19 }
 0x104   : > { %v2042_v31 = vpop.eup %2041  ;;  %841 = vst.msk [vmem:[%s2447_s17 + $0x10] sm:$0xff] %vm405_vm0, %v809_v23  ;;  %v810_v32 = vmul.f32 %v2040_v26, %v2393_v27  ;;  %2061 = vpow2.f32 %v1651_v18 }
 0x105   : > { %v2044_v33 = vpop.eup %2043  ;;  %839 = vst.msk [vmem:[%s2447_s17] sm:$0xff] %vm405_vm0, %v807_v28  ;;  %v808_v22 = vmul.f32 %v2042_v31, %v2397_v30  ;;  %2063 = vpow2.f32 %v1654_v25  ;;  %v1941_v35 = vpop.f32.mrb[16].mxu0 }
 0x106   : > { %v2046_v37 = vpop.eup %2045  ;;  %842 = vst.msk [vmem:[%s2447_s17 + $0x18] sm:$0xff] %vm405_vm0, %v810_v32  ;;  %v872_v24 = vpack.c.bf16 %v810_v32, %v809_v23  ;;  %v721_v38 = vadd.f32 1.0, %v2044_v33  ;;  %2065 = vpow2.f32 %v1652_v29  ;;  %v2466_v40 = vadd.f32 %v1941_v35, %v2383_v20  ;;  %v552_v41 = vpop.f32.mrb[17].mxu0 }
 0x107   : > { %v2048_v43 = vpop.eup %2047  ;;  %840 = vst.msk [vmem:[%s2447_s17 + $0x8] sm:$0xff] %vm405_vm0, %v808_v22  ;;  %v719_v27 = vadd.f32 1.0, %v2046_v37  ;;  %v2471_v44 = vadd.f32 %v2383_v20, %v552_v41  ;;  %v1942_v30 = vpop.f32.mrb[18].mxu0  ;;  %v871_v45 = vpack.c.bf16 %v808_v22, %v807_v28 }
 0x108   : > { %v2050_v46 = vpop.eup %2049  ;;  %2067 = vrcp.f32 %v721_v38  ;;  %v722_v47 = vadd.f32 1.0, %v2048_v43  ;;  %v1657_v48 = vmul.f32 -1.442695, %v2466_v40  ;;  %v2475_v49 = vadd.f32 %v1942_v30, %v2383_v20  ;;  %v555_v50 = vpop.f32.mrb[19].mxu0 }
 0x109   : > { %v2052_v52 = vpop.eup %2051  ;;  %2069 = vrcp.f32 %v719_v27  ;;  %v720_v53 = vadd.f32 1.0, %v2050_v46  ;;  %v1655_v54 = vmul.f32 -1.442695, %v2471_v44  ;;  %v2479_v56 = vadd.f32 %v2383_v20, %v555_v50  ;;  %1959 = vmatprep.mubr.msk.bf16.mxu1 %vm405_vm0, %v871_v45 }
 0x10a   : > { %v2054_v57 = vpop.eup %2053  ;;  %v813_v58 = vmul.f32 %v2052_v52, %v2402_v34  ;;  %2071 = vrcp.f32 %v722_v47  ;;  %v1658_v60 = vmul.f32 -1.442695, %v2475_v49  ;;  %1960 = vmatmul.mubr.msk.bf16.vlgmr.msra.gmra.mrb[0].mxu1 %vm405_vm0, %v872_v24 }
 0x10b   : > { %v2056_v61 = vpop.eup %2055  ;;  %v811_v63 = vmul.f32 %v2054_v57, %v2405_v36  ;;  %2073 = vrcp.f32 %v720_v53  ;;  %v1656_v0 = vmul.f32 -1.442695, %v2479_v56 }
 0x10c   : > { %v2058_v1 = vpop.eup %2057  ;;  %845 = vst.msk [vmem:[%s2447_s17 + $0x30] sm:$0xff] %vm405_vm0, %v813_v58  ;;  %v814_v2 = vmul.f32 %v2056_v61, %v2409_v39  ;;  %2075 = vpow2.f32 %v1657_v48 }
 0x10d   : > { %v2060_v34 = vpop.eup %2059  ;;  %843 = vst.msk [vmem:[%s2447_s17 + $0x20] sm:$0xff] %vm405_vm0, %v811_v63  ;;  %v812_v3 = vmul.f32 %v2058_v1, %v2413_v42  ;;  %2077 = vpow2.f32 %v1655_v54  ;;  %v1945_v4 = vpop.f32.mrb[20].mxu0 }
 0x10e   : > { %v2062_v5 = vpop.eup %2061  ;;  %846 = vst.msk [vmem:[%s2447_s17 + $0x38] sm:$0xff] %vm405_vm0, %v814_v2  ;;  %v874_v36 = vpack.c.bf16 %v814_v2, %v813_v58  ;;  %v725_v6 = vadd.f32 1.0, %v2060_v34  ;;  %2079 = vpow2.f32 %v1658_v60  ;;  %v2496_v8 = vadd.f32 %v1945_v4, %v2383_v20  ;;  %v568_v9 = vpop.f32.mrb[21].mxu0 }
 0x10f   : > { %v2064_v10 = vpop.eup %2063  ;;  %844 = vst.msk [vmem:[%s2447_s17 + $0x28] sm:$0xff] %vm405_vm0, %v812_v3  ;;  %v873_v39 = vpack.c.bf16 %v812_v3, %v811_v63  ;;  %v723_v12 = vadd.f32 1.0, %v2062_v5  ;;  %2081 = vpow2.f32 %v1656_v0  ;;  %v2501_v42 = vadd.f32 %v2383_v20, %v568_v9  ;;  %v1946_v13 = vpop.f32.mrb[22].mxu0 }
 0x110   : > { %v2066_v14 = vpop.eup %2065  ;;  %2083 = vrcp.f32 %v725_v6  ;;  %v726_v16 = vadd.f32 1.0, %v2064_v10  ;;  %v1661_v17 = vmul.f32 -1.442695, %v2496_v8  ;;  %v2505_v18 = vadd.f32 %v1946_v13, %v2383_v20  ;;  %v571_v21 = vpop.f32.mrb[23].mxu0 }
 0x111   : > { %2085 = vrcp.f32 %v723_v12  ;;  %v724_v23 = vadd.f32 1.0, %v2066_v14  ;;  %v1659_v25 = vmul.f32 -1.442695, %v2501_v42  ;;  %v2509_v26 = vadd.f32 %v2383_v20, %v571_v21  ;;  %1963 = vmatprep.mubr.msk.bf16.mxu1 %vm405_vm0, %v873_v39 }
 0x112   : > { %v2068_v28 = vpop.eup %2067  ;;  %2087 = vrcp.f32 %v726_v16  ;;  %v1662_v29 = vmul.f32 -1.442695, %v2505_v18  ;;  %1964 = vmatmul.mubr.msk.bf16.gmra.mrb[4].mxu1 %vm405_vm0, %v874_v36 }
 0x113   : > { %v2070_v31 = vpop.eup %2069  ;;  %v817_v32 = vmul.f32 %v2068_v28, %v2418_v51  ;;  %2089 = vrcp.f32 %v724_v23  ;;  %v1660_v33 = vmul.f32 -1.442695, %v2509_v26 }
 0x114   : > { %v2072_v22 = vpop.eup %2071  ;;  %v815_v35 = vmul.f32 %v2070_v31, %v2421_v55  ;;  %2091 = vpow2.f32 %v1661_v17 }
 0x115   : > { %v2074_v37 = vpop.eup %2073  ;;  %849 = vst.msk [vmem:[%s2447_s17 + $0x50] sm:$0xff] %vm405_vm0, %v817_v32  ;;  %v818_v24 = vmul.f32 %v2072_v22, %v2425_v59  ;;  %2093 = vpow2.f32 %v1659_v25  ;;  %v1949_v38 = vpop.f32.mrb[24].mxu0 }
 0x116   : > { %v2076_v41 = vpop.eup %2075  ;;  %847 = vst.msk [vmem:[%s2447_s17 + $0x40] sm:$0xff] %vm405_vm0, %v815_v35  ;;  %v816_v51 = vmul.f32 %v2074_v37, %v2429_v62  ;;  %2095 = vpow2.f32 %v1662_v29  ;;  %v2524_v43 = vadd.f32 %v1949_v38, %v2383_v20  ;;  %v584_v27 = vpop.f32.mrb[25].mxu0 }
 0x117   : > { %v2078_v55 = vpop.eup %2077  ;;  %850 = vst.msk [vmem:[%s2447_s17 + $0x58] sm:$0xff] %vm405_vm0, %v818_v24  ;;  %v876_v30 = vpack.c.bf16 %v818_v24, %v817_v32  ;;  %v729_v45 = vadd.f32 1.0, %v2076_v41  ;;  %2097 = vpow2.f32 %v1660_v33  ;;  %v2529_v59 = vadd.f32 %v2383_v20, %v584_v27  ;;  %v1950_v46 = vpop.f32.mrb[26].mxu0 }
 0x118   : > { %v2080_v47 = vpop.eup %2079  ;;  %848 = vst.msk [vmem:[%s2447_s17 + $0x48] sm:$0xff] %vm405_vm0, %v816_v51  ;;  %v875_v48 = vpack.c.bf16 %v816_v51, %v815_v35  ;;  %v727_v62 = vadd.f32 1.0, %v2078_v55  ;;  %v2534_v50 = vadd.f32 %v1950_v46, %v2383_v20  ;;  %v587_v52 = vpop.f32.mrb[27].mxu0  ;;  %v1665_v57 = vmul.f32 -1.442695, %v2524_v43 }
 0x119   : > { %v2082_v53 = vpop.eup %2081  ;;  %2099 = vrcp.f32 %v729_v45  ;;  %v730_v54 = vadd.f32 1.0, %v2080_v47  ;;  %v2538_v58 = vadd.f32 %v2383_v20, %v587_v52  ;;  %v1663_v63 = vmul.f32 -1.442695, %v2529_v59 }
 0x11a   : > { %v2084_v60 = vpop.eup %2083  ;;  %2101 = vrcp.f32 %v727_v62  ;;  %v728_v61 = vadd.f32 1.0, %v2082_v53  ;;  %1967 = vmatprep.mubr.msk.bf16.mxu1 %vm405_vm0, %v875_v48  ;;  %v1666_v2 = vmul.f32 -1.442695, %v2534_v50 }
 0x11b   : > { %v2086_v0 = vpop.eup %2085  ;;  %v821_v1 = vmul.f32 %v2084_v60, %v2435_v7  ;;  %2103 = vrcp.f32 %v730_v54  ;;  %1968 = vmatmul.mubr.msk.bf16.gmra.mrb[8].mxu1 %vm405_vm0, %v876_v30  ;;  %v1664_v4 = vmul.f32 -1.442695, %v2538_v58 }
 0x11c   : > { %v2088_v34 = vpop.eup %2087  ;;  %v819_v3 = vmul.f32 %v2086_v0, %v2438_v11  ;;  %2105 = vrcp.f32 %v728_v61 }
 0x11d   : > { %v2090_v5 = vpop.eup %2089  ;;  %853 = vst.msk [vmem:[%s2447_s17 + $0x70] sm:$0xff] %vm405_vm0, %v821_v1  ;;  %v822_v36 = vmul.f32 %v2088_v34, %v2442_v15  ;;  %2107 = vpow2.f32 %v1665_v57  ;;  %v1953_v7 = vpop.f32.mrb[28].mxu0 }
 0x11e   : > { %v2092_v6 = vpop.eup %2091  ;;  %851 = vst.msk [vmem:[%s2447_s17 + $0x60] sm:$0xff] %vm405_vm0, %v819_v3  ;;  %v820_v9 = vmul.f32 %v2090_v5, %v2451_v19  ;;  %2109 = vpow2.f32 %v1663_v63  ;;  %v2554_v10 = vadd.f32 %v1953_v7, %v2383_v20  ;;  %v600_v11 = vpop.f32.mrb[29].mxu0 }
 0x11f   : > { %v2094_v39 = vpop.eup %2093  ;;  %854 = vst.msk [vmem:[%s2447_s17 + $0x78] sm:$0xff] %vm405_vm0, %v822_v36  ;;  %v878_v12 = vpack.c.bf16 %v822_v36, %v821_v1  ;;  %v733_v13 = vadd.f32 1.0, %v2092_v6  ;;  %2111 = vpow2.f32 %v1666_v2  ;;  %v2559_v15 = vadd.f32 %v2383_v20, %v600_v11  ;;  %v1954_v14 = vpop.f32.mrb[30].mxu0 }
 0x120   : > { %v2096_v16 = vpop.eup %2095  ;;  %852 = vst.msk [vmem:[%s2447_s17 + $0x68] sm:$0xff] %vm405_vm0, %v820_v9  ;;  %v877_v17 = vpack.c.bf16 %v820_v9, %v819_v3  ;;  %v731_v19 = vadd.f32 1.0, %v2094_v39  ;;  %2113 = vpow2.f32 %v1664_v4  ;;  %v603_v21 = vpop.f32.mrb[31].mxu0  ;;  %v1669_v28 = vmul.f32 -1.442695, %v2554_v10 }
 0x121   : > { %v2098_v23 = vpop.eup %2097  ;;  %2115 = vrcp.f32 %v733_v13  ;;  %v734_v25 = vadd.f32 1.0, %v2096_v16  ;;  %v2565_v29 = vadd.f32 %v1954_v14, %v2383_v20  ;;  %v1667_v32 = vmul.f32 -1.442695, %v2559_v15 }
 0x122   : > { %2117 = vrcp.f32 %v731_v19  ;;  %v732_v31 = vadd.f32 1.0, %v2098_v23  ;;  %v2569_v33 = vadd.f32 %v2383_v20, %v603_v21  ;;  %1971 = vmatprep.mubr.msk.bf16.mxu1 %vm405_vm0, %v877_v17 }
 0x123   : > { %v2100_v22 = vpop.eup %2099  ;;  %2119 = vrcp.f32 %v734_v25  ;;  %v1670_v35 = vmul.f32 -1.442695, %v2565_v29  ;;  %1972 = vmatmul.mubr.msk.bf16.gmra.mrb[12].mxu1 %vm405_vm0, %v878_v12 }
 0x124   : > { %v2102_v37 = vpop.eup %2101  ;;  %v825_v24 = vmul.f32 %v2100_v22, %v2466_v40  ;;  %2121 = vrcp.f32 %v732_v31  ;;  %v1668_v38 = vmul.f32 -1.442695, %v2569_v33 }
 0x125   : > { %v2104_v41 = vpop.eup %2103  ;;  %v823_v20 = vmul.f32 %v2102_v37, %v2471_v44  ;;  %2123 = vpow2.f32 %v1669_v28 }
 0x126   : > { %v2106_v51 = vpop.eup %2105  ;;  %857 = vst.msk [vmem:[%s2447_s17 + $0x90] sm:$0xff] %vm405_vm0, %v825_v24  ;;  %v826_v27 = vmul.f32 %v2104_v41, %v2475_v49  ;;  %2125 = vpow2.f32 %v1667_v32 }
 0x127   : > { %v2108_v55 = vpop.eup %2107  ;;  %855 = vst.msk [vmem:[%s2447_s17 + $0x80] sm:$0xff] %vm405_vm0, %v823_v20  ;;  %v824_v30 = vmul.f32 %v2106_v51, %v2479_v56  ;;  %2127 = vpow2.f32 %v1670_v35 }
 0x128   : > { %v2110_v40 = vpop.eup %2109  ;;  %858 = vst.msk [vmem:[%s2447_s17 + $0x98] sm:$0xff] %vm405_vm0, %v826_v27  ;;  %v880_v45 = vpack.c.bf16 %v826_v27, %v825_v24  ;;  %v737_v46 = vadd.f32 1.0, %v2108_v55  ;;  %2129 = vpow2.f32 %v1668_v38 }
 0x129   : > { %v2112_v44 = vpop.eup %2111  ;;  %856 = vst.msk [vmem:[%s2447_s17 + $0x88] sm:$0xff] %vm405_vm0, %v824_v30  ;;  %v879_v47 = vpack.c.bf16 %v824_v30, %v823_v20  ;;  %v735_v48 = vadd.f32 1.0, %v2110_v40 }
 0x12a   : > { %v2114_v49 = vpop.eup %2113  ;;  %2131 = vrcp.f32 %v737_v46  ;;  %v738_v62 = vadd.f32 1.0, %v2112_v44 }
 0x12b   : > { %v2116_v52 = vpop.eup %2115  ;;  %2133 = vrcp.f32 %v735_v48  ;;  %v736_v56 = vadd.f32 1.0, %v2114_v49  ;;  %1975 = vmatprep.mubr.msk.bf16.mxu1 %vm405_vm0, %v879_v47 }
 0x12c   : > { %v2118_v53 = vpop.eup %2117  ;;  %v829_v54 = vmul.f32 %v2116_v52, %v2496_v8  ;;  %2135 = vrcp.f32 %v738_v62  ;;  %1976 = vmatmul.mubr.msk.bf16.gmra.mrb[16].mxu1 %vm405_vm0, %v880_v45 }
 0x12d   : > { %v2120_v57 = vpop.eup %2119  ;;  %v827_v60 = vmul.f32 %v2118_v53, %v2501_v42  ;;  %2137 = vrcp.f32 %v736_v56 }
 0x12e   : > { %v2122_v61 = vpop.eup %2121  ;;  %861 = vst.msk [vmem:[%s2447_s17 + $0xb0] sm:$0xff] %vm405_vm0, %v829_v54  ;;  %v830_v63 = vmul.f32 %v2120_v57, %v2505_v18 }
 0x12f   : > { %v2124_v0 = vpop.eup %2123  ;;  %859 = vst.msk [vmem:[%s2447_s17 + $0xa0] sm:$0xff] %vm405_vm0, %v827_v60  ;;  %v828_v1 = vmul.f32 %v2122_v61, %v2509_v26 }
 0x130   : > { %v2126_v2 = vpop.eup %2125  ;;  %862 = vst.msk [vmem:[%s2447_s17 + $0xb8] sm:$0xff] %vm405_vm0, %v830_v63  ;;  %v882_v8 = vpack.c.bf16 %v830_v63, %v829_v54  ;;  %v741_v34 = vadd.f32 1.0, %v2124_v0 }
 0x131   : > { %v2128_v3 = vpop.eup %2127  ;;  %860 = vst.msk [vmem:[%s2447_s17 + $0xa8] sm:$0xff] %vm405_vm0, %v828_v1  ;;  %v881_v42 = vpack.c.bf16 %v828_v1, %v827_v60  ;;  %v739_v4 = vadd.f32 1.0, %v2126_v2 }
 0x132   : > { %v2130_v5 = vpop.eup %2129  ;;  %2139 = vrcp.f32 %v741_v34  ;;  %v742_v18 = vadd.f32 1.0, %v2128_v3 }
 0x133   : > { %2141 = vrcp.f32 %v739_v4  ;;  %v740_v36 = vadd.f32 1.0, %v2130_v5  ;;  %1979 = vmatprep.mubr.msk.bf16.mxu1 %vm405_vm0, %v881_v42 }
 0x134   : > { %v2132_v26 = vpop.eup %2131  ;;  %2143 = vrcp.f32 %v742_v18  ;;  %1980 = vmatmul.mubr.msk.bf16.gmra.mrb[20].mxu1 %vm405_vm0, %v882_v8 }
 0x135   : > { %v2134_v7 = vpop.eup %2133  ;;  %v833_v6 = vmul.f32 %v2132_v26, %v2524_v43  ;;  %2145 = vrcp.f32 %v740_v36 }
 0x136   : > { %v2136_v9 = vpop.eup %2135  ;;  %v831_v11 = vmul.f32 %v2134_v7, %v2529_v59 }
 0x137   : > { %v2138_v39 = vpop.eup %2137  ;;  %865 = vst.msk [vmem:[%s2447_s17 + $0xd0] sm:$0xff] %vm405_vm0, %v833_v6  ;;  %v834_v12 = vmul.f32 %v2136_v9, %v2534_v50 }
 0x138   : > { %863 = vst.msk [vmem:[%s2447_s17 + $0xc0] sm:$0xff] %vm405_vm0, %v831_v11  ;;  %v832_v13 = vmul.f32 %v2138_v39, %v2538_v58 }
 0x139   : > { %866 = vst.msk [vmem:[%s2447_s17 + $0xd8] sm:$0xff] %vm405_vm0, %v834_v12  ;;  %v884_v14 = vpack.c.bf16 %v834_v12, %v833_v6 }
 0x13a   : > { %864 = vst.msk [vmem:[%s2447_s17 + $0xc8] sm:$0xff] %vm405_vm0, %v832_v13  ;;  %v883_v43 = vpack.c.bf16 %v832_v13, %v831_v11 }
 0x13c   : > { %v2140_v59 = vpop.eup %2139  ;;  %1983 = vmatprep.mubr.msk.bf16.mxu1 %vm405_vm0, %v883_v43 }
 0x13d   : > { %v2142_v16 = vpop.eup %2141  ;;  %v837_v17 = vmul.f32 %v2140_v59, %v2554_v10  ;;  %1984 = vmatmul.mubr.msk.bf16.gmra.mrb[24].mxu1 %vm405_vm0, %v884_v14 }
 0x13e   : > { %v2144_v50 = vpop.eup %2143  ;;  %v835_v19 = vmul.f32 %v2142_v16, %v2559_v15  ;;  %v2634_v15 = vld [vmem:[%s2826_s4] ss:$0 sm:$0xff] }
 0x13f   : > { %v2146_v58 = vpop.eup %2145  ;;  %869 = vst.msk [vmem:[%s2447_s17 + $0xf0] sm:$0xff] %vm405_vm0, %v837_v17  ;;  %v838_v21 = vmul.f32 %v2144_v50, %v2565_v29 }
 0x140   : > { %867 = vst.msk [vmem:[%s2447_s17 + $0xe0] sm:$0xff] %vm405_vm0, %v835_v19  ;;  %v836_v23 = vmul.f32 %v2146_v58, %v2569_v33 }
 0x141   : > { %870 = vst.msk [vmem:[%s2447_s17 + $0xf8] sm:$0xff] %vm405_vm0, %v838_v21  ;;  %v886_v25 = vpack.c.bf16 %v838_v21, %v837_v17 }
 0x142   : > { %868 = vst.msk [vmem:[%s2447_s17 + $0xe8] sm:$0xff] %vm405_vm0, %v836_v23  ;;  %v885_v10 = vpack.c.bf16 %v836_v23, %v835_v19 }
 0x144   : > { %1987 = vmatprep.mubr.msk.bf16.mxu1 %vm405_vm0, %v885_v10 }
 0x145   : > { %1988 = vmatmul.mubr.msk.bf16.gmra.mrb[28].mxu1 %vm405_vm0, %v886_v25 }
 0x1dd   : > { %v1961_v28 = vpop.f32.mrb[0].mxu1 }
 0x1de   : > { %v2637_v29 = vadd.f32 %v1961_v28, %v2634_v15  ;;  %v992_v31 = vpop.f32.mrb[1].mxu1 }
 0x1df   : > { %v2640_v32 = vadd.f32 %v2634_v15, %v992_v31  ;;  %v1962_v33 = vpop.f32.mrb[2].mxu1 }
 0x1e0   : > { %v1692_v22 = vmul.f32 -1.442695, %v2637_v29  ;;  %v2644_v35 = vadd.f32 %v1962_v33, %v2634_v15  ;;  %v995_v37 = vpop.f32.mrb[3].mxu1 }
 0x1e1   : > { %v1690_v24 = vmul.f32 -1.442695, %v2640_v32  ;;  %v2648_v38 = vadd.f32 %v2634_v15, %v995_v37 }
 0x1e2   : > { %2147 = vpow2.f32 %v1692_v22  ;;  %v1693_v41 = vmul.f32 -1.442695, %v2644_v35 }
 0x1e3   : > { %2149 = vpow2.f32 %v1690_v24  ;;  %v1691_v20 = vmul.f32 -1.442695, %v2648_v38 }
 0x1e4   : > { %2151 = vpow2.f32 %v1693_v41 }
 0x1e5   : > { %2153 = vpow2.f32 %v1691_v20  ;;  %v1965_v51 = vpop.f32.mrb[4].mxu1 }
 0x1e6   : > { %v2653_v27 = vadd.f32 %v1965_v51, %v2634_v15  ;;  %v1008_v55 = vpop.f32.mrb[5].mxu1 }
 0x1e7   : > { %v2656_v30 = vadd.f32 %v2634_v15, %v1008_v55  ;;  %v1966_v40 = vpop.f32.mrb[6].mxu1 }
 0x1e8   : > { %v1696_v45 = vmul.f32 -1.442695, %v2653_v27  ;;  %v2660_v46 = vadd.f32 %v1966_v40, %v2634_v15  ;;  %v1011_v44 = vpop.f32.mrb[7].mxu1 }
 0x1e9   : > { %v1694_v47 = vmul.f32 -1.442695, %v2656_v30  ;;  %v2664_v48 = vadd.f32 %v2634_v15, %v1011_v44 }
 0x1ea   : > { %2155 = vpow2.f32 %v1696_v45  ;;  %v1697_v49 = vmul.f32 -1.442695, %v2660_v46 }
 0x1eb   : > { %2157 = vpow2.f32 %v1694_v47  ;;  %v1695_v62 = vmul.f32 -1.442695, %v2664_v48 }
 0x1ec   : > { %v2148_v52 = vpop.eup %2147  ;;  %2159 = vpow2.f32 %v1697_v49 }
 0x1ed   : > { %v2150_v56 = vpop.eup %2149  ;;  %v1217_v53 = vadd.f32 1.0, %v2148_v52  ;;  %2161 = vpow2.f32 %v1695_v62 }
 0x1ee   : > { %v2152_v54 = vpop.eup %2151  ;;  %v1215_v57 = vadd.f32 1.0, %v2150_v56  ;;  %v1969_v60 = vpop.f32.mrb[8].mxu1 }
 0x1ef   : > { %v2154_v61 = vpop.eup %2153  ;;  %2163 = vrcp.f32 %v1217_v53  ;;  %v1218_v63 = vadd.f32 1.0, %v2152_v54  ;;  %v2669_v0 = vadd.f32 %v1969_v60, %v2634_v15  ;;  %v1024_v1 = vpop.f32.mrb[9].mxu1 }
 0x1f0   : > { %2165 = vrcp.f32 %v1215_v57  ;;  %v1216_v2 = vadd.f32 1.0, %v2154_v61  ;;  %v2672_v8 = vadd.f32 %v2634_v15, %v1024_v1  ;;  %v1970_v34 = vpop.f32.mrb[10].mxu1 }
 0x1f1   : > { %2167 = vrcp.f32 %v1218_v63  ;;  %v1700_v3 = vmul.f32 -1.442695, %v2669_v0  ;;  %v2676_v42 = vadd.f32 %v1970_v34, %v2634_v15  ;;  %v1027_v4 = vpop.f32.mrb[11].mxu1 }
 0x1f2   : > { %2169 = vrcp.f32 %v1216_v2  ;;  %v1698_v5 = vmul.f32 -1.442695, %v2672_v8  ;;  %v2680_v18 = vadd.f32 %v2634_v15, %v1027_v4 }
 0x1f3   : > { %2171 = vpow2.f32 %v1700_v3  ;;  %v1701_v36 = vmul.f32 -1.442695, %v2676_v42 }
 0x1f4   : > { %v2156_v26 = vpop.eup %2155  ;;  %2173 = vpow2.f32 %v1698_v5  ;;  %v1699_v7 = vmul.f32 -1.442695, %v2680_v18 }
 0x1f5   : > { %v2158_v6 = vpop.eup %2157  ;;  %v1221_v9 = vadd.f32 1.0, %v2156_v26  ;;  %2175 = vpow2.f32 %v1701_v36 }
 0x1f6   : > { %v2160_v11 = vpop.eup %2159  ;;  %v1219_v39 = vadd.f32 1.0, %v2158_v6  ;;  %2177 = vpow2.f32 %v1699_v7  ;;  %v1973_v12 = vpop.f32.mrb[12].mxu1 }
 0x1f7   : > { %v2162_v13 = vpop.eup %2161  ;;  %2179 = vrcp.f32 %v1221_v9  ;;  %v1222_v14 = vadd.f32 1.0, %v2160_v11  ;;  %v2685_v43 = vadd.f32 %v1973_v12, %v2634_v15  ;;  %v1040_v59 = vpop.f32.mrb[13].mxu1 }
 0x1f8   : > { %2181 = vrcp.f32 %v1219_v39  ;;  %v1220_v16 = vadd.f32 1.0, %v2162_v13  ;;  %v2688_v17 = vadd.f32 %v2634_v15, %v1040_v59  ;;  %v1974_v50 = vpop.f32.mrb[14].mxu1 }
 0x1f9   : > { %v2164_v19 = vpop.eup %2163  ;;  %2183 = vrcp.f32 %v1222_v14  ;;  %v1704_v58 = vmul.f32 -1.442695, %v2685_v43  ;;  %v2692_v21 = vadd.f32 %v1974_v50, %v2634_v15  ;;  %v1043_v23 = vpop.f32.mrb[15].mxu1 }
 0x1fa   : > { %v2166_v25 = vpop.eup %2165  ;;  %2185 = vrcp.f32 %v1220_v16  ;;  %v1702_v10 = vmul.f32 -1.442695, %v2688_v17  ;;  %v2696_v28 = vadd.f32 %v2634_v15, %v1043_v23  ;;  %v1313_v37 = vmul.f32 %v2164_v19, %v2637_v29 }
 0x1fb   : > { %v2168_v31 = vpop.eup %2167  ;;  %2187 = vpow2.f32 %v1704_v58  ;;  %v1705_v33 = vmul.f32 -1.442695, %v2692_v21  ;;  %v1311_v51 = vmul.f32 %v2166_v25, %v2640_v32 }
 0x1fc   : > { %v2170_v22 = vpop.eup %2169  ;;  %v1314_v24 = vmul.f32 %v2168_v31, %v2644_v35  ;;  %2189 = vpow2.f32 %v1702_v10  ;;  %v1703_v41 = vmul.f32 -1.442695, %v2696_v28 }
 0x1fd   : > { %v2172_v20 = vpop.eup %2171  ;;  %v1312_v55 = vmul.f32 %v2170_v22, %v2648_v38  ;;  %2191 = vpow2.f32 %v1705_v33 }
 0x1fe   : > { %v2174_v29 = vpop.eup %2173  ;;  %v1796_v40 = vpack.c.bf16 %v1314_v24, %v1313_v37  ;;  %v1225_v35 = vadd.f32 1.0, %v2172_v20  ;;  %2193 = vpow2.f32 %v1703_v41 }
 0x1ff   : > { %v2176_v45 = vpop.eup %2175  ;;  %v1791_v44 = vpack.c.bf16 %v1312_v55, %v1311_v51  ;;  %v1223_v47 = vadd.f32 1.0, %v2174_v29  ;;  %v1977_v49 = vpop.f32.mrb[16].mxu1 }
 0x200   : > { %v2178_v32 = vpop.eup %2177  ;;  %1868 = vst [vmem:[%s2708_s23 + $0x8] sm:$0xff] %v1796_v40   ;;  %2195 = vrcp.f32 %v1225_v35  ;;  %v1226_v62 = vadd.f32 1.0, %v2176_v45  ;;  %v2713_v52 = vadd.f32 %v1977_v49, %v2634_v15  ;;  %v1056_v56 = vpop.f32.mrb[17].mxu1 }
 0x201   : > { %v2180_v53 = vpop.eup %2179  ;;  %1792 = vst [vmem:[%s2708_s23] sm:$0xff] %v1791_v44   ;;  %2197 = vrcp.f32 %v1223_v47  ;;  %v1224_v38 = vadd.f32 1.0, %v2178_v32  ;;  %v2717_v54 = vadd.f32 %v2634_v15, %v1056_v56  ;;  %v1978_v57 = vpop.f32.mrb[18].mxu1 }
 0x202   : > { %v2182_v60 = vpop.eup %2181  ;;  %2199 = vrcp.f32 %v1226_v62  ;;  %v1708_v61 = vmul.f32 -1.442695, %v2713_v52  ;;  %v2721_v63 = vadd.f32 %v1978_v57, %v2634_v15  ;;  %v1059_v1 = vpop.f32.mrb[19].mxu1  ;;  %v1317_v5 = vmul.f32 %v2180_v53, %v2653_v27 }
 0x203   : > { %v2184_v2 = vpop.eup %2183  ;;  %2201 = vrcp.f32 %v1224_v38  ;;  %v1706_v34 = vmul.f32 -1.442695, %v2717_v54  ;;  %v2725_v3 = vadd.f32 %v2634_v15, %v1059_v1  ;;  %v1315_v6 = vmul.f32 %v2182_v60, %v2656_v30 }
 0x204   : > { %v2186_v4 = vpop.eup %2185  ;;  %v1318_v36 = vmul.f32 %v2184_v2, %v2660_v46  ;;  %2203 = vpow2.f32 %v1708_v61  ;;  %v1709_v26 = vmul.f32 -1.442695, %v2721_v63 }
 0x205   : > { %v2188_v7 = vpop.eup %2187  ;;  %v1316_v9 = vmul.f32 %v2186_v4, %v2664_v48  ;;  %2205 = vpow2.f32 %v1706_v34  ;;  %v1707_v11 = vmul.f32 -1.442695, %v2725_v3 }
 0x206   : > { %v2190_v39 = vpop.eup %2189  ;;  %v1806_v12 = vpack.c.bf16 %v1318_v36, %v1317_v5  ;;  %v1229_v13 = vadd.f32 1.0, %v2188_v7  ;;  %2207 = vpow2.f32 %v1709_v26 }
 0x207   : > { %v2192_v27 = vpop.eup %2191  ;;  %v1801_v14 = vpack.c.bf16 %v1316_v9, %v1315_v6  ;;  %v1227_v46 = vadd.f32 1.0, %v2190_v39  ;;  %2209 = vpow2.f32 %v1707_v11  ;;  %v1981_v59 = vpop.f32.mrb[20].mxu1 }
 0x208   : > { %v2194_v16 = vpop.eup %2193  ;;  %1870 = vst [vmem:[%s2708_s23 + $0x18] sm:$0xff] %v1806_v12   ;;  %2211 = vrcp.f32 %v1229_v13  ;;  %v1230_v50 = vadd.f32 1.0, %v2192_v27  ;;  %v2735_v30 = vadd.f32 %v1981_v59, %v2634_v15  ;;  %v1072_v48 = vpop.f32.mrb[21].mxu1 }
 0x209   : > { %1869 = vst [vmem:[%s2708_s23 + $0x10] sm:$0xff] %v1801_v14   ;;  %2213 = vrcp.f32 %v1227_v46  ;;  %v1228_v19 = vadd.f32 1.0, %v2194_v16  ;;  %v2739_v58 = vadd.f32 %v2634_v15, %v1072_v48  ;;  %v1982_v23 = vpop.f32.mrb[22].mxu1 }
 0x20a   : > { %v2196_v25 = vpop.eup %2195  ;;  %2215 = vrcp.f32 %v1230_v50  ;;  %v1712_v10 = vmul.f32 -1.442695, %v2735_v30  ;;  %v2743_v31 = vadd.f32 %v1982_v23, %v2634_v15  ;;  %v1075_v33 = vpop.f32.mrb[23].mxu1 }
 0x20b   : > { %v2198_v22 = vpop.eup %2197  ;;  %2217 = vrcp.f32 %v1228_v19  ;;  %v1710_v37 = vmul.f32 -1.442695, %v2739_v58  ;;  %v2747_v24 = vadd.f32 %v2634_v15, %v1075_v33  ;;  %v1321_v55 = vmul.f32 %v2196_v25, %v2669_v0 }
 0x20c   : > { %v2200_v41 = vpop.eup %2199  ;;  %2219 = vpow2.f32 %v1712_v10  ;;  %v1713_v20 = vmul.f32 -1.442695, %v2743_v31  ;;  %v1319_v45 = vmul.f32 %v2198_v22, %v2672_v8 }
 0x20d   : > { %v2202_v51 = vpop.eup %2201  ;;  %v1322_v29 = vmul.f32 %v2200_v41, %v2676_v42  ;;  %2221 = vpow2.f32 %v1710_v37  ;;  %v1711_v40 = vmul.f32 -1.442695, %v2747_v24 }
 0x20e   : > { %v2204_v35 = vpop.eup %2203  ;;  %v1320_v44 = vmul.f32 %v2202_v51, %v2680_v18  ;;  %2223 = vpow2.f32 %v1713_v20 }
 0x20f   : > { %v2206_v47 = vpop.eup %2205  ;;  %v1816_v49 = vpack.c.bf16 %v1322_v29, %v1321_v55  ;;  %v1233_v32 = vadd.f32 1.0, %v2204_v35  ;;  %2225 = vpow2.f32 %v1711_v40 }
 0x210   : > { %v2208_v62 = vpop.eup %2207  ;;  %v1811_v56 = vpack.c.bf16 %v1320_v44, %v1319_v45  ;;  %v1231_v0 = vadd.f32 1.0, %v2206_v47  ;;  %v1985_v53 = vpop.f32.mrb[24].mxu1 }
 0x211   : > { %v2210_v42 = vpop.eup %2209  ;;  %1872 = vst [vmem:[%s2708_s23 + $0x28] sm:$0xff] %v1816_v49   ;;  %2227 = vrcp.f32 %v1233_v32  ;;  %v1234_v38 = vadd.f32 1.0, %v2208_v62  ;;  %v2757_v57 = vadd.f32 %v1985_v53, %v2634_v15  ;;  %v1088_v8 = vpop.f32.mrb[25].mxu1 }
 0x212   : > { %v2212_v60 = vpop.eup %2211  ;;  %1871 = vst [vmem:[%s2708_s23 + $0x20] sm:$0xff] %v1811_v56   ;;  %2229 = vrcp.f32 %v1231_v0  ;;  %v1232_v18 = vadd.f32 1.0, %v2210_v42  ;;  %v2761_v61 = vadd.f32 %v2634_v15, %v1088_v8  ;;  %v1986_v1 = vpop.f32.mrb[26].mxu1 }
 0x213   : > { %v2214_v2 = vpop.eup %2213  ;;  %2231 = vrcp.f32 %v1234_v38  ;;  %v1716_v34 = vmul.f32 -1.442695, %v2757_v57  ;;  %v2765_v4 = vadd.f32 %v1986_v1, %v2634_v15  ;;  %v1091_v5 = vpop.f32.mrb[27].mxu1  ;;  %v1325_v9 = vmul.f32 %v2212_v60, %v2685_v43 }
 0x214   : > { %v2216_v36 = vpop.eup %2215  ;;  %2233 = vrcp.f32 %v1232_v18  ;;  %v1714_v26 = vmul.f32 -1.442695, %v2761_v61  ;;  %v2769_v7 = vadd.f32 %v2634_v15, %v1091_v5  ;;  %v1323_v13 = vmul.f32 %v2214_v2, %v2688_v17 }
 0x215   : > { %v2218_v6 = vpop.eup %2217  ;;  %v1326_v11 = vmul.f32 %v2216_v36, %v2692_v21  ;;  %2235 = vpow2.f32 %v1716_v34  ;;  %v1717_v39 = vmul.f32 -1.442695, %v2765_v4 }
 0x216   : > { %v2220_v12 = vpop.eup %2219  ;;  %v1324_v27 = vmul.f32 %v2218_v6, %v2696_v28  ;;  %2237 = vpow2.f32 %v1714_v26  ;;  %v1715_v14 = vmul.f32 -1.442695, %v2769_v7 }
 0x217   : > { %v2222_v46 = vpop.eup %2221  ;;  %v1826_v59 = vpack.c.bf16 %v1326_v11, %v1325_v9  ;;  %v1237_v16 = vadd.f32 1.0, %v2220_v12  ;;  %2239 = vpow2.f32 %v1717_v39 }
 0x218   : > { %v2224_v43 = vpop.eup %2223  ;;  %v1821_v50 = vpack.c.bf16 %v1324_v27, %v1323_v13  ;;  %v1235_v21 = vadd.f32 1.0, %v2222_v46  ;;  %2241 = vpow2.f32 %v1715_v14  ;;  %v1989_v48 = vpop.f32.mrb[28].mxu1 }
 0x219   : > { %v2226_v19 = vpop.eup %2225  ;;  %1874 = vst [vmem:[%s2708_s23 + $0x38] sm:$0xff] %v1826_v59   ;;  %2243 = vrcp.f32 %v1237_v16  ;;  %v1238_v23 = vadd.f32 1.0, %v2224_v43  ;;  %v2779_v17 = vadd.f32 %v1989_v48, %v2634_v15  ;;  %v1104_v28 = vpop.f32.mrb[29].mxu1 }
 0x21a   : > { %1873 = vst [vmem:[%s2708_s23 + $0x30] sm:$0xff] %v1821_v50   ;;  %2245 = vrcp.f32 %v1235_v21  ;;  %v1236_v25 = vadd.f32 1.0, %v2226_v19  ;;  %v2783_v10 = vadd.f32 %v2634_v15, %v1104_v28  ;;  %v1990_v33 = vpop.f32.mrb[30].mxu1 }
 0x21b   : > { %v2228_v22 = vpop.eup %2227  ;;  %2247 = vrcp.f32 %v1238_v23  ;;  %v1720_v37 = vmul.f32 -1.442695, %v2779_v17  ;;  %v2787_v41 = vadd.f32 %v1990_v33, %v2634_v15  ;;  %v1107_v20 = vpop.f32.mrb[31].mxu1 }
 0x21c   : > { %v2230_v51 = vpop.eup %2229  ;;  %2249 = vrcp.f32 %v1236_v25  ;;  %v1718_v55 = vmul.f32 -1.442695, %v2783_v10  ;;  %v2791_v29 = vadd.f32 %v2634_v15, %v1107_v20  ;;  %v1329_v44 = vmul.f32 %v2228_v22, %v2713_v52 }
 0x21d   : > { %v2232_v40 = vpop.eup %2231  ;;  %2251 = vpow2.f32 %v1720_v37  ;;  %v1721_v35 = vmul.f32 -1.442695, %v2787_v41  ;;  %v1327_v62 = vmul.f32 %v2230_v51, %v2717_v54 }
 0x21e   : > { %v2234_v45 = vpop.eup %2233  ;;  %v1330_v47 = vmul.f32 %v2232_v40, %v2721_v63  ;;  %2253 = vpow2.f32 %v1718_v55  ;;  %v1719_v49 = vmul.f32 -1.442695, %v2791_v29 }
 0x21f   : > { %v2236_v32 = vpop.eup %2235  ;;  %v1328_v15 = vmul.f32 %v2234_v45, %v2725_v3  ;;  %2255 = vpow2.f32 %v1721_v35 }
 0x220   : > { %v2238_v56 = vpop.eup %2237  ;;  %v1836_v0 = vpack.c.bf16 %v1330_v47, %v1329_v44  ;;  %v1241_v53 = vadd.f32 1.0, %v2236_v32  ;;  %2257 = vpow2.f32 %v1719_v49 }
 0x221   : > { %v2240_v42 = vpop.eup %2239  ;;  %v1831_v38 = vpack.c.bf16 %v1328_v15, %v1327_v62  ;;  %v1239_v52 = vadd.f32 1.0, %v2238_v56 }
 0x222   : > { %v2242_v8 = vpop.eup %2241  ;;  %1876 = vst [vmem:[%s2708_s23 + $0x48] sm:$0xff] %v1836_v0   ;;  %2259 = vrcp.f32 %v1241_v53  ;;  %v1242_v63 = vadd.f32 1.0, %v2240_v42 }
 0x223   : > { %v2244_v60 = vpop.eup %2243  ;;  %1875 = vst [vmem:[%s2708_s23 + $0x40] sm:$0xff] %v1831_v38   ;;  %2261 = vrcp.f32 %v1239_v52  ;;  %v1240_v18 = vadd.f32 1.0, %v2242_v8 }
 0x224   : > { %v2246_v1 = vpop.eup %2245  ;;  %2263 = vrcp.f32 %v1242_v63  ;;  %v1333_v2 = vmul.f32 %v2244_v60, %v2735_v30 }
 0x225   : > { %v2248_v54 = vpop.eup %2247  ;;  %2265 = vrcp.f32 %v1240_v18  ;;  %v1331_v36 = vmul.f32 %v2246_v1, %v2739_v58 }
 0x226   : > { %v2250_v3 = vpop.eup %2249  ;;  %v1334_v34 = vmul.f32 %v2248_v54, %v2743_v31 }
 0x227   : > { %v2252_v5 = vpop.eup %2251  ;;  %v1332_v26 = vmul.f32 %v2250_v3, %v2747_v24 }
 0x228   : > { %v2254_v6 = vpop.eup %2253  ;;  %v1846_v9 = vpack.c.bf16 %v1334_v34, %v1333_v2  ;;  %v1245_v11 = vadd.f32 1.0, %v2252_v5 }
 0x229   : > { %v2256_v39 = vpop.eup %2255  ;;  %v1841_v12 = vpack.c.bf16 %v1332_v26, %v1331_v36  ;;  %v1243_v13 = vadd.f32 1.0, %v2254_v6 }
 0x22a   : > { %v2258_v27 = vpop.eup %2257  ;;  %1878 = vst [vmem:[%s2708_s23 + $0x58] sm:$0xff] %v1846_v9   ;;  %2267 = vrcp.f32 %v1245_v11  ;;  %v1246_v14 = vadd.f32 1.0, %v2256_v39 }
 0x22b   : > { %1877 = vst [vmem:[%s2708_s23 + $0x50] sm:$0xff] %v1841_v12   ;;  %2269 = vrcp.f32 %v1243_v13  ;;  %v1244_v30 = vadd.f32 1.0, %v2258_v27 }
 0x22c   : > { %v2260_v31 = vpop.eup %2259  ;;  %2271 = vrcp.f32 %v1246_v14 }
 0x22d   : > { %v2262_v58 = vpop.eup %2261  ;;  %2273 = vrcp.f32 %v1244_v30  ;;  %v1337_v59 = vmul.f32 %v2260_v31, %v2757_v57 }
 0x22e   : > { %v2264_v24 = vpop.eup %2263  ;;  %v1335_v43 = vmul.f32 %v2262_v58, %v2761_v61 }
 0x22f   : > { %v2266_v46 = vpop.eup %2265  ;;  %v1338_v16 = vmul.f32 %v2264_v24, %v2765_v4 }
 0x230   : > { %v1336_v50 = vmul.f32 %v2266_v46, %v2769_v7 }
 0x231   : > { %v1856_v21 = vpack.c.bf16 %v1338_v16, %v1337_v59 }
 0x232   : > { %v1851_v48 = vpack.c.bf16 %v1336_v50, %v1335_v43 }
 0x233   : > { %1880 = vst [vmem:[%s2708_s23 + $0x68] sm:$0xff] %v1856_v21  }
 0x234   : > { %v2268_v19 = vpop.eup %2267  ;;  %1879 = vst [vmem:[%s2708_s23 + $0x60] sm:$0xff] %v1851_v48  }
 0x235   : > { %v2270_v23 = vpop.eup %2269  ;;  %v1341_v33 = vmul.f32 %v2268_v19, %v2779_v17 }
 0x236   : > { %v2272_v28 = vpop.eup %2271  ;;  %v1339_v4 = vmul.f32 %v2270_v23, %v2783_v10 }
 0x237   : > { %v2274_v25 = vpop.eup %2273  ;;  %v1342_v57 = vmul.f32 %v2272_v28, %v2787_v41 }
 0x238   : > { %v1340_v61 = vmul.f32 %v2274_v25, %v2791_v29 }
 0x239   : > { %v1866_v22 = vpack.c.bf16 %v1342_v57, %v1341_v33 }
 0x23a   : > { %v1861_v37 = vpack.c.bf16 %v1340_v61, %v1339_v4 }
 0x23b   : > { %1882 = vst [vmem:[%s2708_s23 + $0x78] sm:$0xff] %v1866_v22  }
 0x23c   : > { %1881 = vst [vmem:[%s2708_s23 + $0x70] sm:$0xff] %v1861_v37  }
 0x23d PF: > { %s17_s21 = sadd.s32 1, %s2281_s21  }
 0x23e   : > { %p14_p4 = scmp.ge.s32.totalorder %s17_s21, 4  }
 0x240   :  { %16 = sbr.rel (!%p14_p4) target bundleno = 1 (0x1), region = 82 }

// kernel: customized_ens_forward.5
= control target key start
LH: loop header
LB: loop body
LE: loop exit
PB: predicated region body
PF: predicated region fallthrough
CT: control target
= control target key end

     0   :  { %13 = vsyncpa [#allocation4], 0  ;;  %s2422_s0 = inlined_call_operand.vmem [shape: bf16[2,256,128], index: 0, kind: input, shape index: {}]   ;;  %s2423_s1 = inlined_call_operand.vmem [shape: f32[2,256,32], index: 1, kind: input, shape index: {}]   ;;  %s2424_s2 = inlined_call_operand.vmem [shape: bf16[128,32], index: 2, kind: input, shape index: {}]   ;;  %s2425_s3 = inlined_call_operand.vmem [shape: f32[1,32], index: 3, kind: input, shape index: {}]   ;;  %s2426_s4 = inlined_call_operand.vmem [shape: bf16[32,256], index: 4, kind: input, shape index: {}]   ;;  %s2427_s5 = inlined_call_operand.vmem [shape: f32[1,256], index: 5, kind: input, shape index: {}]   ;;  %s2428_s6 = inlined_call_operand.vmem [shape: f32[256,4], index: 6, kind: input, shape index: {}]   ;;  %s2429_s7 = inlined_call_operand.vmem [shape: f32[1,4], index: 7, kind: input, shape index: {}]   ;;  %s2430_s8 = inlined_call_operand.hbm [shape: f32[2,1,4], index: 8, kind: output, shape index: {}]  }
   0x1   :  { %15 = vsyncpa [#allocation4 + $0x1], 0  ;;  %s1900_s27 = smov 0   ;;  %s1902_s28 = smov 0  }
   0x2   :  { %s1904_s29 = smov 0   ;;  %s1906_s30 = smov 0  }
   0x3   :  { %s1908_s9 = smov 0   ;;  %s1910_s10 = smov 0  }
   0x4   :  { %s1912_s11 = smov 0   ;;  %s1914_s12 = smov 0  }
   0x5 LB: > { %2434 = sst [smem:[#allocation6_spill]] %s1841_s10  ;;  %s1339_s13 = sadd.s32 4294967295, %s1849_s12   ;;  %s1849_s12 = sphi %s1914_s12, %s21_s12   ;;  %s1845_s11 = sphi %s1912_s11, %s2445_s11   ;;  %s1841_s10 = sphi %s1910_s10, %s2444_s10   ;;  %s1837_s9 = sphi %s1908_s9, %s2443_s9   ;;  %s1833_s30 = sphi %s1906_s30, %s2442_s30   ;;  %s1829_s29 = sphi %s1904_s29, %s2448_s29   ;;  %s1825_s28 = sphi %s1902_s28, %s2447_s28   ;;  %s1821_s27 = sphi %s1900_s27, %s2446_s27  }
   0x6   : > { %2435 = sst [smem:[#allocation7_spill]] %s1845_s11  ;;  %s1340_s14 = sadd.s32 4294967294, %s1849_s12  }
   0x7   : > { %s30_s15 = sadd.s32 1, %s1841_s10  ;;  %s33_s16 = sadd.s32 1, %s1845_s11 }
   0x8   : > { %p31_p0 = scmp.ge.s32.totalorder %s30_s15, 2  ;;  %p232_p1 = scmp.ne.s32.totalorder %s1829_s29, %s1825_s28 }
   0x9   : > { %p233_p2 = scmp.eq.s32.totalorder %s1339_s13, 3  ;;  %p238_p4 = scmp.ne.s32.totalorder %s1825_s28, %s1821_s27 }
   0xa   : > { %s2450_s15 = smov (%p31_p0, %s30_s15), 0  ;;  %s2452_s16 = smov (!%p31_p0, %s33_s16), %s1845_s11 }
   0xb   : > { %2436 = sst [smem:[#allocation8_spill]] %s2450_s15  ;;  %p1949_p3 = por %p233_p2, %p232_p1 }
   0xc   : > { %p35_p5 = scmp.ge.s32.totalorder %s2452_s16, 2  ;;  %p239_p6 = scmp.eq.s32.totalorder %s1340_s14, 3 }
   0xd   : > { %p1343_p7 = scmp.ge.s32.totalorder %s1849_s12, 1  ;;  %p301_p8 = scmp.lt.s32.totalorder %s1849_s12, 5 }
   0xe   : > { %s2454_s16 = smov (%p35_p5, %s2452_s16), 0  ;;  %p1959_p9 = por %p239_p6, %p238_p4 }
   0xf   : > { %2438 = sst [smem:[#allocation9_spill]] %s2454_s16  ;;  %p302_p10 = pnand %p1343_p7, %p301_p8 }
  0x10   : > { %s219_s19 = ssub.s32 %s1845_s11, %s2454_s16  ;;  %s222_s20 = sadd.s32 1, %s1829_s29 }
  0x11   : > { %p220_p11 = scmp.eq.s32.totalorder %s219_s19, 0  ;;  %305 = sbr.rel (%p302_p10) target bundleno = 878 (0x36e), region = 52 }
  0x12   : > { %s345_s22 = sand.u32 (!%p302_p10), 1, %s1825_s28   ;;  %s1344_s23 = sshll.u32 (!%p302_p10), %s1833_s30, 4 }
  0x13   : > { %s1967_s21 = scalar_select %p220_p11, %s1829_s29, %s222_s20  }
  0x14   : > { %p348_p12 = scmp.lt.s32.totalorder (!%p302_p10), %s1837_s9, 1  ;;  %p350_p13 = scmp.lt.s32.totalorder (!%p302_p10), %s1344_s23, 31 }
  0x15   : > { %2440 = sst [smem:[#allocation10_spill]] %s1967_s21  ;;  %s1985_s21 = scalar_lea.vmem (!%p302_p10), [#allocation3], %s345_s22 }
  0x16   : > { %p1350_p0 = scmp.ne.s32.totalorder (!%p302_p10), %s1833_s30, 0 }
  0x18   : > { %s349_s24 = scalar_select %p348_p12, %s1837_s9, 1 }
  0x19   : > { %s2456_s23 = smov (!%p350_p13, %s1344_s23), 31  ;;  %371 = sbr.rel (%p1350_p0) target bundleno = 32 (0x20), region = 56 }
  0x1a   : > { %s1345_s25 = sshll.u32 %s349_s24, 5  ;;  %v372_v0 = vlaneseq (!%p1350_p0)  ;;  %v1851_v1 = vmov (!%p1350_p0), 0.0  }
  0x1b   : > { %s353_s26 = sadd.s32 %s1345_s25, %s2456_s23 }
  0x1c   : > { %s1346_s13 = sshll.u32 %s353_s26, 2  ;;  %s1349_s14 = sshll.u32 %s353_s26, 3  ;;  %vm374_vm0 = vcmp.lt.s32.totalorder (!%p1350_p0), %v372_v0, 256 }
  0x1d   : > { %s1976_s20 = scalar_lea.vmem %s2422_s0, %s1346_s13  ;;  %s1981_s10 = scalar_lea.vmem %s2423_s1, %s1349_s14  ;;  %376 = vst.msk [vmem:[#allocation2] sm:$0x3] (!%p1350_p0), %vm374_vm0, %v1851_v1 }
  0x20 PF: > { %v1605_v2 = vld [vmem:[%s2424_s2] sm:$0xff]   ;;  %v1606_v3 = vld [vmem:[%s2424_s2 + $0x8] sm:$0xff]   ;;  %v1607_v4 = vld [vmem:[%s2424_s2 + $0x10] sm:$0xff]   ;;  %v1852_v22 = vmov 0   ;;  %vm685_vm1 = vcmask 261120   ;;  %p1412_p1 = scmp.ne.s32.totalorder %s1833_s30, 1 }
  0x21   : > { %1467 = vmatprep.subr.bf16.mxu0 %v1605_v2  ;;  %v1608_v5 = vld [vmem:[%s2424_s2 + $0x18] sm:$0xff]   ;;  %v1613_v6 = vld [vmem:[%s1976_s20] sm:$0xff]   ;;  %v1610_v8 = vld [vmem:[%s2424_s2 + $0x28] sm:$0xff]   ;;  %742 = vmatprep.mubr.bf16.mxu1 %v1852_v22  ;;  %vm1234_vm3 = vcmask (!%p1412_p1), 24576  }
  0x22   : > { %1468 = vmatpush3.bf16.msra.mxu0 %v1605_v2  ;;  %1483 = vmatprep.mubr.bf16.mxu0 %v1613_v6  ;;  %v1609_v7 = vld [vmem:[%s2424_s2 + $0x20] sm:$0xff]   ;;  %v1611_v9 = vld [vmem:[%s2424_s2 + $0x30] sm:$0xff]   ;;  %v1612_v10 = vld [vmem:[%s2424_s2 + $0x38] sm:$0xff]  }
  0x23   : > { %1469 = vmatprep.subr.bf16.mxu0 %v1606_v3  ;;  %v1614_v11 = vld [vmem:[%s1976_s20 + $0x8] sm:$0xff]   ;;  %v1615_v12 = vld [vmem:[%s1976_s20 + $0x10] sm:$0xff]   ;;  %v1616_v13 = vld [vmem:[%s1976_s20 + $0x18] sm:$0xff]  }
  0x24   : > { %v1617_v14 = vld [vmem:[%s1976_s20 + $0x20] sm:$0xff]   ;;  %v1618_v15 = vld [vmem:[%s1976_s20 + $0x28] sm:$0xff]   ;;  %v1619_v16 = vld [vmem:[%s1976_s20 + $0x30] sm:$0xff]  }
  0x25   : > { %v1620_v17 = vld [vmem:[%s1976_s20 + $0x38] sm:$0xff]   ;;  %v1621_v18 = vld [vmem:[%s2426_s4 + $0x4] ss:$8 sps:$4 sm:$0xff]   ;;  %v1623_v19 = vld [vmem:[%s2426_s4] ss:$8 sps:$4 sm:$0xff]  }
  0x26   : > { %1470 = vmatpush3.bf16.msra.mxu0 %v1606_v3  ;;  %710 = vmatprep.subr.bf16.mxu1 %v1621_v18  ;;  %v1624_v20 = vld [vmem:[%s2426_s4 + $0x14] ss:$8 sps:$4 sm:$0xff]   ;;  %v1626_v21 = vld [vmem:[%s2426_s4 + $0x10] ss:$8 sps:$4 sm:$0xff]   ;;  %v2036_v23 = vld [vmem:[%s2425_s3] ss:$0 sm:$0xff] }
  0x27   : > { %1471 = vmatprep.subr.bf16.mxu0 %v1607_v4  ;;  %711 = vmatpush1.bf16.msra.mxu1 %v1623_v19  ;;  %v611_v27 = vld [vmem:[%s1981_s10 + $0x10] sm:$0xff]  ;;  %v612_v30 = vld [vmem:[%s1981_s10 + $0x18] sm:$0xff]  ;;  %v609_v31 = vld [vmem:[%s1981_s10] sm:$0xff] }
  0x28   : > { %712 = vmatprep.subr.bf16.mxu1 %v1624_v20  ;;  %v610_v34 = vld [vmem:[%s1981_s10 + $0x8] sm:$0xff]  ;;  %v615_v43 = vld [vmem:[%s1981_s10 + $0x30] sm:$0xff]  ;;  %v613_v46 = vld [vmem:[%s1981_s10 + $0x20] sm:$0xff] }
  0x29   : > { %v616_v49 = vld [vmem:[%s1981_s10 + $0x38] sm:$0xff]  ;;  %v614_v53 = vld [vmem:[%s1981_s10 + $0x28] sm:$0xff]  ;;  %v619_v61 = vld [vmem:[%s1981_s10 + $0x50] sm:$0xff] }
  0x2a   : > { %1472 = vmatpush3.bf16.msra.mxu0 %v1607_v4  ;;  %v617_v0 = vld [vmem:[%s1981_s10 + $0x40] sm:$0xff]  ;;  %v620_v3 = vld [vmem:[%s1981_s10 + $0x58] sm:$0xff] }
  0x2b   : > { %1473 = vmatprep.subr.bf16.mxu0 %v1608_v5  ;;  %713 = vmatpush1.bf16.msra.mxu1 %v1626_v21  ;;  %v621_v18 = vld [vmem:[%s1981_s10 + $0x60] sm:$0xff]  ;;  %v624_v21 = vld [vmem:[%s1981_s10 + $0x78] sm:$0xff] }
  0x2e   : > { %1474 = vmatpush3.bf16.msra.mxu0 %v1608_v5 }
  0x2f   : > { %1475 = vmatprep.subr.bf16.mxu0 %v1609_v7 }
  0x32   : > { %1476 = vmatpush3.bf16.msra.mxu0 %v1609_v7  ;;  %v618_v7 = vld [vmem:[%s1981_s10 + $0x48] sm:$0xff] }
  0x33   : > { %1477 = vmatprep.subr.bf16.mxu0 %v1610_v8 }
  0x36   : > { %1478 = vmatpush3.bf16.msra.mxu0 %v1610_v8 }
  0x37   : > { %1479 = vmatprep.subr.bf16.mxu0 %v1611_v9 }
  0x3a   : > { %1480 = vmatpush3.bf16.msra.mxu0 %v1611_v9 }
  0x3b   : > { %1481 = vmatprep.subr.bf16.mxu0 %v1612_v10 }
  0x3e   : > { %1482 = vmatpush3.bf16.msra.mxu0 %v1612_v10 }
  0x41   : > { %1484 = vmatmul.mubr.bf16.vlgmr.msra.gmra.mrb[0].mxu0 %v1614_v11 }
  0x42   : > { %1487 = vmatprep.mubr.bf16.mxu0 %v1615_v12 }
  0x49   : > { %1488 = vmatmul.mubr.bf16.gmra.mrb[4].mxu0 %v1616_v13 }
  0x4a   : > { %1491 = vmatprep.mubr.bf16.mxu0 %v1617_v14 }
  0x51   : > { %1492 = vmatmul.mubr.bf16.gmra.mrb[8].mxu0 %v1618_v15  ;;  %v623_v15 = vld [vmem:[%s1981_s10 + $0x70] sm:$0xff] }
  0x52   : > { %1495 = vmatprep.mubr.bf16.mxu0 %v1619_v16 }
  0x59   : > { %1496 = vmatmul.mubr.bf16.gmra.mrb[12].mxu0 %v1620_v17 }
 0x114   : > { %v1485_v24 = vpop.f32.mrb[0].mxu0 }
 0x115   : > { %v555_v25 = vadd.f32 %v1485_v24, %v2036_v23  ;;  %v546_v26 = vpop.f32.mrb[1].mxu0 }
 0x116   : > { %v547_v28 = vadd.f32 %v2036_v23, %v546_v26  ;;  %v1486_v29 = vpop.f32.mrb[2].mxu0 }
 0x117   : > { %v558_v32 = vadd.f32 %v1486_v29, %v2036_v23  ;;  %v549_v33 = vpop.f32.mrb[3].mxu0  ;;  %v627_v36 = vadd.f32 %v611_v27, %v555_v25  ;;  %v622_v27 = vld [vmem:[%s1981_s10 + $0x68] sm:$0xff] }
 0x118   : > { %v550_v35 = vadd.f32 %v2036_v23, %v549_v33  ;;  %v625_v38 = vadd.f32 %v609_v31, %v547_v28 }
 0x119   : > { %v628_v37 = vadd.f32 %v612_v30, %v558_v32 }
 0x11a   : > { %v626_v39 = vadd.f32 %v610_v34, %v550_v35 }
 0x11b   : > { %v642_v40 = vpack.c.bf16 %v628_v37, %v627_v36  ;;  %v653_v36 = vld [vmem:[%s2427_s5] sm:$0x3] }
 0x11c   : > { %v641_v41 = vpack.c.bf16 %v626_v39, %v625_v38  ;;  %v1489_v42 = vpop.f32.mrb[4].mxu0 }
 0x11d   : > { %v571_v44 = vadd.f32 %v1489_v42, %v2036_v23  ;;  %v562_v45 = vpop.f32.mrb[5].mxu0 }
 0x11e   : > { %1372 = vmatmul.mubr.msk.bf16.vlgmr.msra.gmra.mrb[0].mxu1 %vm685_vm1, %v641_v41  ;;  %v563_v47 = vadd.f32 %v2036_v23, %v562_v45  ;;  %v1490_v48 = vpop.f32.mrb[6].mxu0 }
 0x11f   : > { %v631_v50 = vadd.f32 %v615_v43, %v571_v44  ;;  %v574_v51 = vadd.f32 %v1490_v48, %v2036_v23  ;;  %v565_v52 = vpop.f32.mrb[7].mxu0  ;;  %752 = vmatprep.mubr.bf16.mxu1 %v1852_v22 }
 0x120   : > { %v629_v54 = vadd.f32 %v613_v46, %v563_v47  ;;  %v566_v55 = vadd.f32 %v2036_v23, %v565_v52 }
 0x121   : > { %v632_v56 = vadd.f32 %v616_v49, %v574_v51 }
 0x122   : > { %v630_v57 = vadd.f32 %v614_v53, %v566_v55 }
 0x123   : > { %v644_v58 = vpack.c.bf16 %v632_v56, %v631_v50 }
 0x124   : > { %v643_v59 = vpack.c.bf16 %v630_v57, %v629_v54  ;;  %v1493_v60 = vpop.f32.mrb[8].mxu0 }
 0x125   : > { %v587_v62 = vadd.f32 %v1493_v60, %v2036_v23  ;;  %v578_v63 = vpop.f32.mrb[9].mxu0 }
 0x126   : > { %1373 = vmatmul.mubr.msk.bf16.gmra.mrb[4].mxu1 %vm685_vm1, %v642_v40  ;;  %v579_v1 = vadd.f32 %v2036_v23, %v578_v63  ;;  %v1494_v2 = vpop.f32.mrb[10].mxu0 }
 0x127   : > { %762 = vmatprep.mubr.bf16.mxu1 %v1852_v22  ;;  %v635_v4 = vadd.f32 %v619_v61, %v587_v62  ;;  %v590_v5 = vadd.f32 %v1494_v2, %v2036_v23  ;;  %v581_v6 = vpop.f32.mrb[11].mxu0 }
 0x128   : > { %v633_v8 = vadd.f32 %v617_v0, %v579_v1  ;;  %v582_v9 = vadd.f32 %v2036_v23, %v581_v6 }
 0x129   : > { %v636_v10 = vadd.f32 %v620_v3, %v590_v5 }
 0x12a   : > { %v634_v11 = vadd.f32 %v618_v7, %v582_v9 }
 0x12b   : > { %v646_v12 = vpack.c.bf16 %v636_v10, %v635_v4 }
 0x12c   : > { %v645_v13 = vpack.c.bf16 %v634_v11, %v633_v8  ;;  %v1497_v14 = vpop.f32.mrb[12].mxu0 }
 0x12d   : > { %v603_v16 = vadd.f32 %v1497_v14, %v2036_v23  ;;  %v594_v17 = vpop.f32.mrb[13].mxu0 }
 0x12e   : > { %1374 = vmatmul.mubr.msk.bf16.gmra.mrb[8].mxu1 %vm685_vm1, %v643_v59  ;;  %v595_v19 = vadd.f32 %v2036_v23, %v594_v17  ;;  %v1498_v20 = vpop.f32.mrb[14].mxu0 }
 0x12f   : > { %772 = vmatprep.mubr.bf16.mxu1 %v1852_v22  ;;  %v639_v24 = vadd.f32 %v623_v15, %v603_v16  ;;  %v606_v25 = vadd.f32 %v1498_v20, %v2036_v23  ;;  %v597_v26 = vpop.f32.mrb[15].mxu0 }
 0x130   : > { %v637_v28 = vadd.f32 %v621_v18, %v595_v19  ;;  %v598_v29 = vadd.f32 %v2036_v23, %v597_v26  ;;  %v655_v23 = vlaneseq }
 0x131   : > { %v640_v30 = vadd.f32 %v624_v21, %v606_v25 }
 0x132   : > { %v638_v31 = vadd.f32 %v622_v27, %v598_v29  ;;  %v2086_v34 = vshrl.u32 %v655_v23, 7  ;;  %vm1111_vm2 = vcmp.lt.s32.totalorder %v655_v23, 256  ;;  %v1121_v23 = vld [vmem:[%s2428_s6 + $0x8] sm:$0xff] (!%p1412_p1) }
 0x133   : > { %v648_v32 = vpack.c.bf16 %v640_v30, %v639_v24 }
 0x134   : > { %v647_v33 = vpack.c.bf16 %v638_v31, %v637_v28  ;;  %v657_v35 = vsub.s32 0, %v2086_v34  ;;  %v661_v37 = vsub.s32 1, %v2086_v34 }
 0x136   : > { %1375 = vmatmul.mubr.msk.bf16.gmra.mrb[12].mxu1 %vm685_vm1, %v644_v58  ;;  %v2095_v38 = vrot.slane %v653_v36, %v657_v35 }
 0x137   : > { %782 = vmatprep.mubr.bf16.mxu1 %v1852_v22 }
 0x13e   : > { %1376 = vmatmul.mubr.msk.bf16.gmra.mrb[16].mxu1 %vm685_vm1, %v645_v13 }
 0x13f   : > { %792 = vmatprep.mubr.bf16.mxu1 %v1852_v22 }
 0x146   : > { %1377 = vmatmul.mubr.msk.bf16.gmra.mrb[20].mxu1 %vm685_vm1, %v646_v12 }
 0x147   : > { %802 = vmatprep.mubr.bf16.mxu1 %v1852_v22 }
 0x14e   : > { %1378 = vmatmul.mubr.msk.bf16.gmra.mrb[24].mxu1 %vm685_vm1, %v647_v33 }
 0x14f   : > { %812 = vmatprep.mubr.bf16.mxu1 %v1852_v22  ;;  %v2099_v22 = vrot.slane %v653_v36, %v661_v37 }
 0x156   : > { %1379 = vmatmul.mubr.msk.bf16.gmra.mrb[28].mxu1 %vm685_vm1, %v648_v32 }
 0x1f1   : > { %v744_v39 = vpop.f32.mrb[0].mxu1 }
 0x1f2   : > { %v2102_v40 = vadd.f32 %v744_v39, %v2095_v38  ;;  %v746_v41 = vpop.f32.mrb[1].mxu1 }
 0x1f3   : > { %v2105_v42 = vadd.f32 %v746_v41, %v2099_v22  ;;  %v748_v43 = vpop.f32.mrb[2].mxu1 }
 0x1f4   : > { %v1380_v44 = vmul.f32 -1.442695, %v2102_v40  ;;  %v2109_v45 = vadd.f32 %v748_v43, %v2095_v38  ;;  %v750_v46 = vpop.f32.mrb[3].mxu1 }
 0x1f5   : > { %v1381_v47 = vmul.f32 -1.442695, %v2105_v42  ;;  %v2113_v48 = vadd.f32 %v750_v46, %v2099_v22 }
 0x1f6   : > { %1627 = vpow2.f32 %v1380_v44  ;;  %v1382_v49 = vmul.f32 -1.442695, %v2109_v45 }
 0x1f7   : > { %1629 = vpow2.f32 %v1381_v47  ;;  %v1383_v50 = vmul.f32 -1.442695, %v2113_v48 }
 0x1f8   : > { %1631 = vpow2.f32 %v1382_v49 }
 0x1f9   : > { %1633 = vpow2.f32 %v1383_v50  ;;  %v754_v51 = vpop.f32.mrb[4].mxu1 }
 0x1fa   : > { %v2118_v52 = vadd.f32 %v754_v51, %v2095_v38  ;;  %v756_v53 = vpop.f32.mrb[5].mxu1 }
 0x1fb   : > { %v2121_v54 = vadd.f32 %v756_v53, %v2099_v22  ;;  %v758_v55 = vpop.f32.mrb[6].mxu1 }
 0x1fc   : > { %v1384_v56 = vmul.f32 -1.442695, %v2118_v52  ;;  %v2125_v57 = vadd.f32 %v758_v55, %v2095_v38  ;;  %v760_v58 = vpop.f32.mrb[7].mxu1 }
 0x1fd   : > { %v1385_v59 = vmul.f32 -1.442695, %v2121_v54  ;;  %v2129_v60 = vadd.f32 %v760_v58, %v2099_v22 }
 0x1fe   : > { %1635 = vpow2.f32 %v1384_v56  ;;  %v1386_v61 = vmul.f32 -1.442695, %v2125_v57 }
 0x1ff   : > { %1637 = vpow2.f32 %v1385_v59  ;;  %v1387_v62 = vmul.f32 -1.442695, %v2129_v60 }
 0x200   : > { %v1628_v63 = vpop.eup %1627  ;;  %1639 = vpow2.f32 %v1386_v61 }
 0x201   : > { %v1630_v0 = vpop.eup %1629  ;;  %v919_v1 = vadd.f32 1.0, %v1628_v63  ;;  %1641 = vpow2.f32 %v1387_v62  ;;  %v764_v2 = vpop.f32.mrb[8].mxu1 }
 0x202   : > { %v1632_v3 = vpop.eup %1631  ;;  %v920_v4 = vadd.f32 1.0, %v1630_v0  ;;  %v2134_v5 = vadd.f32 %v764_v2, %v2095_v38  ;;  %v766_v6 = vpop.f32.mrb[9].mxu1 }
 0x203   : > { %v1634_v7 = vpop.eup %1633  ;;  %1643 = vrcp.f32 %v919_v1  ;;  %v921_v8 = vadd.f32 1.0, %v1632_v3  ;;  %v2137_v9 = vadd.f32 %v766_v6, %v2099_v22  ;;  %v768_v10 = vpop.f32.mrb[10].mxu1 }
 0x204   : > { %1645 = vrcp.f32 %v920_v4  ;;  %v922_v11 = vadd.f32 1.0, %v1634_v7  ;;  %v1388_v12 = vmul.f32 -1.442695, %v2134_v5  ;;  %v2141_v13 = vadd.f32 %v768_v10, %v2095_v38  ;;  %v770_v14 = vpop.f32.mrb[11].mxu1 }
 0x205   : > { %1647 = vrcp.f32 %v921_v8  ;;  %v1389_v15 = vmul.f32 -1.442695, %v2137_v9  ;;  %v2145_v16 = vadd.f32 %v770_v14, %v2099_v22 }
 0x206   : > { %1649 = vrcp.f32 %v922_v11  ;;  %v1390_v17 = vmul.f32 -1.442695, %v2141_v13 }
 0x207   : > { %1651 = vpow2.f32 %v1388_v12  ;;  %v1391_v18 = vmul.f32 -1.442695, %v2145_v16 }
 0x208   : > { %v1636_v19 = vpop.eup %1635  ;;  %1653 = vpow2.f32 %v1389_v15 }
 0x209   : > { %v1638_v20 = vpop.eup %1637  ;;  %v923_v21 = vadd.f32 1.0, %v1636_v19  ;;  %1655 = vpow2.f32 %v1390_v17  ;;  %v774_v24 = vpop.f32.mrb[12].mxu1 }
 0x20a   : > { %v1640_v25 = vpop.eup %1639  ;;  %v924_v26 = vadd.f32 1.0, %v1638_v20  ;;  %1657 = vpow2.f32 %v1391_v18  ;;  %v2150_v27 = vadd.f32 %v774_v24, %v2095_v38  ;;  %v776_v28 = vpop.f32.mrb[13].mxu1 }
 0x20b   : > { %v1642_v29 = vpop.eup %1641  ;;  %1659 = vrcp.f32 %v923_v21  ;;  %v925_v30 = vadd.f32 1.0, %v1640_v25  ;;  %v2153_v31 = vadd.f32 %v776_v28, %v2099_v22  ;;  %v778_v32 = vpop.f32.mrb[14].mxu1 }
 0x20c   : > { %1661 = vrcp.f32 %v924_v26  ;;  %v926_v33 = vadd.f32 1.0, %v1642_v29  ;;  %v1392_v36 = vmul.f32 -1.442695, %v2150_v27  ;;  %v2157_v39 = vadd.f32 %v778_v32, %v2095_v38  ;;  %v780_v41 = vpop.f32.mrb[15].mxu1 }
 0x20d   : > { %v1644_v43 = vpop.eup %1643  ;;  %1663 = vrcp.f32 %v925_v30  ;;  %v1393_v44 = vmul.f32 -1.442695, %v2153_v31  ;;  %v2161_v46 = vadd.f32 %v780_v41, %v2099_v22 }
 0x20e   : > { %v1646_v47 = vpop.eup %1645  ;;  %1665 = vrcp.f32 %v926_v33  ;;  %v1394_v49 = vmul.f32 -1.442695, %v2157_v39  ;;  %v1015_v55 = vmul.f32 %v1644_v43, %v2102_v40 }
 0x20f   : > { %v1648_v50 = vpop.eup %1647  ;;  %1667 = vpow2.f32 %v1392_v36  ;;  %v1395_v51 = vmul.f32 -1.442695, %v2161_v46  ;;  %v1016_v59 = vmul.f32 %v1646_v47, %v2105_v42 }
 0x210   : > { %v1650_v53 = vpop.eup %1649  ;;  %v1017_v56 = vmul.f32 %v1648_v50, %v2109_v45  ;;  %1669 = vpow2.f32 %v1393_v44 }
 0x211   : > { %v1652_v58 = vpop.eup %1651  ;;  %v1018_v61 = vmul.f32 %v1650_v53, %v2113_v48  ;;  %1671 = vpow2.f32 %v1394_v49  ;;  %v784_v62 = vpop.f32.mrb[16].mxu1 }
 0x212   : > { %v1654_v63 = vpop.eup %1653  ;;  %v1048_v0 = vadd.f32 %v1017_v56, %v1015_v55  ;;  %v927_v1 = vadd.f32 1.0, %v1652_v58  ;;  %1673 = vpow2.f32 %v1395_v51  ;;  %v2170_v2 = vadd.f32 %v784_v62, %v2095_v38  ;;  %v786_v3 = vpop.f32.mrb[17].mxu1 }
 0x213   : > { %v1656_v4 = vpop.eup %1655  ;;  %v1069_v40 = vadd.f32 %v1018_v61, %v1016_v59  ;;  %v928_v6 = vadd.f32 1.0, %v1654_v63  ;;  %v2173_v45 = vadd.f32 %v786_v3, %v2099_v22  ;;  %v788_v7 = vpop.f32.mrb[18].mxu1 }
 0x214   : > { %v1658_v42 = vpop.eup %1657  ;;  %1675 = vrcp.f32 %v927_v1  ;;  %v929_v48 = vadd.f32 1.0, %v1656_v4  ;;  %v1396_v8 = vmul.f32 -1.442695, %v2170_v2  ;;  %v2177_v10 = vadd.f32 %v788_v7, %v2095_v38  ;;  %v790_v11 = vpop.f32.mrb[19].mxu1 }
 0x215   : > { %v1660_v12 = vpop.eup %1659  ;;  %1677 = vrcp.f32 %v928_v6  ;;  %v930_v14 = vadd.f32 1.0, %v1658_v42  ;;  %v1397_v15 = vmul.f32 -1.442695, %v2173_v45  ;;  %v2181_v17 = vadd.f32 %v790_v11, %v2099_v22 }
 0x216   : > { %v1662_v18 = vpop.eup %1661  ;;  %v1019_v19 = vmul.f32 %v1660_v12, %v2118_v52  ;;  %1679 = vrcp.f32 %v929_v48  ;;  %v1398_v20 = vmul.f32 -1.442695, %v2177_v10 }
 0x217   : > { %v1664_v21 = vpop.eup %1663  ;;  %v1020_v24 = vmul.f32 %v1662_v18, %v2121_v54  ;;  %1681 = vrcp.f32 %v930_v14  ;;  %v1399_v25 = vmul.f32 -1.442695, %v2181_v17 }
 0x218   : > { %v1666_v26 = vpop.eup %1665  ;;  %v1049_v28 = vadd.f32 %v1048_v0, %v1019_v19  ;;  %v1021_v29 = vmul.f32 %v1664_v21, %v2125_v57  ;;  %1683 = vpow2.f32 %v1396_v8 }
 0x219   : > { %v1668_v30 = vpop.eup %1667  ;;  %v1070_v32 = vadd.f32 %v1069_v40, %v1020_v24  ;;  %v1022_v33 = vmul.f32 %v1666_v26, %v2129_v60  ;;  %1685 = vpow2.f32 %v1397_v15  ;;  %v794_v52 = vpop.f32.mrb[20].mxu1 }
 0x21a   : > { %v1670_v36 = vpop.eup %1669  ;;  %v1050_v41 = vadd.f32 %v1049_v28, %v1021_v29  ;;  %v931_v43 = vadd.f32 1.0, %v1668_v30  ;;  %1687 = vpow2.f32 %v1398_v20  ;;  %v2190_v54 = vadd.f32 %v794_v52, %v2095_v38  ;;  %v796_v44 = vpop.f32.mrb[21].mxu1 }
 0x21b   : > { %v1672_v47 = vpop.eup %1671  ;;  %v1071_v49 = vadd.f32 %v1070_v32, %v1022_v33  ;;  %v932_v50 = vadd.f32 1.0, %v1670_v36  ;;  %1689 = vpow2.f32 %v1399_v25  ;;  %v2193_v57 = vadd.f32 %v796_v44, %v2099_v22  ;;  %v798_v51 = vpop.f32.mrb[22].mxu1 }
 0x21c   : > { %v1674_v53 = vpop.eup %1673  ;;  %1691 = vrcp.f32 %v931_v43  ;;  %v933_v60 = vadd.f32 1.0, %v1672_v47  ;;  %v1400_v55 = vmul.f32 -1.442695, %v2190_v54  ;;  %v2197_v56 = vadd.f32 %v798_v51, %v2095_v38  ;;  %v800_v58 = vpop.f32.mrb[23].mxu1 }
 0x21d   : > { %1693 = vrcp.f32 %v932_v50  ;;  %v934_v59 = vadd.f32 1.0, %v1674_v53  ;;  %v1401_v61 = vmul.f32 -1.442695, %v2193_v57  ;;  %v2201_v62 = vadd.f32 %v800_v58, %v2099_v22 }
 0x21e   : > { %v1676_v63 = vpop.eup %1675  ;;  %1695 = vrcp.f32 %v933_v60  ;;  %v1402_v0 = vmul.f32 -1.442695, %v2197_v56 }
 0x21f   : > { %v1678_v1 = vpop.eup %1677  ;;  %v1023_v3 = vmul.f32 %v1676_v63, %v2134_v5  ;;  %1697 = vrcp.f32 %v934_v59  ;;  %v1403_v4 = vmul.f32 -1.442695, %v2201_v62 }
 0x220   : > { %v1680_v40 = vpop.eup %1679  ;;  %v1024_v6 = vmul.f32 %v1678_v1, %v2137_v9  ;;  %1699 = vpow2.f32 %v1400_v55 }
 0x221   : > { %v1682_v7 = vpop.eup %1681  ;;  %v1051_v42 = vadd.f32 %v1050_v41, %v1023_v3  ;;  %v1025_v48 = vmul.f32 %v1680_v40, %v2141_v13  ;;  %1701 = vpow2.f32 %v1401_v61  ;;  %v804_v8 = vpop.f32.mrb[24].mxu1 }
 0x222   : > { %v1684_v11 = vpop.eup %1683  ;;  %v1072_v12 = vadd.f32 %v1071_v49, %v1024_v6  ;;  %v1026_v14 = vmul.f32 %v1682_v7, %v2145_v16  ;;  %1703 = vpow2.f32 %v1402_v0  ;;  %v2210_v5 = vadd.f32 %v804_v8, %v2095_v38  ;;  %v806_v15 = vpop.f32.mrb[25].mxu1 }
 0x223   : > { %v1686_v18 = vpop.eup %1685  ;;  %v1052_v19 = vadd.f32 %v1051_v42, %v1025_v48  ;;  %v935_v20 = vadd.f32 1.0, %v1684_v11  ;;  %1705 = vpow2.f32 %v1403_v4  ;;  %v2213_v9 = vadd.f32 %v806_v15, %v2099_v22  ;;  %v808_v21 = vpop.f32.mrb[26].mxu1 }
 0x224   : > { %v1688_v13 = vpop.eup %1687  ;;  %v1073_v24 = vadd.f32 %v1072_v12, %v1026_v14  ;;  %v936_v25 = vadd.f32 1.0, %v1686_v18  ;;  %v2216_v26 = vadd.f32 %v808_v21, %v2095_v38  ;;  %v810_v16 = vpop.f32.mrb[27].mxu1  ;;  %v1404_v30 = vmul.f32 -1.442695, %v2210_v5 }
 0x225   : > { %v1690_v28 = vpop.eup %1689  ;;  %1707 = vrcp.f32 %v935_v20  ;;  %v937_v29 = vadd.f32 1.0, %v1688_v13  ;;  %v2220_v32 = vadd.f32 %v810_v16, %v2099_v22  ;;  %v1405_v36 = vmul.f32 -1.442695, %v2213_v9 }
 0x226   : > { %v1692_v33 = vpop.eup %1691  ;;  %1709 = vrcp.f32 %v936_v25  ;;  %v938_v52 = vadd.f32 1.0, %v1690_v28  ;;  %v1406_v44 = vmul.f32 -1.442695, %v2216_v26 }
 0x227   : > { %v1694_v41 = vpop.eup %1693  ;;  %v1027_v43 = vmul.f32 %v1692_v33, %v2150_v27  ;;  %1711 = vrcp.f32 %v937_v29  ;;  %v1407_v50 = vmul.f32 -1.442695, %v2220_v32 }
 0x228   : > { %v1696_v47 = vpop.eup %1695  ;;  %v1028_v49 = vmul.f32 %v1694_v41, %v2153_v31  ;;  %1713 = vrcp.f32 %v938_v52 }
 0x229   : > { %v1698_v51 = vpop.eup %1697  ;;  %v1053_v53 = vadd.f32 %v1052_v19, %v1027_v43  ;;  %v1029_v60 = vmul.f32 %v1696_v47, %v2157_v39  ;;  %1715 = vpow2.f32 %v1404_v30  ;;  %v814_v55 = vpop.f32.mrb[28].mxu1 }
 0x22a   : > { %v1700_v58 = vpop.eup %1699  ;;  %v1074_v59 = vadd.f32 %v1073_v24, %v1028_v49  ;;  %v1030_v61 = vmul.f32 %v1698_v51, %v2161_v46  ;;  %1717 = vpow2.f32 %v1405_v36  ;;  %v2230_v27 = vadd.f32 %v814_v55, %v2095_v38  ;;  %v816_v63 = vpop.f32.mrb[29].mxu1 }
 0x22b   : > { %v1702_v0 = vpop.eup %1701  ;;  %v1054_v31 = vadd.f32 %v1053_v53, %v1029_v60  ;;  %v939_v1 = vadd.f32 1.0, %v1700_v58  ;;  %1719 = vpow2.f32 %v1406_v44  ;;  %v2233_v3 = vadd.f32 %v816_v63, %v2099_v22  ;;  %v818_v4 = vpop.f32.mrb[30].mxu1 }
 0x22c   : > { %v1704_v39 = vpop.eup %1703  ;;  %v1075_v40 = vadd.f32 %v1074_v59, %v1030_v61  ;;  %v940_v6 = vadd.f32 1.0, %v1702_v0  ;;  %1721 = vpow2.f32 %v1407_v50  ;;  %v820_v7 = vpop.f32.mrb[31].mxu1  ;;  %v1408_v48 = vmul.f32 -1.442695, %v2230_v27 }
 0x22d   : > { %v1706_v42 = vpop.eup %1705  ;;  %1723 = vrcp.f32 %v939_v1  ;;  %v941_v46 = vadd.f32 1.0, %v1704_v39  ;;  %v2237_v8 = vadd.f32 %v818_v4, %v2095_v38  ;;  %v1409_v12 = vmul.f32 -1.442695, %v2233_v3 }
 0x22e   : > { %1725 = vrcp.f32 %v940_v6  ;;  %v942_v11 = vadd.f32 1.0, %v1706_v42  ;;  %v2241_v14 = vadd.f32 %v820_v7, %v2099_v22 }
 0x22f   : > { %v1708_v15 = vpop.eup %1707  ;;  %1727 = vrcp.f32 %v941_v46  ;;  %v1410_v18 = vmul.f32 -1.442695, %v2237_v8 }
 0x230   : > { %v1710_v19 = vpop.eup %1709  ;;  %v1031_v20 = vmul.f32 %v1708_v15, %v2170_v2  ;;  %1729 = vrcp.f32 %v942_v11  ;;  %v1411_v21 = vmul.f32 -1.442695, %v2241_v14 }
 0x231   : > { %v1712_v13 = vpop.eup %1711  ;;  %v1032_v38 = vmul.f32 %v1710_v19, %v2173_v45  ;;  %1731 = vpow2.f32 %v1408_v48 }
 0x232   : > { %v1714_v24 = vpop.eup %1713  ;;  %v1055_v25 = vadd.f32 %v1054_v31, %v1031_v20  ;;  %v1033_v16 = vmul.f32 %v1712_v13, %v2177_v10  ;;  %1733 = vpow2.f32 %v1409_v12 }
 0x233   : > { %v1716_v22 = vpop.eup %1715  ;;  %v1076_v28 = vadd.f32 %v1075_v40, %v1032_v38  ;;  %v1034_v29 = vmul.f32 %v1714_v24, %v2181_v17  ;;  %1735 = vpow2.f32 %v1410_v18 }
 0x234   : > { %v1718_v30 = vpop.eup %1717  ;;  %v1056_v33 = vadd.f32 %v1055_v25, %v1033_v16  ;;  %v943_v2 = vadd.f32 1.0, %v1716_v22  ;;  %1737 = vpow2.f32 %v1411_v21 }
 0x235   : > { %v1720_v52 = vpop.eup %1719  ;;  %v1077_v36 = vadd.f32 %v1076_v28, %v1034_v29  ;;  %v944_v41 = vadd.f32 1.0, %v1718_v30 }
 0x236   : > { %v1722_v43 = vpop.eup %1721  ;;  %1739 = vrcp.f32 %v943_v2  ;;  %v945_v45 = vadd.f32 1.0, %v1720_v52 }
 0x237   : > { %v1724_v44 = vpop.eup %1723  ;;  %1741 = vrcp.f32 %v944_v41  ;;  %v946_v47 = vadd.f32 1.0, %v1722_v43 }
 0x238   : > { %v1726_v10 = vpop.eup %1725  ;;  %v1035_v49 = vmul.f32 %v1724_v44, %v2190_v54  ;;  %1743 = vrcp.f32 %v945_v45 }
 0x239   : > { %v1728_v50 = vpop.eup %1727  ;;  %v1036_v17 = vmul.f32 %v1726_v10, %v2193_v57  ;;  %1745 = vrcp.f32 %v946_v47 }
 0x23a   : > { %v1730_v51 = vpop.eup %1729  ;;  %v1057_v53 = vadd.f32 %v1056_v33, %v1035_v49  ;;  %v1037_v60 = vmul.f32 %v1728_v50, %v2197_v56  ;;  %v1853_v33 = vmov 1966171168   ;;  %v1047_v49 = vld [vmem:[#allocation2] sm:$0x3] }
 0x23b   : > { %v1732_v55 = vpop.eup %1731  ;;  %v1078_v58 = vadd.f32 %v1077_v36, %v1036_v17  ;;  %v1038_v59 = vmul.f32 %v1730_v51, %v2201_v62  ;;  %v1094_v2 = vunpack.c.l.s4 %v1853_v33  ;;  %v1136_v51 = vld [vmem:[%s2428_s6 + $0x80] sm:$0xff] (!%p1412_p1)  ;;  %v1151_v33 = vld [vmem:[%s2428_s6 + $0xf8] sm:$0xff] (!%p1412_p1) }
 0x23c   : > { %v1734_v61 = vpop.eup %1733  ;;  %v1058_v63 = vadd.f32 %v1057_v53, %v1037_v60  ;;  %v947_v0 = vadd.f32 1.0, %v1732_v55  ;;  %v1137_v53 = vld [vmem:[%s2428_s6 + $0x88] sm:$0xff] (!%p1412_p1)  ;;  %v1120_v60 = vld [vmem:[%s2428_s6] sm:$0xff] (!%p1412_p1) }
 0x23d   : > { %v1736_v31 = vpop.eup %1735  ;;  %v1079_v1 = vadd.f32 %v1078_v58, %v1038_v59  ;;  %v948_v4 = vadd.f32 1.0, %v1734_v61  ;;  %v1499_v55 = vpack.c.bf16 (!%p1412_p1), %v1137_v53, %v1136_v51  ;;  %v1138_v58 = vld [vmem:[%s2428_s6 + $0x90] sm:$0xff] (!%p1412_p1)  ;;  %v1139_v59 = vld [vmem:[%s2428_s6 + $0x98] sm:$0xff] (!%p1412_p1)  ;;  %v1501_v61 = vpack.c.bf16 (!%p1412_p1), %v1121_v23, %v1120_v60 }
 0x23e   : > { %v1738_v54 = vpop.eup %1737  ;;  %1747 = vrcp.f32 %v947_v0  ;;  %v949_v39 = vadd.f32 1.0, %v1736_v31  ;;  %v1122_v0 = vld [vmem:[%s2428_s6 + $0x10] sm:$0xff] (!%p1412_p1)  ;;  %v1123_v31 = vld [vmem:[%s2428_s6 + $0x18] sm:$0xff] (!%p1412_p1) }
 0x23f   : > { %1749 = vrcp.f32 %v948_v4  ;;  %v950_v57 = vadd.f32 1.0, %v1738_v54  ;;  %1500 = vmatprep.subr.bf16.mxu0 (!%p1412_p1), %v1499_v55  ;;  %v1141_v4 = vld [vmem:[%s2428_s6 + $0xa8] sm:$0xff] (!%p1412_p1)  ;;  %v1505_v54 = vpack.c.bf16 (!%p1412_p1), %v1123_v31, %v1122_v0 }
 0x240   : > { %v1740_v40 = vpop.eup %1739  ;;  %1751 = vrcp.f32 %v949_v39  ;;  %1502 = vmatpush3.bf16.msra.mxu0 (!%p1412_p1), %v1501_v61 }
 0x241   : > { %v1742_v6 = vpop.eup %1741  ;;  %v1039_v56 = vmul.f32 %v1740_v40, %v2210_v5  ;;  %1753 = vrcp.f32 %v950_v57  ;;  %v1124_v57 = vld [vmem:[%s2428_s6 + $0x20] sm:$0xff] (!%p1412_p1)  ;;  %v1125_v40 = vld [vmem:[%s2428_s6 + $0x28] sm:$0xff] (!%p1412_p1) }
 0x242   : > { %v1744_v7 = vpop.eup %1743  ;;  %v1040_v62 = vmul.f32 %v1742_v6, %v2213_v9  ;;  %v1142_v6 = vld [vmem:[%s2428_s6 + $0xb0] sm:$0xff] (!%p1412_p1) }
 0x243   : > { %v1746_v42 = vpop.eup %1745  ;;  %v1059_v46 = vadd.f32 %v1058_v63, %v1039_v56  ;;  %v1041_v48 = vmul.f32 %v1744_v7, %v2216_v26  ;;  %v1503_v63 = vpack.c.bf16 (!%p1412_p1), %v1139_v59, %v1138_v58  ;;  %v1143_v56 = vld [vmem:[%s2428_s6 + $0xb8] sm:$0xff] (!%p1412_p1)  ;;  %v1509_v7 = vpack.c.bf16 (!%p1412_p1), %v1125_v40, %v1124_v57 }
 0x244   : > { %v1080_v11 = vadd.f32 %v1079_v1, %v1040_v62  ;;  %v1042_v12 = vmul.f32 %v1746_v42, %v2220_v32  ;;  %v1140_v1 = vld [vmem:[%s2428_s6 + $0xa0] sm:$0xff] (!%p1412_p1)  ;;  %v1511_v62 = vpack.c.bf16 (!%p1412_p1), %v1143_v56, %v1142_v6  ;;  %v1126_v42 = vld [vmem:[%s2428_s6 + $0x30] sm:$0xff] (!%p1412_p1) }
 0x245   : > { %v1060_v15 = vadd.f32 %v1059_v46, %v1041_v48  ;;  %1504 = vmatprep.subr.bf16.mxu0 (!%p1412_p1), %v1503_v63  ;;  %v1507_v39 = vpack.c.bf16 (!%p1412_p1), %v1141_v4, %v1140_v1  ;;  %v1127_v46 = vld [vmem:[%s2428_s6 + $0x38] sm:$0xff] (!%p1412_p1)  ;;  %v1144_v48 = vld [vmem:[%s2428_s6 + $0xc0] sm:$0xff] (!%p1412_p1) }
 0x246   : > { %v1081_v18 = vadd.f32 %v1080_v11, %v1042_v12  ;;  %1506 = vmatpush3.bf16.msra.mxu0 (!%p1412_p1), %v1505_v54  ;;  %v1145_v11 = vld [vmem:[%s2428_s6 + $0xc8] sm:$0xff] (!%p1412_p1) }
 0x247   : > { %1508 = vmatprep.subr.bf16.mxu0 (!%p1412_p1), %v1507_v39 }
 0x248   : > { %v1748_v19 = vpop.eup %1747 }
 0x249   : > { %v1750_v20 = vpop.eup %1749  ;;  %v1043_v21 = vmul.f32 %v1748_v19, %v2230_v27  ;;  %v1515_v19 = vpack.c.bf16 (!%p1412_p1), %v1145_v11, %v1144_v48 }
 0x24a   : > { %v1752_v13 = vpop.eup %1751  ;;  %v1044_v5 = vmul.f32 %v1750_v20, %v2233_v3  ;;  %v1095_v3 = vunpack.c.0.s8 %v1094_v2  ;;  %1510 = vmatpush3.bf16.msra.mxu0 (!%p1412_p1), %v1509_v7  ;;  %v1128_v20 = vld [vmem:[%s2428_s6 + $0x40] sm:$0xff] (!%p1412_p1) }
 0x24b   : > { %v1754_v38 = vpop.eup %1753  ;;  %v1061_v24 = vadd.f32 %v1060_v15, %v1043_v21  ;;  %v1045_v9 = vmul.f32 %v1752_v13, %v2237_v8  ;;  %1512 = vmatprep.subr.bf16.mxu0 (!%p1412_p1), %v1511_v62  ;;  %v1129_v21 = vld [vmem:[%s2428_s6 + $0x48] sm:$0xff] (!%p1412_p1) }
 0x24c   : > { %v1082_v25 = vadd.f32 %v1081_v18, %v1044_v5  ;;  %v1046_v16 = vmul.f32 %v1754_v38, %v2241_v14  ;;  %v1098_v47 = vsub.s32 %v1095_v3, %v2086_v34  ;;  %v1513_v18 = vpack.c.bf16 (!%p1412_p1), %v1127_v46, %v1126_v42  ;;  %v1146_v5 = vld [vmem:[%s2428_s6 + $0xd0] sm:$0xff] (!%p1412_p1)  ;;  %v1147_v38 = vld [vmem:[%s2428_s6 + $0xd8] sm:$0xff] (!%p1412_p1) }
 0x24d   : > { %v1062_v26 = vadd.f32 %v1061_v24, %v1045_v9  ;;  %v1517_v24 = vpack.c.bf16 (!%p1412_p1), %v1129_v21, %v1128_v20  ;;  %v1519_v9 = vpack.c.bf16 (!%p1412_p1), %v1147_v38, %v1146_v5 }
 0x24e   : > { %v1083_v22 = vadd.f32 %v1082_v25, %v1046_v16  ;;  %1514 = vmatpush3.bf16.msra.mxu0 (!%p1412_p1), %v1513_v18  ;;  %v1130_v25 = vld [vmem:[%s2428_s6 + $0x50] sm:$0xff] (!%p1412_p1)  ;;  %v1148_v16 = vld [vmem:[%s2428_s6 + $0xe0] sm:$0xff] (!%p1412_p1) }
 0x24f   : > { %v1063_v28 = vrot.slane %v1062_v26, 4  ;;  %1516 = vmatprep.subr.bf16.mxu0 (!%p1412_p1), %v1515_v19 }
 0x250   : > { %v1084_v32 = vrot.slane %v1083_v22, 4 }
 0x251   : > { %v1064_v29 = vadd.f32 %v1063_v28, %v1062_v26  ;;  %v1149_v26 = vld [vmem:[%s2428_s6 + $0xe8] sm:$0xff] (!%p1412_p1) }
 0x252   : > { %v1085_v30 = vadd.f32 %v1084_v32, %v1083_v22  ;;  %1518 = vmatpush3.bf16.msra.mxu0 (!%p1412_p1), %v1517_v24  ;;  %v1523_v28 = vpack.c.bf16 (!%p1412_p1), %v1149_v26, %v1148_v16  ;;  %v1132_v32 = vld [vmem:[%s2428_s6 + $0x60] sm:$0xff] (!%p1412_p1) }
 0x253   : > { %v1065_v52 = vrot.slane %v1064_v29, 2  ;;  %1520 = vmatprep.subr.bf16.mxu0 (!%p1412_p1), %v1519_v9 }
 0x254   : > { %v1086_v27 = vrot.slane %v1085_v30, 2 }
 0x255   : > { %v1066_v36 = vadd.f32 %v1065_v52, %v1064_v29  ;;  %v1133_v29 = vld [vmem:[%s2428_s6 + $0x68] sm:$0xff] (!%p1412_p1) }
 0x256   : > { %v1087_v41 = vadd.f32 %v1086_v27, %v1085_v30  ;;  %v1150_v30 = vld [vmem:[%s2428_s6 + $0xf0] sm:$0xff] (!%p1412_p1)  ;;  %v1525_v2 = vpack.c.bf16 (!%p1412_p1), %v1133_v29, %v1132_v32 }
 0x257   : > { %v1067_v43 = vrot.slane %v1066_v36, 1  ;;  %v1527_v52 = vpack.c.bf16 (!%p1412_p1), %v1151_v33, %v1150_v30  ;;  %v1134_v27 = vld [vmem:[%s2428_s6 + $0x70] sm:$0xff] (!%p1412_p1) }
 0x258   : > { %v1088_v45 = vrot.slane %v1087_v41, 1 }
 0x259   : > { %v1068_v44 = vadd.f32 %v1067_v43, %v1066_v36  ;;  %v1135_v36 = vld [vmem:[%s2428_s6 + $0x78] sm:$0xff] (!%p1412_p1) }
 0x25a   : > { %v1089_v8 = vadd.f32 %v1088_v45, %v1087_v41  ;;  %v1529_v41 = vpack.c.bf16 (!%p1412_p1), %v1135_v36, %v1134_v27  ;;  %v1152_v45 = vld [vmem:[%s2429_s7] sm:$0x1] (!%p1412_p1) }
 0x25c   : > { %v1092_v14 = vcombine.low %v1068_v44, %v1089_v8 }
 0x25e   : > { %v1099_v10 = vrot.slane %v1092_v14, %v1098_v47  ;;  %1117 = sbr.rel (%p1412_p1) target bundleno = 854 (0x356), region = 60 }
 0x260   : > { %v1106_v50 = vrot.slane %v1099_v10, %v1098_v47 }
 0x262   : > { %v1108_v17 = vadd.f32 %v1106_v50, %v1047_v49 }
 0x264   : > { %1113 = vst.msk [vmem:[#allocation2] sm:$0x3] %vm1111_vm2, %v1108_v17 }
 0x26b   : > { %v1118_v12 = vld [vmem:[#allocation2] sm:$0x3] }
 0x26c   : > { %v1119_v15 = vmul.f32 0.00390625, %v1118_v12 }
 0x26e   : > { %v1161_v13 = vrot.slane %v1119_v15, %v661_v37  ;;  %v1131_v37 = vld [vmem:[%s2428_s6 + $0x58] sm:$0xff]  ;;  %v1157_v3 = vrot.slane %v1119_v15, %v657_v35 }
 0x26f   : > { %v1521_v22 = vpack.c.bf16 %v1131_v37, %v1130_v25 }
 0x270   : > { %1228 = vmatprep.mubr.f32.mxu0 %v1161_v13 }
 0x271   : > { %1522 = vmatpush3.bf16.msra.mxu0 %v1521_v22 }
 0x272   : > { %1524 = vmatprep.subr.bf16.mxu0 %v1523_v28 }
 0x275   : > { %1526 = vmatpush3.bf16.msra.mxu0 %v1525_v2 }
 0x276   : > { %1528 = vmatprep.subr.bf16.mxu0 %v1527_v52 }
 0x279   : > { %1530 = vmatpush3.bf16.msra.mxu0 %v1529_v41 }
 0x27c   : > { %1229 = vmatmul.mubr.f32.vlgmr.msra.gmra.mrb[0].mxu0 %v1157_v3 }
 0x34f   : > { %v1464_v43 = vpop.f32.mrb[0].mxu0 }
 0x350   : > { %v1465_v44 = vpop.f32.mrb[1].mxu0 }
 0x351   : > { %v1466_v8 = vadd.f32 %v1465_v44, %v1464_v43 }
 0x353   : > { %v1231_v47 = vadd.f32 %v1466_v8, %v1152_v45 }
 0x355   : > { %1235 = vst.msk [vmem:[%s1985_s21] sm:$0x1] %vm1234_vm3, %v1231_v47 }
 0x356 PF: > { %s1413_s13 = sshll.u32 %s1837_s9, 4  ;;  %s1249_s16 = sshll.u32 %s1985_s21, 4  ;;  %s1250_s16 = int_to_ptr.vmem [resolvable:$true] %s1249_s16 }
 0x357   : > { %s2372_s23 = scalar_lea.hbm %s2430_s8, %s1413_s13  ;;  %s1237_s24 = scalar_lea.sflag [#allocation4], %s345_s22 }
 0x358   : > { %s1755_s20 = scalar_lea.vmem %s1250_s16, 16  ;;  %s1854_s11 = smov [#allocation3]  }
 0x359   : > { %p1756_p2 = scmp.ne.s32.totalorder %s1250_s16, %s1755_s20  ;;  %s1759_s30 = sshll.u32 %s1854_s11, 4  ;;  %s1760_s30 = int_to_ptr.vmem [resolvable:$false] %s1759_s30 }
 0x35a   : > { %s1761_s15 = scalar_lea.vmem %s1760_s30, 32  ;;  %p1762_p6 = scmp.lt.s32.totalorder %s1250_s16, %s1760_s30 }
 0x35b   : > { %p1757_p4 = pnand %p1756_p2, %p1949_p3  ;;  %p1763_p7 = scmp.lt.s32.totalorder %s1761_s15, %s1755_s20 }
 0x35d   : > { %p1758_p5 = pneg %p1757_p4  ;;  %p1764_p8 = por %p1763_p7, %p1762_p6 }
 0x35f   : > { %p1765_p10 = pnand %p1764_p8, %p1758_p5 }
 0x361   : > { %1768 = shalt.err (!%p1765_p10)
}
 0x362   : > { %s1769_s9 = scalar_lea.hbm %s2372_s23, 16  ;;  %s1773_s10 = scalar_lea.hbm %s2430_s8, 32 }
 0x363   : > { %p1770_p11 = scmp.ne.s32.totalorder %s2372_s23, %s1769_s9  ;;  %p1774_p0 = scmp.lt.u32.totalorder %s2372_s23, %s2430_s8 }
 0x364   : > { %p1775_p1 = scmp.lt.u32.totalorder %s1773_s10, %s1769_s9  ;;  %p1777_p4 = scmp.lt.u32.totalorder %s1769_s9, %s2372_s23 }
 0x365   : > { %p1771_p12 = pnand %p1770_p11, %p1949_p3 }
 0x366   : > { %p1776_p2 = por %p1775_p1, %p1774_p0 }
 0x367   : > { %p1772_p13 = pneg %p1771_p12 }
 0x368   : > { %p1778_p5 = por %p1777_p4, %p1776_p2 }
 0x36a   : > { %p1779_p6 = pnand %p1778_p5, %p1772_p13 }
 0x36c   : > { %1782 = shalt.err (!%p1779_p6)
}
 0x36d   : > { %1531 = dma.vmem_to_hbm [thread:$0]  (%p1949_p3), %s1250_s16, 16, %s2372_s23, %s1237_s24  }
 0x36e PF: > { %p1537_p7 = scmp.ge.s32.totalorder %s1849_s12, 2  ;;  %s1261_s13 = sand.u32 1, %s1821_s27  }
 0x36f   : > { %s1262_s14 = scalar_lea.sflag [#allocation4], %s1261_s13 }
 0x370   : > { %p1534_p8 = pnand %p1537_p7, %p1959_p9 }
 0x372   : > { %1816 = dma.done.wait (!%p1534_p8), %s1262_s14, 16  }
 0x373   : > { %1818 = vsyncadd (!%p1534_p8), %s1262_s14, 4294967280  ;;  %s21_s12 = sadd.s32 1, %s1849_s12   ;;  %s2441_s19 = sld [smem:[#allocation10_spill]] }
 0x374   : > { %p18_p10 = scmp.ge.s32.totalorder %s21_s12, 6   ;;  %s2442_s30 = sld [smem:[#allocation6_spill]] }
 0x375   : > { %s2443_s9 = sld [smem:[#allocation7_spill]]  ;;  %s2444_s10 = sld [smem:[#allocation8_spill]] }
 0x376   : > { %s2445_s11 = sld [smem:[#allocation9_spill]]  ;;  %s2446_s27 = smov %s1825_s28 }
 0x377   : > { %s2447_s28 = smov %s1829_s29  ;;  %20 = sbr.rel (!%p18_p10) target bundleno = 5 (0x5), region = 98 }
 0x379   : > { %s2448_s29 = smov %s2441_s19 }
 0x37e   :  { %1266 = vsyncpa [#allocation4], 1 }
 0x37f   :  { %1268 = vsyncpa [#allocation4 + $0x1], 1 }

// kernel: customized_ens_forward.4
= control target key start
LH: loop header
LB: loop body
LE: loop exit
PB: predicated region body
PF: predicated region fallthrough
CT: control target
= control target key end

     0   :  { %s3322_s24 = smov 0   ;;  %s6507_s0 = inlined_call_operand.vmem [shape: bf16[2,18,18,128], index: 0, kind: input, shape index: {}]   ;;  %s6508_s1 = inlined_call_operand.vmem [shape: f32[9,128], index: 1, kind: input, shape index: {}]   ;;  %s6509_s2 = inlined_call_operand.vmem [shape: f32[1,128], index: 2, kind: input, shape index: {}]   ;;  %s6510_s3 = inlined_call_operand.vmem [shape: f32[128,8], index: 3, kind: input, shape index: {}]   ;;  %s6511_s4 = inlined_call_operand.vmem [shape: f32[1,8], index: 4, kind: input, shape index: {}]   ;;  %s6512_s5 = inlined_call_operand.vmem [shape: f32[8,128], index: 5, kind: input, shape index: {}]   ;;  %s6513_s6 = inlined_call_operand.vmem [shape: f32[1,128], index: 6, kind: input, shape index: {}]   ;;  %s6514_s7 = inlined_call_operand.vmem [shape: bf16[2,256,128], index: 7, kind: output, shape index: {}]  }
   0x1 LB: > { %s2788_s25 = sadd.s32 4294967295, %s3277_s24   ;;  %p2792_p0 = scmp.ge.s32.totalorder %s3277_s24, 1  ;;  %s3277_s24 = sphi %s3322_s24, %s17_s24  }
   0x2   : > { %p237_p1 = scmp.lt.s32.totalorder %s3277_s24, 3 }
   0x4   : > { %p238_p2 = pnand %p2792_p0, %p237_p1 }
   0x6   : > { %241 = sbr.rel (%p238_p2) target bundleno = 962 (0x3c2), region = 48 }
   0xd   : > { %v2361_v0 = vld [vmem:[%s6510_s3] sm:$0xff]  ;;  %v2362_v1 = vld [vmem:[%s6510_s3 + $0x8] sm:$0xff]  ;;  %v2363_v2 = vld [vmem:[%s6510_s3 + $0x10] sm:$0xff]  ;;  %v3279_v3 = vmov 0.0|0.0   ;;  %vm3280_vm0 = vmmov 0   ;;  %v3281_v6 = vmov 0.0   ;;  %v389_v26 = vlaneseq }
   0xe   : > { %3098 = vmatprep.subr.bf16.mxu0 %v3279_v3  ;;  %v3099_v4 = vpack.c.bf16 %v2362_v1, %v2361_v0  ;;  %v2364_v5 = vld [vmem:[%s6510_s3 + $0x18] sm:$0xff]  ;;  %3090 = vmatprep.mubr.msk.f32.mxu0 %vm3280_vm0, %v3281_v6  ;;  %v2365_v8 = vld [vmem:[%s6510_s3 + $0x20] sm:$0xff]  ;;  %v2366_v9 = vld [vmem:[%s6510_s3 + $0x28] sm:$0xff]  ;;  %p269_p3 = scmp.lt.s32.totalorder %s2788_s25, 1  ;;  %vm557_vm1 = vcmask 1046528   ;;  %vm802_vm2 = vcmask 1045504  }
   0xf   : > { %3093 = vmatprep.subr.mxu1 %v3281_v6  ;;  %3095 = vmatprep.mubr.msk.f32.mxu1 %vm3280_vm0, %v3281_v6  ;;  %v3102_v7 = vpack.c.bf16 %v2364_v5, %v2363_v2  ;;  %v3105_v10 = vpack.c.bf16 %v2366_v9, %v2365_v8  ;;  %v2367_v11 = vld [vmem:[%s6510_s3 + $0x30] sm:$0xff]  ;;  %v2368_v12 = vld [vmem:[%s6510_s3 + $0x38] sm:$0xff]  ;;  %v2369_v14 = vld [vmem:[%s6510_s3 + $0x40] sm:$0xff]  ;;  %v3385_v27 = vshrl.u32 %v389_v26, 7  ;;  %vm2457_vm3 = vcmask 64512  }
  0x10   : > { %3100 = vmatpush3.bf16.msra.mxu0 %v3099_v4  ;;  %v3108_v13 = vpack.c.bf16 %v2368_v12, %v2367_v11  ;;  %v2370_v15 = vld [vmem:[%s6510_s3 + $0x48] sm:$0xff]  ;;  %v2371_v17 = vld [vmem:[%s6510_s3 + $0x50] sm:$0xff]  ;;  %v2372_v18 = vld [vmem:[%s6510_s3 + $0x58] sm:$0xff]  ;;  %s7369_s25 = smov (!%p269_p3, %s2788_s25), 1 }
  0x11   : > { %3101 = vmatprep.subr.bf16.mxu0 %v3279_v3  ;;  %v3111_v16 = vpack.c.bf16 %v2370_v15, %v2369_v14  ;;  %v3114_v19 = vpack.c.bf16 %v2372_v18, %v2371_v17  ;;  %v2373_v20 = vld [vmem:[%s6510_s3 + $0x60] sm:$0xff]  ;;  %v2374_v21 = vld [vmem:[%s6510_s3 + $0x68] sm:$0xff]  ;;  %v2375_v23 = vld [vmem:[%s6510_s3 + $0x70] sm:$0xff]  ;;  %s3122_s14 = smul.u32 216, %s7369_s25  ;;  %6638 = vst [vmem:[#allocation2_spill] sm:$0xff] %v3385_v27  ;;  %v6515_v28 = vsub.s32 0, %v3385_v27 }
  0x12   : > { %v3117_v22 = vpack.c.bf16 %v2374_v21, %v2373_v20  ;;  %v2376_v24 = vld [vmem:[%s6510_s3 + $0x78] sm:$0xff]  ;;  %v459_v29 = vsub.s32 1, %v3385_v27  ;;  %v704_v30 = vsub.s32 2, %v3385_v27  ;;  %v3399_v32 = vld [vmem:[%s6508_s1] sm:$0xff]  ;;  %s2867_s11 = sshll.u32 %s7369_s25, 7 }
  0x13   : > { %v3120_v25 = vpack.c.bf16 %v2376_v24, %v2375_v23  ;;  %s3390_s17 = scalar_lea.vmem %s6507_s0, %s3122_s14  ;;  %6639 = vst [vmem:[#allocation3_spill] sm:$0xff] %v3399_v32  ;;  %v3411_v38 = vrot.slane %v3399_v32, %v6515_v28  ;;  %s6482_s13 = scalar_lea.vmem %s6514_s7, %s2867_s11 }
  0x14   : > { %3103 = vmatpush3.bf16.msra.mxu0 %v3102_v7  ;;  %v2901_v31 = vld [vmem:[%s3390_s17] sm:$0xff]   ;;  %v3402_v33 = vld [vmem:[%s3390_s17 + $0x8] sm:$0x1]  ;;  %v282_v34 = vld [vmem:[%s3390_s17 + $0xc] sm:$0xff]   ;;  %v3420_v44 = vrot.slane %v3399_v32, %v459_v29  ;;  %v3423_v45 = vrot.slane %v3399_v32, %v704_v30 }
  0x15   : > { %3104 = vmatprep.subr.bf16.mxu0 %v3279_v3  ;;  %6640 = vst [vmem:[#allocation4_spill] sm:$0xff] %v3402_v33  ;;  %v3016_v35 = vld [vmem:[%s3390_s17 + $0x18] sm:$0xff]   ;;  %v284_v36 = vld [vmem:[%s3390_s17 + $0x14] sm:$0x1]  ;;  %v3414_v40 = vunpack.c.l.bf16 %v2901_v31  ;;  %v287_v41 = vld [vmem:[%s3390_s17 + $0x20] sm:$0x1]  ;;  %v3426_v47 = vunpack.c.h.bf16 %v2901_v31  ;;  %v3434_v53 = vunpack.c.l.bf16 %v282_v34  ;;  %v3442_v58 = vunpack.c.h.bf16 %v282_v34 }
  0x16   : > { %v3017_v37 = vld [vmem:[%s3390_s17 + $0x30] sm:$0xff]   ;;  %v288_v42 = vld [vmem:[%s3390_s17 + $0x24] sm:$0xff]   ;;  %v290_v43 = vld [vmem:[%s3390_s17 + $0x2c] sm:$0x1]  ;;  %6642 = vst [vmem:[#allocation6_spill] sm:$0xff] %v3423_v45  ;;  %v3428_v48 = vunpack.c.l.bf16 %v3016_v35  ;;  %v3436_v54 = vunpack.c.h.bf16 %v3016_v35  ;;  %v3444_v59 = vunpack.c.l.bf16 %v284_v36  ;;  %v3451_v0 = vunpack.c.l.bf16 %v287_v41 }
  0x17   : > { %6641 = vst [vmem:[#allocation5_spill] sm:$0xff] %v3414_v40  ;;  %6643 = vst [vmem:[#allocation7_spill] sm:$0xff] %v3426_v47  ;;  %v293_v49 = vld [vmem:[%s3390_s17 + $0x38] sm:$0x1]  ;;  %v294_v50 = vld [vmem:[%s3390_s17 + $0x3c] sm:$0xff]   ;;  %v3438_v55 = vunpack.c.l.bf16 %v3017_v37  ;;  %v3446_v60 = vunpack.c.h.bf16 %v3017_v37  ;;  %v3453_v1 = vunpack.c.l.bf16 %v288_v42  ;;  %v3455_v2 = vunpack.c.h.bf16 %v288_v42 }
  0x18   : > { %3106 = vmatpush3.bf16.msra.mxu0 %v3105_v10  ;;  %6644 = vst [vmem:[#allocation8_spill] sm:$0xff] %v3428_v48  ;;  %v3018_v51 = vld [vmem:[%s3390_s17 + $0x48] sm:$0xff]   ;;  %6645 = vst [vmem:[#allocation9_spill] sm:$0xff] %v3434_v53  ;;  %v296_v56 = vld [vmem:[%s3390_s17 + $0x44] sm:$0x1]  ;;  %v3461_v6 = vunpack.c.l.bf16 %v290_v43  ;;  %v3463_v7 = vunpack.c.l.bf16 %v293_v49  ;;  %v3465_v8 = vunpack.c.l.bf16 %v294_v50  ;;  %v3474_v14 = vunpack.c.h.bf16 %v294_v50 }
  0x19   : > { %3107 = vmatprep.subr.bf16.mxu0 %v3279_v3  ;;  %6646 = vst [vmem:[#allocation10_spill] sm:$0xff] %v3436_v54  ;;  %6647 = vst [vmem:[#allocation11_spill] sm:$0xff] %v3438_v55  ;;  %v3019_v57 = vld [vmem:[%s3390_s17 + $0x60] sm:$0xff]   ;;  %v299_v61 = vld [vmem:[%s3390_s17 + $0x50] sm:$0x1]  ;;  %v3467_v9 = vunpack.c.h.bf16 %v3018_v51  ;;  %v3476_v15 = vunpack.c.l.bf16 %v296_v56  ;;  %v3589_v32 = vmul.f32 %v3411_v38, %v3455_v2 }
  0x1a   : > { %6648 = vst [vmem:[#allocation12_spill] sm:$0xff] %v3442_v58  ;;  %6649 = vst [vmem:[#allocation13_spill] sm:$0xff] %v3444_v59  ;;  %v300_v62 = vld [vmem:[%s3390_s17 + $0x54] sm:$0xff]   ;;  %v302_v4 = vld [vmem:[%s3390_s17 + $0x5c] sm:$0x1]  ;;  %v3469_v10 = vunpack.c.l.bf16 %v3019_v57  ;;  %v3485_v21 = vunpack.c.l.bf16 %v299_v61 }
  0x1b   : > { %6650 = vst [vmem:[#allocation14_spill] sm:$0xff] %v3446_v60  ;;  %v3020_v63 = vld [vmem:[%s3390_s17 + $0x78] sm:$0xff]   ;;  %6651 = vst [vmem:[#allocation15_spill] sm:$0xff] %v3451_v0  ;;  %v305_v5 = vld [vmem:[%s3390_s17 + $0x68] sm:$0x1]  ;;  %v3493_v26 = vunpack.c.h.bf16 %v300_v62  ;;  %v3495_v29 = vunpack.c.l.bf16 %v302_v4  ;;  %v3613_v45 = vmul.f32 %v3467_v9, %v3411_v38 }
  0x1c   : > { %3109 = vmatpush3.bf16.msra.mxu0 %v3108_v13  ;;  %6652 = vst [vmem:[#allocation16_spill] sm:$0xff] %v3453_v1  ;;  %6653 = vst [vmem:[#allocation17_spill] sm:$0xff] %v3455_v2  ;;  %v306_v11 = vld [vmem:[%s3390_s17 + $0x6c] sm:$0xff]   ;;  %v308_v12 = vld [vmem:[%s3390_s17 + $0x74] sm:$0x1]  ;;  %v3480_v17 = vunpack.c.l.bf16 %v3020_v63  ;;  %v3489_v23 = vunpack.c.h.bf16 %v3020_v63  ;;  %v3497_v30 = vunpack.c.l.bf16 %v305_v5 }
  0x1d   : > { %3110 = vmatprep.subr.bf16.mxu0 %v3279_v3  ;;  %6655 = vst [vmem:[#allocation19_spill] sm:$0xff] %v3461_v6  ;;  %6656 = vst [vmem:[#allocation20_spill] sm:$0xff] %v3463_v7  ;;  %v3021_v13 = vld [vmem:[%s3390_s17 + $0x90] sm:$0xff]   ;;  %v311_v18 = vld [vmem:[%s3390_s17 + $0x80] sm:$0x1]  ;;  %v3503_v36 = vunpack.c.l.bf16 %v306_v11  ;;  %v3505_v37 = vunpack.c.h.bf16 %v306_v11  ;;  %v3507_v41 = vunpack.c.l.bf16 %v308_v12 }
  0x1e   : > { %6657 = vst [vmem:[#allocation21_spill] sm:$0xff] %v3465_v8  ;;  %6658 = vst [vmem:[#allocation22_spill] sm:$0xff] %v3467_v9  ;;  %v3022_v20 = vld [vmem:[%s3390_s17 + $0xa8] sm:$0xff]   ;;  %v3499_v31 = vunpack.c.l.bf16 %v3021_v13  ;;  %v317_v34 = vld [vmem:[%s3390_s17 + $0x98] sm:$0x1]  ;;  %v3509_v42 = vunpack.c.h.bf16 %v3021_v13  ;;  %v3516_v56 = vunpack.c.l.bf16 %v311_v18 }
  0x1f   : > { %6659 = vst [vmem:[#allocation23_spill] sm:$0xff] %v3469_v10  ;;  %6660 = vst [vmem:[#allocation24_spill] sm:$0xff] %v3474_v14  ;;  %v314_v24 = vld [vmem:[%s3390_s17 + $0x8c] sm:$0x1]  ;;  %v318_v35 = vld [vmem:[%s3390_s17 + $0x9c] sm:$0xff]   ;;  %v3512_v49 = vunpack.c.l.bf16 %v3022_v20  ;;  %v3520_v61 = vunpack.c.h.bf16 %v3022_v20  ;;  %v3536_v46 = vunpack.c.l.bf16 %v317_v34 }
  0x20   : > { %3112 = vmatpush3.bf16.msra.mxu0 %v3111_v16  ;;  %6661 = vst [vmem:[#allocation25_spill] sm:$0xff] %v3476_v15  ;;  %v3478_v16 = vunpack.c.h.bf16 %v3019_v57  ;;  %6663 = vst [vmem:[#allocation27_spill] sm:$0xff] %v3480_v17  ;;  %v320_v43 = vld [vmem:[%s3390_s17 + $0xa4] sm:$0x1]  ;;  %v323_v50 = vld [vmem:[%s3390_s17 + $0xb0] sm:$0x1]  ;;  %v3529_v12 = vunpack.c.l.bf16 %v314_v24  ;;  %v3538_v18 = vunpack.c.l.bf16 %v318_v35  ;;  %v3540_v39 = vunpack.c.h.bf16 %v318_v35 }
  0x21   : > { %3113 = vmatprep.subr.bf16.mxu0 %v3279_v3  ;;  %6664 = vst [vmem:[#allocation28_spill] sm:$0xff] %v3485_v21  ;;  %6666 = vst [vmem:[#allocation30_spill] sm:$0xff] %v3489_v23  ;;  %v329_v4 = vld [vmem:[%s3390_s17 + $0xc8] sm:$0x1]  ;;  %v330_v5 = vld [vmem:[%s3390_s17 + $0xcc] sm:$0xff]   ;;  %v3542_v20 = vunpack.c.l.bf16 %v320_v43  ;;  %v3544_v52 = vunpack.c.l.bf16 %v323_v50  ;;  %v3561_v35 = vmul.f32 %v3414_v40, %v3411_v38  ;;  %v3565_v43 = vmul.f32 %v3426_v47, %v3411_v38 }
  0x22   : > { %6662 = vst [vmem:[#allocation26_spill] sm:$0xff] %v3478_v16  ;;  %6667 = vst [vmem:[#allocation31_spill] sm:$0xff] %v3493_v26  ;;  %v3534_v28 = vld [vmem:[%s3390_s17 + $0xd4] sm:$0x1]  ;;  %v3556_v34 = vunpack.c.h.bf16 %v330_v5  ;;  %v3569_v50 = vmul.f32 %v3411_v38, %v3434_v53 }
  0x23   : > { %6668 = vst [vmem:[#allocation32_spill] sm:$0xff] %v3495_v29  ;;  %6669 = vst [vmem:[#allocation33_spill] sm:$0xff] %v3497_v30 }
  0x24   : > { %3115 = vmatpush3.bf16.msra.mxu0 %v3114_v19  ;;  %v312_v19 = vld [vmem:[%s3390_s17 + $0x84] sm:$0xff]   ;;  %6670 = vst [vmem:[#allocation34_spill] sm:$0xff] %v3499_v31  ;;  %6671 = vst [vmem:[#allocation35_spill] sm:$0xff] %v3503_v36 }
  0x25   : > { %3116 = vmatprep.subr.bf16.mxu0 %v3279_v3  ;;  %6672 = vst [vmem:[#allocation36_spill] sm:$0xff] %v3505_v37  ;;  %6673 = vst [vmem:[#allocation37_spill] sm:$0xff] %v3507_v41  ;;  %v3518_v57 = vunpack.c.l.bf16 %v312_v19  ;;  %v3527_v11 = vunpack.c.h.bf16 %v312_v19 }
  0x26   : > { %6674 = vst [vmem:[#allocation38_spill] sm:$0xff] %v3509_v42  ;;  %6675 = vst [vmem:[#allocation39_spill] sm:$0xff] %v3512_v49 }
  0x27   : > { %6676 = vst [vmem:[#allocation40_spill] sm:$0xff] %v3516_v56  ;;  %6677 = vst [vmem:[#allocation41_spill] sm:$0xff] %v3518_v57 }
  0x28   : > { %3118 = vmatpush3.bf16.msra.mxu0 %v3117_v22  ;;  %v3487_v22 = vunpack.c.l.bf16 %v300_v62  ;;  %6678 = vst [vmem:[#allocation42_spill] sm:$0xff] %v3520_v61  ;;  %v326_v62 = vld [vmem:[%s3390_s17 + $0xbc] sm:$0x1]  ;;  %6680 = vst [vmem:[#allocation44_spill] sm:$0xff] %v3527_v11 }
  0x29   : > { %3119 = vmatprep.subr.bf16.mxu0 %v3279_v3  ;;  %v3457_v3 = vunpack.c.l.bf16 %v3018_v51  ;;  %v324_v51 = vld [vmem:[%s3390_s17 + $0xb4] sm:$0xff]   ;;  %6681 = vst [vmem:[#allocation45_spill] sm:$0xff] %v3529_v12  ;;  %6683 = vst [vmem:[#allocation47_spill] sm:$0xff] %v3534_v28  ;;  %v3550_v24 = vunpack.c.l.bf16 %v326_v62  ;;  %v3577_v62 = vmul.f32 %v3428_v48, %v3411_v38  ;;  %v3593_v28 = vmul.f32 %v3438_v55, %v3411_v38 }
  0x2a   : > { %6665 = vst [vmem:[#allocation29_spill] sm:$0xff] %v3487_v22  ;;  %6684 = vst [vmem:[#allocation48_spill] sm:$0xff] %v3536_v46  ;;  %v3548_v19 = vunpack.c.h.bf16 %v324_v51 }
  0x2b   : > { %6654 = vst [vmem:[#allocation18_spill] sm:$0xff] %v3457_v3  ;;  %6685 = vst [vmem:[#allocation49_spill] sm:$0xff] %v3538_v18  ;;  %v3609_v27 = vmul.f32 %v3457_v3, %v3411_v38 }
  0x2c   : > { %3121 = vmatpush3.bf16.msra.mxu0 %v3120_v25  ;;  %v3023_v25 = vld [vmem:[%s3390_s17 + $0xc0] sm:$0xff]   ;;  %6686 = vst [vmem:[#allocation50_spill] sm:$0xff] %v3540_v39  ;;  %6687 = vst [vmem:[#allocation51_spill] sm:$0xff] %v3542_v20 }
  0x2d   : > { %v3523_v63 = vunpack.c.l.bf16 %v3023_v25  ;;  %v3531_v13 = vunpack.c.h.bf16 %v3023_v25  ;;  %6688 = vst [vmem:[#allocation52_spill] sm:$0xff] %v3544_v52  ;;  %6690 = vst [vmem:[#allocation54_spill] sm:$0xff] %v3548_v19  ;;  %v3552_v25 = vunpack.c.l.bf16 %v329_v4  ;;  %v3581_v4 = vmul.f32 %v3436_v54, %v3411_v38 }
  0x2e   : > { %6691 = vst [vmem:[#allocation55_spill] sm:$0xff] %v3550_v24  ;;  %6694 = vst [vmem:[#allocation58_spill] sm:$0xff] %v3556_v34  ;;  %v3597_v34 = vmul.f32 %v3446_v60, %v3411_v38 }
  0x2f   : > { %6679 = vst [vmem:[#allocation43_spill] sm:$0xff] %v3523_v63  ;;  %6682 = vst [vmem:[#allocation46_spill] sm:$0xff] %v3531_v13  ;;  %v3546_v63 = vunpack.c.l.bf16 %v324_v51  ;;  %v3554_v13 = vunpack.c.l.bf16 %v330_v5  ;;  %v3573_v51 = vmul.f32 %v3411_v38, %v3442_v58  ;;  %v3585_v5 = vmul.f32 %v3411_v38, %v3453_v1 }
  0x30   : > { %6692 = vst [vmem:[#allocation56_spill] sm:$0xff] %v3552_v25  ;;  %6695 = vst [vmem:[#allocation59_spill] sm:$0xff] %v3589_v32  ;;  %v3605_v25 = vmul.f32 %v3411_v38, %v3474_v14 }
  0x31   : > { %6689 = vst [vmem:[#allocation53_spill] sm:$0xff] %v3546_v63  ;;  %6693 = vst [vmem:[#allocation57_spill] sm:$0xff] %v3554_v13  ;;  %v3601_v13 = vmul.f32 %v3411_v38, %v3465_v8 }
  0x32   : > { %6696 = vst [vmem:[#allocation60_spill] sm:$0xff] %v3593_v28  ;;  %6697 = vst [vmem:[#allocation61_spill] sm:$0xff] %v3597_v34  ;;  %v3617_v28 = vmul.f32 %v3411_v38, %v3487_v22  ;;  %v3621_v34 = vmul.f32 %v3411_v38, %v3493_v26 }
  0x33   : > { %6698 = vst [vmem:[#allocation62_spill] sm:$0xff] %v3601_v13  ;;  %6699 = vst [vmem:[#allocation63_spill] sm:$0xff] %v3605_v25  ;;  %v3625_v13 = vmul.f32 %v3469_v10, %v3411_v38  ;;  %v3629_v25 = vmul.f32 %v3478_v16, %v3411_v38 }
  0x34   : > { %6700 = vst [vmem:[#allocation64_spill] sm:$0xff] %v3609_v27  ;;  %6701 = vst [vmem:[#allocation65_spill] sm:$0xff] %v3613_v45  ;;  %v3633_v27 = vmul.f32 %v3411_v38, %v3503_v36  ;;  %v3637_v45 = vmul.f32 %v3411_v38, %v3505_v37 }
  0x35   : > { %6702 = vst [vmem:[#allocation66_spill] sm:$0xff] %v3617_v28  ;;  %6703 = vst [vmem:[#allocation67_spill] sm:$0xff] %v3621_v34  ;;  %v3641_v28 = vmul.f32 %v3480_v17, %v3411_v38  ;;  %v3645_v34 = vmul.f32 %v3489_v23, %v3411_v38 }
  0x36   : > { %6704 = vst [vmem:[#allocation68_spill] sm:$0xff] %v3625_v13  ;;  %6705 = vst [vmem:[#allocation69_spill] sm:$0xff] %v3629_v25  ;;  %v3649_v13 = vmul.f32 %v3411_v38, %v3518_v57  ;;  %v3653_v25 = vmul.f32 %v3411_v38, %v3527_v11 }
  0x37   : > { %6706 = vst [vmem:[#allocation70_spill] sm:$0xff] %v3633_v27  ;;  %6707 = vst [vmem:[#allocation71_spill] sm:$0xff] %v3637_v45  ;;  %v3657_v27 = vmul.f32 %v3499_v31, %v3411_v38  ;;  %v3661_v45 = vmul.f32 %v3509_v42, %v3411_v38 }
  0x38   : > { %6708 = vst [vmem:[#allocation72_spill] sm:$0xff] %v3641_v28  ;;  %6709 = vst [vmem:[#allocation73_spill] sm:$0xff] %v3645_v34  ;;  %v3665_v28 = vmul.f32 %v3411_v38, %v3538_v18  ;;  %v3669_v34 = vmul.f32 %v3411_v38, %v3540_v39 }
  0x39   : > { %6710 = vst [vmem:[#allocation74_spill] sm:$0xff] %v3649_v13  ;;  %6711 = vst [vmem:[#allocation75_spill] sm:$0xff] %v3653_v25  ;;  %v3673_v13 = vmul.f32 %v3512_v49, %v3411_v38  ;;  %v3677_v25 = vmul.f32 %v3520_v61, %v3411_v38 }
  0x3a   : > { %6712 = vst [vmem:[#allocation76_spill] sm:$0xff] %v3657_v27  ;;  %6713 = vst [vmem:[#allocation77_spill] sm:$0xff] %v3661_v45  ;;  %v3681_v27 = vmul.f32 %v3411_v38, %v3546_v63  ;;  %v3685_v45 = vmul.f32 %v3411_v38, %v3548_v19  ;;  %v466_v38 = vmul.f32 %v3420_v44, %v3444_v59 }
  0x3b   : > { %6714 = vst [vmem:[#allocation78_spill] sm:$0xff] %v3665_v28  ;;  %6715 = vst [vmem:[#allocation79_spill] sm:$0xff] %v3669_v34  ;;  %v461_v28 = vmul.f32 %v3414_v40, %v3420_v44  ;;  %v462_v34 = vmul.f32 %v3426_v47, %v3420_v44  ;;  %v3706_v47 = vmul.f32 %v3436_v54, %v3420_v44 }
  0x3c   : > { %6716 = vst [vmem:[#allocation80_spill] sm:$0xff] %v3673_v13  ;;  %6717 = vst [vmem:[#allocation81_spill] sm:$0xff] %v3677_v25  ;;  %v6720_v13 = vunpack.c.l.bf16 %v3402_v33  ;;  %v464_v25 = vmul.f32 %v3420_v44, %v3434_v53  ;;  %v3714_v53 = vmul.f32 %v3420_v44, %v3453_v1  ;;  %v3726_v54 = vmul.f32 %v3438_v55, %v3420_v44 }
  0x3d   : > { %6718 = vst [vmem:[#allocation82_spill] sm:$0xff] %v3681_v27  ;;  %6719 = vst [vmem:[#allocation83_spill] sm:$0xff] %v3685_v45  ;;  %v465_v27 = vmul.f32 %v3420_v44, %v3442_v58  ;;  %v3702_v45 = vmul.f32 %v3428_v48, %v3420_v44  ;;  %v3718_v58 = vmul.f32 %v3420_v44, %v3455_v2  ;;  %v558_v59 = vrot.slane %v461_v28, 1 }
  0x3e   : > { %v463_v32 = vmul.f32 %v3420_v44, %v6720_v13  ;;  %v3710_v13 = vmul.f32 %v3420_v44, %v3451_v0  ;;  %v3722_v48 = vmul.f32 %v3420_v44, %v3461_v6  ;;  %v3730_v0 = vmul.f32 %v3446_v60, %v3420_v44 }
  0x3f   : > { %v3734_v1 = vmul.f32 %v3420_v44, %v3463_v7  ;;  %v3738_v2 = vmul.f32 %v3420_v44, %v3465_v8  ;;  %v3742_v6 = vmul.f32 %v3420_v44, %v3474_v14  ;;  %v3746_v55 = vmul.f32 %v3420_v44, %v3476_v15 }
  0x40   : > { %v3750_v60 = vmul.f32 %v3457_v3, %v3420_v44  ;;  %v3754_v7 = vmul.f32 %v3467_v9, %v3420_v44  ;;  %v3758_v8 = vmul.f32 %v3420_v44, %v3485_v21  ;;  %v3762_v14 = vmul.f32 %v3420_v44, %v3487_v22 }
  0x41   : > { %v3766_v15 = vmul.f32 %v3420_v44, %v3493_v26  ;;  %v3770_v3 = vmul.f32 %v3420_v44, %v3495_v29  ;;  %v3774_v9 = vmul.f32 %v3469_v10, %v3420_v44  ;;  %v3778_v21 = vmul.f32 %v3478_v16, %v3420_v44 }
  0x42   : > { %v3782_v22 = vmul.f32 %v3420_v44, %v3497_v30  ;;  %v3786_v26 = vmul.f32 %v3420_v44, %v3503_v36  ;;  %v3790_v29 = vmul.f32 %v3420_v44, %v3505_v37  ;;  %v3794_v10 = vmul.f32 %v3420_v44, %v3507_v41 }
  0x43   : > { %v3798_v16 = vmul.f32 %v3480_v17, %v3420_v44  ;;  %v3802_v30 = vmul.f32 %v3489_v23, %v3420_v44  ;;  %v3806_v36 = vmul.f32 %v3420_v44, %v3516_v56  ;;  %v3810_v37 = vmul.f32 %v3420_v44, %v3518_v57 }
  0x44   : > { %v3814_v41 = vmul.f32 %v3420_v44, %v3527_v11  ;;  %v3818_v17 = vmul.f32 %v3420_v44, %v3529_v12  ;;  %v3822_v23 = vmul.f32 %v3499_v31, %v3420_v44  ;;  %v559_v33 = vrot.slane %v462_v34, 1 }
  0x45   : > { %v3826_v56 = vmul.f32 %v3509_v42, %v3420_v44  ;;  %v3830_v57 = vmul.f32 %v3420_v44, %v3536_v46  ;;  %v3834_v11 = vmul.f32 %v3420_v44, %v3538_v18  ;;  %v561_v12 = vrot.slane %v463_v32, 1 }
  0x46   : > { %v3838_v40 = vmul.f32 %v3420_v44, %v3540_v39  ;;  %v563_v31 = vrot.slane %v464_v25, 1  ;;  %v564_v28 = vrot.slane %v465_v27, 1  ;;  %v566_v34 = vrot.slane %v466_v38, 1 }
  0x47   : > { %v3842_v42 = vmul.f32 %v3420_v44, %v3542_v20  ;;  %v3846_v46 = vmul.f32 %v3512_v49, %v3420_v44  ;;  %v3850_v18 = vmul.f32 %v3520_v61, %v3420_v44  ;;  %v3854_v32 = vmul.f32 %v3420_v44, %v3544_v52 }
  0x48   : > { %v3858_v27 = vmul.f32 %v3420_v44, %v3546_v63  ;;  %v3862_v25 = vmul.f32 %v3420_v44, %v3548_v19  ;;  %v3866_v38 = vmul.f32 %v3420_v44, %v3550_v24  ;;  %v3869_v49 = vsel %vm557_vm1, %v558_v59, %v559_v33 }
  0x49   : > { %v3872_v61 = vsel %vm557_vm1, %v559_v33, %v561_v12  ;;  %v568_v52 = vrot.slane %v3702_v45, 1  ;;  %v569_v20 = vrot.slane %v3706_v47, 1  ;;  %v571_v63 = vrot.slane %v3710_v13, 1 }
  0x4a   : > { %v3878_v39 = vsel %vm557_vm1, %v563_v31, %v564_v28  ;;  %v3881_v19 = vsel %vm557_vm1, %v564_v28, %v566_v34  ;;  %v573_v44 = vrot.slane %v3714_v53, 1  ;;  %v574_v59 = vrot.slane %v3718_v58, 1 }
  0x4b   : > { %v576_v24 = vrot.slane %v3722_v48, 1  ;;  %v578_v33 = vrot.slane %v3726_v54, 1  ;;  %v579_v45 = vrot.slane %v3730_v0, 1  ;;  %v581_v47 = vrot.slane %v3734_v1, 1 }
  0x4c   : > { %v583_v12 = vrot.slane %v3738_v2, 1  ;;  %v584_v31 = vrot.slane %v3742_v6, 1  ;;  %v586_v13 = vrot.slane %v3746_v55, 1  ;;  %v588_v28 = vrot.slane %v3750_v60, 1 }
  0x4d   : > { %v589_v53 = vrot.slane %v3754_v7, 1  ;;  %v591_v58 = vrot.slane %v3758_v8, 1  ;;  %v593_v48 = vrot.slane %v3762_v14, 1  ;;  %v594_v54 = vrot.slane %v3766_v15, 1 }
  0x4e   : > { %v570_v0 = vsel %vm557_vm1, %v568_v52, %v569_v20  ;;  %v596_v1 = vrot.slane %v3770_v3, 1  ;;  %v598_v2 = vrot.slane %v3774_v9, 1  ;;  %v599_v6 = vrot.slane %v3778_v21, 1 }
  0x4f   : > { %v572_v55 = vsel %vm557_vm1, %v569_v20, %v571_v63  ;;  %v575_v60 = vsel %vm557_vm1, %v573_v44, %v574_v59  ;;  %v577_v7 = vsel %vm557_vm1, %v574_v59, %v576_v24  ;;  %v601_v8 = vrot.slane %v3782_v22, 1 }
  0x50   : > { %v580_v14 = vsel %vm557_vm1, %v578_v33, %v579_v45  ;;  %v582_v15 = vsel %vm557_vm1, %v579_v45, %v581_v47  ;;  %v585_v52 = vsel %vm557_vm1, %v583_v12, %v584_v31  ;;  %v587_v3 = vsel %vm557_vm1, %v584_v31, %v586_v13 }
  0x51   : > { %v590_v9 = vsel %vm557_vm1, %v588_v28, %v589_v53  ;;  %v592_v21 = vsel %vm557_vm1, %v589_v53, %v591_v58  ;;  %v595_v63 = vsel %vm557_vm1, %v593_v48, %v594_v54  ;;  %v603_v20 = vrot.slane %v3786_v26, 1 }
  0x52   : > { %v597_v24 = vsel %vm557_vm1, %v594_v54, %v596_v1  ;;  %v600_v22 = vsel %vm557_vm1, %v598_v2, %v599_v6  ;;  %v604_v34 = vrot.slane %v3790_v29, 1  ;;  %v606_v44 = vrot.slane %v3794_v10, 1 }
  0x53   : > { %v602_v59 = vsel %vm557_vm1, %v599_v6, %v601_v8  ;;  %v608_v33 = vrot.slane %v3798_v16, 1  ;;  %v609_v45 = vrot.slane %v3802_v30, 1  ;;  %v611_v47 = vrot.slane %v3806_v36, 1 }
  0x54   : > { %v613_v12 = vrot.slane %v3810_v37, 1  ;;  %v614_v26 = vrot.slane %v3814_v41, 1  ;;  %v616_v31 = vrot.slane %v3818_v17, 1  ;;  %v618_v13 = vrot.slane %v3822_v23, 1 }
  0x55   : > { %v619_v29 = vrot.slane %v3826_v56, 1  ;;  %v621_v10 = vrot.slane %v3830_v57, 1  ;;  %v623_v28 = vrot.slane %v3834_v11, 1  ;;  %v624_v16 = vrot.slane %v3838_v40, 1 }
  0x56   : > { %v626_v30 = vrot.slane %v3842_v42, 1  ;;  %v628_v36 = vrot.slane %v3846_v46, 1  ;;  %v629_v37 = vrot.slane %v3850_v18, 1  ;;  %v631_v41 = vrot.slane %v3854_v32, 1 }
  0x57   : > { %v605_v17 = vsel %vm557_vm1, %v603_v20, %v604_v34  ;;  %v607_v23 = vsel %vm557_vm1, %v604_v34, %v606_v44  ;;  %v633_v56 = vrot.slane %v3858_v27, 1  ;;  %v634_v57 = vrot.slane %v3862_v25, 1  ;;  %v6725_v34 = vld [vmem:[#allocation61_spill] sm:$0xff] }
  0x58   : > { %v610_v11 = vsel %vm557_vm1, %v608_v33, %v609_v45  ;;  %v612_v40 = vsel %vm557_vm1, %v609_v45, %v611_v47  ;;  %v615_v42 = vsel %vm557_vm1, %v613_v12, %v614_v26  ;;  %v636_v46 = vrot.slane %v3866_v38, 1 }
  0x59   : > { %v617_v18 = vsel %vm557_vm1, %v614_v26, %v616_v31  ;;  %v620_v32 = vsel %vm557_vm1, %v618_v13, %v619_v29  ;;  %v622_v53 = vsel %vm557_vm1, %v619_v29, %v621_v10  ;;  %v625_v58 = vsel %vm557_vm1, %v623_v28, %v624_v16 }
  0x5a   : > { %v627_v27 = vsel %vm557_vm1, %v624_v16, %v626_v30  ;;  %v630_v25 = vsel %vm557_vm1, %v628_v36, %v629_v37  ;;  %v632_v48 = vsel %vm557_vm1, %v629_v37, %v631_v41  ;;  %v3950_v54 = vadd.f32 %v3869_v49, %v3561_v35  ;;  %v6757_v30 = vld [vmem:[#allocation77_spill] sm:$0xff]  ;;  %v6759_v37 = vld [vmem:[#allocation78_spill] sm:$0xff] }
  0x5b   : > { %v635_v38 = vsel %vm557_vm1, %v633_v56, %v634_v57  ;;  %v3955_v1 = vadd.f32 %v3872_v61, %v3565_v43  ;;  %v3959_v2 = vadd.f32 %v3878_v39, %v3569_v50  ;;  %v3963_v6 = vadd.f32 %v3881_v19, %v3573_v51  ;;  %v6721_v61 = vld [vmem:[#allocation59_spill] sm:$0xff]  ;;  %v6723_v39 = vld [vmem:[#allocation60_spill] sm:$0xff]  ;;  %v6727_v51 = vld [vmem:[#allocation62_spill] sm:$0xff] }
  0x5c   : > { %v637_v8 = vsel %vm557_vm1, %v634_v57, %v636_v46  ;;  %v3967_v20 = vadd.f32 %v570_v0, %v3577_v62  ;;  %v3970_v49 = vadd.f32 %v572_v55, %v3581_v4  ;;  %v3973_v35 = vadd.f32 %v575_v60, %v3585_v5  ;;  %v6729_v62 = vld [vmem:[#allocation63_spill] sm:$0xff]  ;;  %v6731_v4 = vld [vmem:[#allocation64_spill] sm:$0xff]  ;;  %v6733_v5 = vld [vmem:[#allocation65_spill] sm:$0xff] }
  0x5d   : > { %v3976_v43 = vadd.f32 %v577_v7, %v6721_v61  ;;  %v3979_v50 = vadd.f32 %v580_v14, %v6723_v39  ;;  %v3982_v19 = vadd.f32 %v582_v15, %v6725_v34  ;;  %v3985_v44 = vadd.f32 %v585_v52, %v6727_v51  ;;  %v6735_v7 = vld [vmem:[#allocation66_spill] sm:$0xff]  ;;  %v6737_v14 = vld [vmem:[#allocation67_spill] sm:$0xff]  ;;  %v6739_v15 = vld [vmem:[#allocation68_spill] sm:$0xff] }
  0x5e   : > { %v3988_v0 = vadd.f32 %v587_v3, %v6729_v62  ;;  %v3991_v55 = vadd.f32 %v590_v9, %v6731_v4  ;;  %v3994_v60 = vadd.f32 %v592_v21, %v6733_v5  ;;  %v3997_v33 = vadd.f32 %v595_v63, %v6735_v7  ;;  %v6741_v52 = vld [vmem:[#allocation69_spill] sm:$0xff]  ;;  %v6743_v3 = vld [vmem:[#allocation70_spill] sm:$0xff]  ;;  %v6745_v9 = vld [vmem:[#allocation71_spill] sm:$0xff] }
  0x5f   : > { %6722 = vst [vmem:[#allocation59_spill] sm:$0xff] %v3976_v43  ;;  %6724 = vst [vmem:[#allocation60_spill] sm:$0xff] %v3979_v50  ;;  %v4000_v45 = vadd.f32 %v597_v24, %v6737_v14  ;;  %v4003_v47 = vadd.f32 %v600_v22, %v6739_v15  ;;  %v4006_v12 = vadd.f32 %v602_v59, %v6741_v52  ;;  %v6747_v21 = vld [vmem:[#allocation72_spill] sm:$0xff]  ;;  %v6749_v63 = vld [vmem:[#allocation73_spill] sm:$0xff] }
  0x60   : > { %6726 = vst [vmem:[#allocation61_spill] sm:$0xff] %v3982_v19  ;;  %6728 = vst [vmem:[#allocation62_spill] sm:$0xff] %v3985_v44  ;;  %v4009_v26 = vadd.f32 %v605_v17, %v6743_v3  ;;  %v4012_v31 = vadd.f32 %v607_v23, %v6745_v9  ;;  %v4015_v13 = vadd.f32 %v610_v11, %v6747_v21  ;;  %v6751_v24 = vld [vmem:[#allocation74_spill] sm:$0xff]  ;;  %v6753_v22 = vld [vmem:[#allocation75_spill] sm:$0xff] }
  0x61   : > { %6730 = vst [vmem:[#allocation63_spill] sm:$0xff] %v3988_v0  ;;  %6732 = vst [vmem:[#allocation64_spill] sm:$0xff] %v3991_v55  ;;  %v4018_v29 = vadd.f32 %v612_v40, %v6749_v63  ;;  %v4021_v10 = vadd.f32 %v615_v42, %v6751_v24  ;;  %v4024_v28 = vadd.f32 %v617_v18, %v6753_v22  ;;  %v6755_v59 = vld [vmem:[#allocation76_spill] sm:$0xff]  ;;  %v6761_v17 = vld [vmem:[#allocation79_spill] sm:$0xff] }
  0x62   : > { %6734 = vst [vmem:[#allocation65_spill] sm:$0xff] %v3994_v60  ;;  %6736 = vst [vmem:[#allocation66_spill] sm:$0xff] %v3997_v33  ;;  %v4027_v16 = vadd.f32 %v620_v32, %v6755_v59  ;;  %v4030_v36 = vadd.f32 %v622_v53, %v6757_v30  ;;  %v4033_v41 = vadd.f32 %v625_v58, %v6759_v37  ;;  %v6763_v56 = vld [vmem:[#allocation80_spill] sm:$0xff]  ;;  %v6765_v11 = vld [vmem:[#allocation81_spill] sm:$0xff] }
  0x63   : > { %6738 = vst [vmem:[#allocation67_spill] sm:$0xff] %v4000_v45  ;;  %6740 = vst [vmem:[#allocation68_spill] sm:$0xff] %v4003_v47  ;;  %v4036_v23 = vadd.f32 %v627_v27, %v6761_v17  ;;  %v4039_v57 = vadd.f32 %v630_v25, %v6763_v56  ;;  %v4042_v40 = vadd.f32 %v632_v48, %v6765_v11  ;;  %v6767_v42 = vld [vmem:[#allocation82_spill] sm:$0xff]  ;;  %v6769_v18 = vld [vmem:[#allocation83_spill] sm:$0xff] }
  0x64   : > { %6742 = vst [vmem:[#allocation69_spill] sm:$0xff] %v4006_v12  ;;  %6744 = vst [vmem:[#allocation70_spill] sm:$0xff] %v4009_v26  ;;  %v4045_v46 = vadd.f32 %v635_v38, %v6767_v42  ;;  %v4048_v32 = vadd.f32 %v637_v8, %v6769_v18  ;;  %v6771_v53 = vld [vmem:[#allocation6_spill] sm:$0xff]  ;;  %v6772_v61 = vld [vmem:[#allocation5_spill] sm:$0xff] }
  0x65   : > { %6746 = vst [vmem:[#allocation71_spill] sm:$0xff] %v4012_v31  ;;  %6748 = vst [vmem:[#allocation72_spill] sm:$0xff] %v4015_v13  ;;  %v706_v39 = vmul.f32 %v6772_v61, %v6771_v53  ;;  %v6773_v58 = vld [vmem:[#allocation7_spill] sm:$0xff]  ;;  %v6774_v27 = vld [vmem:[#allocation4_spill] sm:$0xff] }
  0x66   : > { %6750 = vst [vmem:[#allocation73_spill] sm:$0xff] %v4018_v29  ;;  %6752 = vst [vmem:[#allocation74_spill] sm:$0xff] %v4021_v10  ;;  %v707_v34 = vmul.f32 %v6773_v58, %v6771_v53  ;;  %v6775_v51 = vunpack.c.l.bf16 %v6774_v27  ;;  %v6776_v62 = vld [vmem:[#allocation9_spill] sm:$0xff]  ;;  %v6777_v4 = vld [vmem:[#allocation12_spill] sm:$0xff] }
  0x67   : > { %6754 = vst [vmem:[#allocation75_spill] sm:$0xff] %v4024_v28  ;;  %6756 = vst [vmem:[#allocation76_spill] sm:$0xff] %v4027_v16  ;;  %v709_v48 = vmul.f32 %v6771_v53, %v6776_v62  ;;  %v710_v38 = vmul.f32 %v6771_v53, %v6777_v4  ;;  %v6778_v5 = vld [vmem:[#allocation13_spill] sm:$0xff]  ;;  %v6779_v7 = vld [vmem:[#allocation8_spill] sm:$0xff]  ;;  %v803_v13 = vrot.slane %v706_v39, 2 }
  0x68   : > { %6758 = vst [vmem:[#allocation77_spill] sm:$0xff] %v4030_v36  ;;  %6760 = vst [vmem:[#allocation78_spill] sm:$0xff] %v4033_v41  ;;  %v708_v25 = vmul.f32 %v6771_v53, %v6775_v51  ;;  %v711_v8 = vmul.f32 %v6771_v53, %v6778_v5  ;;  %v4065_v14 = vmul.f32 %v6779_v7, %v6771_v53  ;;  %v6780_v15 = vld [vmem:[#allocation10_spill] sm:$0xff]  ;;  %v6781_v3 = vld [vmem:[#allocation15_spill] sm:$0xff]  ;;  %v804_v31 = vrot.slane %v707_v34, 2 }
  0x69   : > { %6762 = vst [vmem:[#allocation79_spill] sm:$0xff] %v4036_v23  ;;  %6764 = vst [vmem:[#allocation80_spill] sm:$0xff] %v4039_v57  ;;  %v4069_v52 = vmul.f32 %v6780_v15, %v6771_v53  ;;  %v4073_v9 = vmul.f32 %v6771_v53, %v6781_v3  ;;  %v6782_v21 = vld [vmem:[#allocation16_spill] sm:$0xff]  ;;  %v6783_v24 = vld [vmem:[#allocation17_spill] sm:$0xff]  ;;  %v809_v39 = vrot.slane %v710_v38, 2 }
  0x6a   : > { %6766 = vst [vmem:[#allocation81_spill] sm:$0xff] %v4042_v40  ;;  %6768 = vst [vmem:[#allocation82_spill] sm:$0xff] %v4045_v46  ;;  %v4077_v63 = vmul.f32 %v6771_v53, %v6782_v21  ;;  %v4081_v22 = vmul.f32 %v6771_v53, %v6783_v24  ;;  %v6784_v59 = vld [vmem:[#allocation19_spill] sm:$0xff]  ;;  %v6786_v56 = vld [vmem:[#allocation14_spill] sm:$0xff]  ;;  %v811_v34 = vrot.slane %v711_v8, 2  ;;  %v4232_v19 = vsel %vm802_vm2, %v803_v13, %v804_v31 }
  0x6b   : > { %6770 = vst [vmem:[#allocation83_spill] sm:$0xff] %v4048_v32  ;;  %v4085_v30 = vmul.f32 %v6771_v53, %v6784_v59  ;;  %v6785_v37 = vld [vmem:[#allocation11_spill] sm:$0xff]  ;;  %v4093_v11 = vmul.f32 %v6786_v56, %v6771_v53  ;;  %v6787_v42 = vld [vmem:[#allocation20_spill] sm:$0xff]  ;;  %v6788_v61 = vld [vmem:[#allocation21_spill] sm:$0xff]  ;;  %v814_v50 = vrot.slane %v4069_v52, 2 }
  0x6c   : > { %v4089_v17 = vmul.f32 %v6785_v37, %v6771_v53  ;;  %v4097_v18 = vmul.f32 %v6771_v53, %v6787_v42  ;;  %v4101_v58 = vmul.f32 %v6771_v53, %v6788_v61  ;;  %v6789_v27 = vld [vmem:[#allocation24_spill] sm:$0xff]  ;;  %v6790_v59 = vld [vmem:[#allocation25_spill] sm:$0xff]  ;;  %v6791_v5 = vld [vmem:[#allocation18_spill] sm:$0xff]  ;;  %v819_v13 = vrot.slane %v4081_v22, 2 }
  0x6d   : > { %v4105_v51 = vmul.f32 %v6771_v53, %v6789_v27  ;;  %v4109_v3 = vmul.f32 %v6771_v53, %v6790_v59  ;;  %v4113_v56 = vmul.f32 %v6791_v5, %v6771_v53  ;;  %v6792_v37 = vld [vmem:[#allocation22_spill] sm:$0xff]  ;;  %v6793_v24 = vld [vmem:[#allocation28_spill] sm:$0xff]  ;;  %v6794_v21 = vld [vmem:[#allocation29_spill] sm:$0xff] }
  0x6e   : > { %v4117_v42 = vmul.f32 %v6792_v37, %v6771_v53  ;;  %v4121_v61 = vmul.f32 %v6771_v53, %v6793_v24  ;;  %v4125_v27 = vmul.f32 %v6771_v53, %v6794_v21  ;;  %v6795_v15 = vld [vmem:[#allocation31_spill] sm:$0xff]  ;;  %v6796_v7 = vld [vmem:[#allocation32_spill] sm:$0xff]  ;;  %v6798_v62 = vld [vmem:[#allocation26_spill] sm:$0xff]  ;;  %v828_v52 = vrot.slane %v4101_v58, 2 }
  0x6f   : > { %v4129_v59 = vmul.f32 %v6771_v53, %v6795_v15  ;;  %v4133_v5 = vmul.f32 %v6771_v53, %v6796_v7  ;;  %v6797_v4 = vld [vmem:[#allocation23_spill] sm:$0xff]  ;;  %v4141_v24 = vmul.f32 %v6798_v62, %v6771_v53  ;;  %v6799_v32 = vld [vmem:[#allocation33_spill] sm:$0xff]  ;;  %v6801_v40 = vld [vmem:[#allocation36_spill] sm:$0xff] }
  0x70   : > { %v4137_v37 = vmul.f32 %v6797_v4, %v6771_v53  ;;  %v4145_v21 = vmul.f32 %v6771_v53, %v6799_v32  ;;  %v6800_v46 = vld [vmem:[#allocation35_spill] sm:$0xff]  ;;  %v4153_v7 = vmul.f32 %v6771_v53, %v6801_v40  ;;  %v6802_v57 = vld [vmem:[#allocation37_spill] sm:$0xff]  ;;  %v6804_v41 = vld [vmem:[#allocation30_spill] sm:$0xff]  ;;  %v836_v22 = vrot.slane %v4121_v61, 2 }
  0x71   : > { %v4149_v15 = vmul.f32 %v6771_v53, %v6800_v46  ;;  %v4157_v4 = vmul.f32 %v6771_v53, %v6802_v57  ;;  %v6803_v23 = vld [vmem:[#allocation27_spill] sm:$0xff]  ;;  %v4165_v32 = vmul.f32 %v6804_v41, %v6771_v53  ;;  %v6805_v36 = vld [vmem:[#allocation40_spill] sm:$0xff]  ;;  %v6806_v16 = vld [vmem:[#allocation41_spill] sm:$0xff] }
  0x72   : > { %v4161_v62 = vmul.f32 %v6803_v23, %v6771_v53  ;;  %v4169_v46 = vmul.f32 %v6771_v53, %v6805_v36  ;;  %v4173_v40 = vmul.f32 %v6771_v53, %v6806_v16  ;;  %v6807_v28 = vld [vmem:[#allocation44_spill] sm:$0xff]  ;;  %v6808_v10 = vld [vmem:[#allocation45_spill] sm:$0xff]  ;;  %v6809_v29 = vld [vmem:[#allocation34_spill] sm:$0xff]  ;;  %v843_v58 = vrot.slane %v4137_v37, 2 }
  0x73   : > { %v4177_v57 = vmul.f32 %v6771_v53, %v6807_v28  ;;  %v4181_v23 = vmul.f32 %v6771_v53, %v6808_v10  ;;  %v4185_v41 = vmul.f32 %v6809_v29, %v6771_v53  ;;  %v6810_v36 = vld [vmem:[#allocation38_spill] sm:$0xff]  ;;  %v6811_v16 = vld [vmem:[#allocation48_spill] sm:$0xff]  ;;  %v6812_v28 = vld [vmem:[#allocation49_spill] sm:$0xff]  ;;  %v806_v10 = vrot.slane %v708_v25, 2 }
  0x74   : > { %v4189_v26 = vmul.f32 %v6810_v36, %v6771_v53  ;;  %v4193_v12 = vmul.f32 %v6771_v53, %v6811_v16  ;;  %v4197_v47 = vmul.f32 %v6771_v53, %v6812_v28  ;;  %v6813_v45 = vld [vmem:[#allocation50_spill] sm:$0xff]  ;;  %v808_v29 = vrot.slane %v709_v48, 2  ;;  %v6814_v60 = vld [vmem:[#allocation51_spill] sm:$0xff]  ;;  %v6817_v25 = vld [vmem:[#allocation52_spill] sm:$0xff] }
  0x75   : > { %v4201_v33 = vmul.f32 %v6771_v53, %v6813_v45  ;;  %v4205_v36 = vmul.f32 %v6771_v53, %v6814_v60  ;;  %v6815_v55 = vld [vmem:[#allocation39_spill] sm:$0xff]  ;;  %v6816_v0 = vld [vmem:[#allocation42_spill] sm:$0xff]  ;;  %v4217_v44 = vmul.f32 %v6771_v53, %v6817_v25  ;;  %v6818_v45 = vld [vmem:[#allocation53_spill] sm:$0xff]  ;;  %v813_v25 = vrot.slane %v4065_v14, 2 }
  0x76   : > { %v4209_v16 = vmul.f32 %v6815_v55, %v6771_v53  ;;  %v4213_v28 = vmul.f32 %v6816_v0, %v6771_v53  ;;  %v4221_v48 = vmul.f32 %v6771_v53, %v6818_v45  ;;  %v6819_v38 = vld [vmem:[#allocation54_spill] sm:$0xff]  ;;  %v6820_v60 = vld [vmem:[#allocation55_spill] sm:$0xff]  ;;  %v4235_v0 = vsel %vm802_vm2, %v804_v31, %v806_v10 }
  0x77   : > { %v4225_v8 = vmul.f32 %v6771_v53, %v6819_v38  ;;  %v4229_v55 = vmul.f32 %v6771_v53, %v6820_v60  ;;  %v816_v45 = vrot.slane %v4073_v9, 2  ;;  %v4241_v43 = vsel %vm802_vm2, %v808_v29, %v809_v39 }
  0x78   : > { %v4244_v38 = vsel %vm802_vm2, %v809_v39, %v811_v34  ;;  %v818_v53 = vrot.slane %v4077_v63, 2  ;;  %v821_v60 = vrot.slane %v4085_v30, 2  ;;  %v823_v31 = vrot.slane %v4089_v17, 2 }
  0x79   : > { %v824_v10 = vrot.slane %v4093_v11, 2  ;;  %v826_v14 = vrot.slane %v4097_v18, 2  ;;  %v829_v29 = vrot.slane %v4105_v51, 2  ;;  %v831_v9 = vrot.slane %v4109_v3, 2 }
  0x7a   : > { %v833_v39 = vrot.slane %v4113_v56, 2  ;;  %v834_v63 = vrot.slane %v4117_v42, 2  ;;  %v838_v30 = vrot.slane %v4125_v27, 2  ;;  %v839_v17 = vrot.slane %v4129_v59, 2 }
  0x7b   : > { %v815_v11 = vsel %vm802_vm2, %v813_v25, %v814_v50  ;;  %v841_v18 = vrot.slane %v4133_v5, 2  ;;  %v844_v51 = vrot.slane %v4141_v24, 2  ;;  %v817_v3 = vsel %vm802_vm2, %v814_v50, %v816_v45 }
  0x7c   : > { %v820_v56 = vsel %vm802_vm2, %v818_v53, %v819_v13  ;;  %v822_v42 = vsel %vm802_vm2, %v819_v13, %v821_v60  ;;  %v846_v61 = vrot.slane %v4145_v21, 2  ;;  %v825_v27 = vsel %vm802_vm2, %v823_v31, %v824_v10 }
  0x7d   : > { %v827_v59 = vsel %vm802_vm2, %v824_v10, %v826_v14  ;;  %v830_v34 = vsel %vm802_vm2, %v828_v52, %v829_v29  ;;  %v832_v5 = vsel %vm802_vm2, %v829_v29, %v831_v9  ;;  %v835_v37 = vsel %vm802_vm2, %v833_v39, %v834_v63 }
  0x7e   : > { %v837_v24 = vsel %vm802_vm2, %v834_v63, %v836_v22  ;;  %v840_v50 = vsel %vm802_vm2, %v838_v30, %v839_v17  ;;  %v848_v45 = vrot.slane %v4149_v15, 2  ;;  %v842_v60 = vsel %vm802_vm2, %v839_v17, %v841_v18 }
  0x7f   : > { %v845_v21 = vsel %vm802_vm2, %v843_v58, %v844_v51  ;;  %v849_v25 = vrot.slane %v4153_v7, 2  ;;  %v851_v53 = vrot.slane %v4157_v4, 2  ;;  %v847_v13 = vsel %vm802_vm2, %v844_v51, %v846_v61 }
  0x80   : > { %v853_v31 = vrot.slane %v4161_v62, 2  ;;  %v854_v10 = vrot.slane %v4165_v32, 2  ;;  %v856_v14 = vrot.slane %v4169_v46, 2  ;;  %v858_v52 = vrot.slane %v4173_v40, 2 }
  0x81   : > { %v859_v15 = vrot.slane %v4177_v57, 2  ;;  %v861_v29 = vrot.slane %v4181_v23, 2  ;;  %v863_v9 = vrot.slane %v4185_v41, 2  ;;  %v864_v7 = vrot.slane %v4189_v26, 2 }
  0x82   : > { %v866_v4 = vrot.slane %v4193_v12, 2  ;;  %v868_v39 = vrot.slane %v4197_v47, 2  ;;  %v869_v62 = vrot.slane %v4201_v33, 2  ;;  %v871_v32 = vrot.slane %v4205_v36, 2 }
  0x83   : > { %v873_v46 = vrot.slane %v4209_v16, 2  ;;  %v874_v40 = vrot.slane %v4213_v28, 2  ;;  %v876_v57 = vrot.slane %v4217_v44, 2  ;;  %v850_v23 = vsel %vm802_vm2, %v848_v45, %v849_v25 }
  0x84   : > { %v852_v41 = vsel %vm802_vm2, %v849_v25, %v851_v53  ;;  %v878_v26 = vrot.slane %v4221_v48, 2  ;;  %v879_v12 = vrot.slane %v4225_v8, 2  ;;  %v855_v47 = vsel %vm802_vm2, %v853_v31, %v854_v10  ;;  %v6823_v25 = vld [vmem:[#allocation61_spill] sm:$0xff] }
  0x85   : > { %v857_v33 = vsel %vm802_vm2, %v854_v10, %v856_v14  ;;  %v860_v36 = vsel %vm802_vm2, %v858_v52, %v859_v15  ;;  %v881_v16 = vrot.slane %v4229_v55, 2  ;;  %v862_v28 = vsel %vm802_vm2, %v859_v15, %v861_v29 }
  0x86   : > { %v865_v44 = vsel %vm802_vm2, %v863_v9, %v864_v7  ;;  %v867_v63 = vsel %vm802_vm2, %v864_v7, %v866_v4  ;;  %v870_v22 = vsel %vm802_vm2, %v868_v39, %v869_v62  ;;  %v872_v48 = vsel %vm802_vm2, %v869_v62, %v871_v32  ;;  %v6839_v39 = vld [vmem:[#allocation3_spill] sm:$0xff]  ;;  %v6840_v62 = vld [vmem:[#allocation74_spill] sm:$0xff] }
  0x87   : > { %v875_v8 = vsel %vm802_vm2, %v873_v46, %v874_v40  ;;  %v877_v30 = vsel %vm802_vm2, %v874_v40, %v876_v57  ;;  %v4313_v17 = vadd.f32 %v4232_v19, %v3950_v54  ;;  %v880_v55 = vsel %vm802_vm2, %v878_v26, %v879_v12  ;;  %v6844_v40 = vld [vmem:[#allocation76_spill] sm:$0xff]  ;;  %v6848_v26 = vld [vmem:[#allocation78_spill] sm:$0xff] }
  0x88   : > { %v4318_v18 = vadd.f32 %v4235_v0, %v3955_v1  ;;  %v4322_v58 = vadd.f32 %v4241_v43, %v3959_v2  ;;  %v4326_v51 = vadd.f32 %v4244_v38, %v3963_v6  ;;  %v882_v61 = vsel %vm802_vm2, %v879_v12, %v881_v16  ;;  %v6821_v1 = vld [vmem:[#allocation59_spill] sm:$0xff]  ;;  %v6822_v2 = vld [vmem:[#allocation60_spill] sm:$0xff]  ;;  %v6824_v38 = vld [vmem:[#allocation62_spill] sm:$0xff] }
  0x89   : > { %v4330_v45 = vadd.f32 %v815_v11, %v3967_v20  ;;  %v4333_v54 = vadd.f32 %v817_v3, %v3970_v49  ;;  %v4336_v19 = vadd.f32 %v820_v56, %v3973_v35  ;;  %v4339_v0 = vadd.f32 %v822_v42, %v6821_v1  ;;  %v6825_v20 = vld [vmem:[#allocation63_spill] sm:$0xff]  ;;  %v6826_v49 = vld [vmem:[#allocation64_spill] sm:$0xff]  ;;  %v6827_v35 = vld [vmem:[#allocation65_spill] sm:$0xff] }
  0x8a   : > { %v4342_v43 = vadd.f32 %v825_v27, %v6822_v2  ;;  %v4345_v6 = vadd.f32 %v827_v59, %v6823_v25  ;;  %v4348_v53 = vadd.f32 %v830_v34, %v6824_v38  ;;  %v4351_v11 = vadd.f32 %v832_v5, %v6825_v20  ;;  %v6828_v42 = vld [vmem:[#allocation66_spill] sm:$0xff]  ;;  %v6829_v27 = vld [vmem:[#allocation67_spill] sm:$0xff]  ;;  %v6830_v59 = vld [vmem:[#allocation68_spill] sm:$0xff] }
  0x8b   : > { %v4354_v3 = vadd.f32 %v835_v37, %v6826_v49  ;;  %v4357_v56 = vadd.f32 %v837_v24, %v6827_v35  ;;  %v4360_v31 = vadd.f32 %v840_v50, %v6828_v42  ;;  %v4363_v10 = vadd.f32 %v842_v60, %v6829_v27  ;;  %v6831_v34 = vld [vmem:[#allocation69_spill] sm:$0xff]  ;;  %v6832_v5 = vld [vmem:[#allocation70_spill] sm:$0xff]  ;;  %v6833_v37 = vld [vmem:[#allocation71_spill] sm:$0xff] }
  0x8c   : > { %v4366_v14 = vadd.f32 %v845_v21, %v6830_v59  ;;  %v4369_v52 = vadd.f32 %v847_v13, %v6831_v34  ;;  %v4372_v15 = vadd.f32 %v850_v23, %v6832_v5  ;;  %v4375_v29 = vadd.f32 %v852_v41, %v6833_v37  ;;  %v6834_v24 = vld [vmem:[#allocation72_spill] sm:$0xff]  ;;  %v6835_v50 = vld [vmem:[#allocation73_spill] sm:$0xff]  ;;  %v6837_v60 = vld [vmem:[#allocation2_spill] sm:$0xff] }
  0x8d   : > { %v4378_v9 = vadd.f32 %v855_v47, %v6834_v24  ;;  %v4381_v7 = vadd.f32 %v857_v33, %v6835_v50  ;;  %v6838_v4 = vsub.s32 3, %v6837_v60  ;;  %v4387_v32 = vadd.f32 %v860_v36, %v6840_v62  ;;  %v6842_v13 = vld [vmem:[#allocation75_spill] sm:$0xff]  ;;  %v6846_v23 = vld [vmem:[#allocation77_spill] sm:$0xff]  ;;  %v6852_v16 = vld [vmem:[#allocation80_spill] sm:$0xff] }
  0x8e   : > { %v4390_v46 = vadd.f32 %v862_v28, %v6842_v13  ;;  %v4393_v57 = vadd.f32 %v865_v44, %v6844_v40  ;;  %v4396_v41 = vadd.f32 %v867_v63, %v6846_v23  ;;  %v4399_v12 = vadd.f32 %v870_v22, %v6848_v26  ;;  %v6850_v47 = vld [vmem:[#allocation79_spill] sm:$0xff]  ;;  %v6854_v36 = vld [vmem:[#allocation81_spill] sm:$0xff]  ;;  %v6856_v28 = vld [vmem:[#allocation82_spill] sm:$0xff] }
  0x8f   : > { %6836 = vst [vmem:[#allocation6_spill] sm:$0xff] %v4381_v7  ;;  %v950_v21 = vrot.slane %v6839_v39, %v6838_v4  ;;  %6841 = vst [vmem:[#allocation5_spill] sm:$0xff] %v4387_v32  ;;  %v4402_v33 = vadd.f32 %v872_v48, %v6850_v47  ;;  %v4405_v1 = vadd.f32 %v875_v8, %v6852_v16  ;;  %v6858_v44 = vld [vmem:[#allocation83_spill] sm:$0xff]  ;;  %v6860_v63 = vsub.s32 4, %v6837_v60  ;;  %v6862_v20 = vld [vmem:[#allocation9_spill] sm:$0xff] }
  0x90   : > { %6843 = vst [vmem:[#allocation7_spill] sm:$0xff] %v4390_v46  ;;  %6845 = vst [vmem:[#allocation4_spill] sm:$0xff] %v4393_v57  ;;  %v4408_v2 = vadd.f32 %v877_v30, %v6854_v36  ;;  %v4411_v25 = vadd.f32 %v880_v55, %v6856_v28  ;;  %v4414_v38 = vadd.f32 %v882_v61, %v6858_v44  ;;  %v6863_v8 = vld [vmem:[#allocation12_spill] sm:$0xff]  ;;  %v6865_v59 = vld [vmem:[#allocation10_spill] sm:$0xff] }
  0x91   : > { %6847 = vst [vmem:[#allocation59_spill] sm:$0xff] %v4396_v41  ;;  %6849 = vst [vmem:[#allocation60_spill] sm:$0xff] %v4399_v12  ;;  %v4419_v22 = vrot.slane %v6839_v39, %v6860_v63  ;;  %v951_v49 = vmul.f32 %v950_v21, %v6862_v20  ;;  %v952_v35 = vmul.f32 %v950_v21, %v6863_v8  ;;  %v6864_v55 = vld [vmem:[#allocation8_spill] sm:$0xff]  ;;  %v6867_v37 = vld [vmem:[#allocation17_spill] sm:$0xff] }
  0x92   : > { %6851 = vst [vmem:[#allocation61_spill] sm:$0xff] %v4402_v33  ;;  %6853 = vst [vmem:[#allocation62_spill] sm:$0xff] %v4405_v1  ;;  %v953_v27 = vmul.f32 %v6864_v55, %v950_v21  ;;  %v954_v61 = vmul.f32 %v6865_v59, %v950_v21  ;;  %v6866_v34 = vld [vmem:[#allocation16_spill] sm:$0xff]  ;;  %v956_v24 = vmul.f32 %v950_v21, %v6867_v37  ;;  %v6868_v50 = vld [vmem:[#allocation11_spill] sm:$0xff] }
  0x93   : > { %6855 = vst [vmem:[#allocation63_spill] sm:$0xff] %v4408_v2  ;;  %6857 = vst [vmem:[#allocation64_spill] sm:$0xff] %v4411_v25  ;;  %v955_v5 = vmul.f32 %v950_v21, %v6866_v34  ;;  %v957_v4 = vmul.f32 %v6868_v50, %v950_v21  ;;  %v6869_v39 = vld [vmem:[#allocation14_spill] sm:$0xff]  ;;  %v6870_v13 = vld [vmem:[#allocation21_spill] sm:$0xff] }
  0x94   : > { %6859 = vst [vmem:[#allocation65_spill] sm:$0xff] %v4414_v38  ;;  %6861 = vst [vmem:[#allocation66_spill] sm:$0xff] %v4419_v22  ;;  %v958_v62 = vmul.f32 %v6869_v39, %v950_v21  ;;  %v959_v40 = vmul.f32 %v950_v21, %v6870_v13  ;;  %v6871_v23 = vld [vmem:[#allocation24_spill] sm:$0xff]  ;;  %v6872_v47 = vld [vmem:[#allocation18_spill] sm:$0xff] }
  0x95   : > { %v960_v26 = vmul.f32 %v950_v21, %v6871_v23  ;;  %v961_v16 = vmul.f32 %v6872_v47, %v950_v21  ;;  %v6873_v36 = vld [vmem:[#allocation22_spill] sm:$0xff]  ;;  %v6874_v44 = vld [vmem:[#allocation29_spill] sm:$0xff]  ;;  %v6875_v42 = vld [vmem:[#allocation31_spill] sm:$0xff] }
  0x96   : > { %v962_v28 = vmul.f32 %v6873_v36, %v950_v21  ;;  %v963_v63 = vmul.f32 %v950_v21, %v6874_v44  ;;  %v964_v30 = vmul.f32 %v950_v21, %v6875_v42  ;;  %v6876_v48 = vld [vmem:[#allocation23_spill] sm:$0xff]  ;;  %v6877_v34 = vld [vmem:[#allocation26_spill] sm:$0xff]  ;;  %v6879_v55 = vld [vmem:[#allocation36_spill] sm:$0xff] }
  0x97   : > { %v965_v60 = vmul.f32 %v6876_v48, %v950_v21  ;;  %v966_v37 = vmul.f32 %v6877_v34, %v950_v21  ;;  %v6878_v59 = vld [vmem:[#allocation35_spill] sm:$0xff]  ;;  %v968_v39 = vmul.f32 %v950_v21, %v6879_v55  ;;  %v6881_v22 = vld [vmem:[#allocation30_spill] sm:$0xff]  ;;  %v6882_v20 = vld [vmem:[#allocation41_spill] sm:$0xff] }
  0x98   : > { %v967_v50 = vmul.f32 %v950_v21, %v6878_v59  ;;  %v6880_v8 = vld [vmem:[#allocation27_spill] sm:$0xff]  ;;  %v970_v23 = vmul.f32 %v6881_v22, %v950_v21  ;;  %v971_v47 = vmul.f32 %v950_v21, %v6882_v20  ;;  %v6883_v38 = vld [vmem:[#allocation44_spill] sm:$0xff]  ;;  %v6884_v25 = vld [vmem:[#allocation34_spill] sm:$0xff] }
  0x99   : > { %v969_v13 = vmul.f32 %v6880_v8, %v950_v21  ;;  %v972_v36 = vmul.f32 %v950_v21, %v6883_v38  ;;  %v973_v44 = vmul.f32 %v6884_v25, %v950_v21  ;;  %v6885_v2 = vld [vmem:[#allocation38_spill] sm:$0xff]  ;;  %v6886_v1 = vld [vmem:[#allocation49_spill] sm:$0xff]  ;;  %v6888_v12 = vld [vmem:[#allocation39_spill] sm:$0xff]  ;;  %v4457_v25 = vadd.f32 %v951_v49, %v4313_v17 }
  0x9a   : > { %v974_v42 = vmul.f32 %v6885_v2, %v950_v21  ;;  %v975_v48 = vmul.f32 %v950_v21, %v6886_v1  ;;  %v6887_v33 = vld [vmem:[#allocation50_spill] sm:$0xff]  ;;  %v977_v59 = vmul.f32 %v6888_v12, %v950_v21  ;;  %v6890_v57 = vld [vmem:[#allocation53_spill] sm:$0xff]  ;;  %v6892_v32 = vld [vmem:[#allocation43_spill] sm:$0xff]  ;;  %v4460_v2 = vadd.f32 %v952_v35, %v4318_v18 }
  0x9b   : > { %v976_v34 = vmul.f32 %v950_v21, %v6887_v33  ;;  %v6889_v41 = vld [vmem:[#allocation42_spill] sm:$0xff]  ;;  %v979_v8 = vmul.f32 %v950_v21, %v6890_v57  ;;  %v981_v20 = vmul.f32 %v6892_v32, %v950_v21  ;;  %v4463_v33 = vadd.f32 %v953_v27, %v4322_v58 }
  0x9c   : > { %v978_v55 = vmul.f32 %v6889_v41, %v950_v21  ;;  %v6891_v46 = vld [vmem:[#allocation54_spill] sm:$0xff]  ;;  %v4466_v12 = vadd.f32 %v954_v61, %v4326_v51  ;;  %v4469_v57 = vadd.f32 %v955_v5, %v4330_v45  ;;  %v4478_v17 = vadd.f32 %v958_v62, %v4339_v0 }
  0x9d   : > { %v980_v22 = vmul.f32 %v950_v21, %v6891_v46  ;;  %v6893_v7 = vld [vmem:[#allocation46_spill] sm:$0xff]  ;;  %v4472_v46 = vadd.f32 %v956_v24, %v4333_v54  ;;  %v4481_v18 = vadd.f32 %v959_v40, %v4342_v43  ;;  %v4484_v58 = vadd.f32 %v960_v26, %v4345_v6 }
  0x9e   : > { %v982_v38 = vmul.f32 %v6893_v7, %v950_v21  ;;  %v4475_v21 = vadd.f32 %v957_v4, %v4336_v19  ;;  %6895 = vst [vmem:[#allocation68_spill] sm:$0xff] %v4478_v17  ;;  %v4487_v51 = vadd.f32 %v961_v16, %v4348_v53  ;;  %v4490_v45 = vadd.f32 %v962_v28, %v4351_v11  ;;  %v6937_v16 = vld [vmem:[#allocation15_spill] sm:$0xff] }
  0x9f   : > { %6896 = vst [vmem:[#allocation69_spill] sm:$0xff] %v4481_v18  ;;  %6897 = vst [vmem:[#allocation70_spill] sm:$0xff] %v4484_v58  ;;  %v4493_v54 = vadd.f32 %v963_v63, %v4354_v3  ;;  %v4496_v19 = vadd.f32 %v964_v30, %v4357_v56  ;;  %v4499_v0 = vadd.f32 %v965_v60, %v4360_v31  ;;  %v6909_v31 = vld [vmem:[#allocation6_spill] sm:$0xff] }
  0xa0   : > { %6894 = vst [vmem:[#allocation67_spill] sm:$0xff] %v4475_v21  ;;  %6898 = vst [vmem:[#allocation71_spill] sm:$0xff] %v4487_v51  ;;  %v4502_v43 = vadd.f32 %v966_v37, %v4363_v10  ;;  %v4505_v6 = vadd.f32 %v967_v50, %v4366_v14  ;;  %v4508_v53 = vadd.f32 %v968_v39, %v4369_v52  ;;  %v6911_v10 = vld [vmem:[#allocation5_spill] sm:$0xff]  ;;  %v6913_v14 = vld [vmem:[#allocation7_spill] sm:$0xff] }
  0xa1   : > { %6899 = vst [vmem:[#allocation72_spill] sm:$0xff] %v4490_v45  ;;  %6900 = vst [vmem:[#allocation73_spill] sm:$0xff] %v4493_v54  ;;  %v4511_v11 = vadd.f32 %v969_v13, %v4372_v15  ;;  %v4514_v3 = vadd.f32 %v970_v23, %v4375_v29  ;;  %v4517_v56 = vadd.f32 %v971_v47, %v4378_v9  ;;  %v6915_v52 = vld [vmem:[#allocation4_spill] sm:$0xff]  ;;  %v6917_v15 = vld [vmem:[#allocation59_spill] sm:$0xff] }
  0xa2   : > { %6901 = vst [vmem:[#allocation3_spill] sm:$0xff] %v4496_v19  ;;  %6902 = vst [vmem:[#allocation74_spill] sm:$0xff] %v4499_v0  ;;  %v4520_v60 = vadd.f32 %v972_v36, %v6909_v31  ;;  %v4523_v49 = vadd.f32 %v973_v44, %v6911_v10  ;;  %v4526_v35 = vadd.f32 %v974_v42, %v6913_v14  ;;  %v6919_v29 = vld [vmem:[#allocation60_spill] sm:$0xff]  ;;  %v6921_v9 = vld [vmem:[#allocation61_spill] sm:$0xff] }
  0xa3   : > { %6903 = vst [vmem:[#allocation75_spill] sm:$0xff] %v4502_v43  ;;  %6904 = vst [vmem:[#allocation76_spill] sm:$0xff] %v4505_v6  ;;  %v4529_v30 = vadd.f32 %v975_v48, %v6915_v52  ;;  %v4532_v27 = vadd.f32 %v976_v34, %v6917_v15  ;;  %v4535_v61 = vadd.f32 %v977_v59, %v6919_v29  ;;  %v6923_v37 = vld [vmem:[#allocation62_spill] sm:$0xff]  ;;  %v6925_v50 = vld [vmem:[#allocation63_spill] sm:$0xff] }
  0xa4   : > { %6905 = vst [vmem:[#allocation77_spill] sm:$0xff] %v4508_v53  ;;  %6906 = vst [vmem:[#allocation78_spill] sm:$0xff] %v4511_v11  ;;  %v4538_v5 = vadd.f32 %v978_v55, %v6921_v9  ;;  %v4541_v24 = vadd.f32 %v979_v8, %v6923_v37  ;;  %v4544_v4 = vadd.f32 %v980_v22, %v6925_v50  ;;  %v6927_v42 = vld [vmem:[#allocation64_spill] sm:$0xff]  ;;  %v6929_v48 = vld [vmem:[#allocation65_spill] sm:$0xff] }
  0xa5   : > { %6907 = vst [vmem:[#allocation79_spill] sm:$0xff] %v4514_v3  ;;  %6908 = vst [vmem:[#allocation80_spill] sm:$0xff] %v4517_v56  ;;  %v4547_v39 = vadd.f32 %v981_v20, %v6927_v42  ;;  %v4550_v62 = vadd.f32 %v982_v38, %v6929_v48  ;;  %v6931_v34 = vld [vmem:[#allocation9_spill] sm:$0xff]  ;;  %v6932_v13 = vld [vmem:[#allocation66_spill] sm:$0xff] }
  0xa6   : > { %6910 = vst [vmem:[#allocation81_spill] sm:$0xff] %v4520_v60  ;;  %6912 = vst [vmem:[#allocation82_spill] sm:$0xff] %v4523_v49  ;;  %v1019_v40 = vmul.f32 %v6932_v13, %v6931_v34  ;;  %v6933_v59 = vld [vmem:[#allocation12_spill] sm:$0xff]  ;;  %v6934_v55 = vld [vmem:[#allocation13_spill] sm:$0xff]  ;;  %v4568_v38 = vmul.f32 %v6932_v13, %v6937_v16 }
  0xa7   : > { %6914 = vst [vmem:[#allocation83_spill] sm:$0xff] %v4526_v35  ;;  %6916 = vst [vmem:[#allocation6_spill] sm:$0xff] %v4529_v30  ;;  %v1020_v23 = vmul.f32 %v6932_v13, %v6933_v59  ;;  %v1021_v26 = vmul.f32 %v6932_v13, %v6934_v55  ;;  %v6935_v8 = vld [vmem:[#allocation8_spill] sm:$0xff]  ;;  %v6936_v22 = vld [vmem:[#allocation10_spill] sm:$0xff] }
  0xa8   : > { %6918 = vst [vmem:[#allocation5_spill] sm:$0xff] %v4532_v27  ;;  %6920 = vst [vmem:[#allocation7_spill] sm:$0xff] %v4535_v61  ;;  %v4560_v47 = vmul.f32 %v6935_v8, %v6932_v13  ;;  %v4564_v20 = vmul.f32 %v6936_v22, %v6932_v13  ;;  %v6938_v36 = vld [vmem:[#allocation16_spill] sm:$0xff]  ;;  %v6939_v44 = vld [vmem:[#allocation17_spill] sm:$0xff]  ;;  %v1115_v43 = vrot.slane %v1019_v40, 1  ;;  %v1123_v18 = vrot.slane %v4568_v38, 1 }
  0xa9   : > { %6922 = vst [vmem:[#allocation4_spill] sm:$0xff] %v4538_v5  ;;  %6924 = vst [vmem:[#allocation59_spill] sm:$0xff] %v4541_v24  ;;  %v4572_v28 = vmul.f32 %v6932_v13, %v6938_v36  ;;  %v4576_v63 = vmul.f32 %v6932_v13, %v6939_v44  ;;  %v6940_v31 = vld [vmem:[#allocation19_spill] sm:$0xff]  ;;  %v6942_v15 = vld [vmem:[#allocation14_spill] sm:$0xff]  ;;  %v1116_v0 = vrot.slane %v1020_v23, 1 }
  0xaa   : > { %6926 = vst [vmem:[#allocation60_spill] sm:$0xff] %v4544_v4  ;;  %6928 = vst [vmem:[#allocation61_spill] sm:$0xff] %v4547_v39  ;;  %v4580_v10 = vmul.f32 %v6932_v13, %v6940_v31  ;;  %v6941_v14 = vld [vmem:[#allocation11_spill] sm:$0xff]  ;;  %v4588_v29 = vmul.f32 %v6942_v15, %v6932_v13  ;;  %v6943_v9 = vld [vmem:[#allocation20_spill] sm:$0xff]  ;;  %v1120_v58 = vrot.slane %v4560_v47, 1 }
  0xab   : > { %6930 = vst [vmem:[#allocation62_spill] sm:$0xff] %v4550_v62  ;;  %v4584_v52 = vmul.f32 %v6941_v14, %v6932_v13  ;;  %v4592_v37 = vmul.f32 %v6932_v13, %v6943_v9  ;;  %v6944_v50 = vld [vmem:[#allocation21_spill] sm:$0xff]  ;;  %v6945_v48 = vld [vmem:[#allocation24_spill] sm:$0xff]  ;;  %v6947_v44 = vld [vmem:[#allocation18_spill] sm:$0xff]  ;;  %v1125_v17 = vrot.slane %v4572_v28, 1 }
  0xac   : > { %v4596_v42 = vmul.f32 %v6932_v13, %v6944_v50  ;;  %v4600_v31 = vmul.f32 %v6932_v13, %v6945_v48  ;;  %v6946_v55 = vld [vmem:[#allocation25_spill] sm:$0xff]  ;;  %v4608_v15 = vmul.f32 %v6947_v44, %v6932_v13  ;;  %v6948_v36 = vld [vmem:[#allocation22_spill] sm:$0xff]  ;;  %v6949_v59 = vld [vmem:[#allocation28_spill] sm:$0xff]  ;;  %v1128_v21 = vrot.slane %v4580_v10, 1 }
  0xad   : > { %v4604_v14 = vmul.f32 %v6932_v13, %v6946_v55  ;;  %v4612_v9 = vmul.f32 %v6948_v36, %v6932_v13  ;;  %v4616_v50 = vmul.f32 %v6932_v13, %v6949_v59  ;;  %v6950_v34 = vld [vmem:[#allocation29_spill] sm:$0xff]  ;;  %v6951_v16 = vld [vmem:[#allocation31_spill] sm:$0xff]  ;;  %v6952_v22 = vld [vmem:[#allocation32_spill] sm:$0xff]  ;;  %v1131_v47 = vrot.slane %v4588_v29, 1 }
  0xae   : > { %v4620_v48 = vmul.f32 %v6932_v13, %v6950_v34  ;;  %v4624_v55 = vmul.f32 %v6932_v13, %v6951_v16  ;;  %v4628_v44 = vmul.f32 %v6932_v13, %v6952_v22  ;;  %v6953_v8 = vld [vmem:[#allocation23_spill] sm:$0xff]  ;;  %v6954_v62 = vld [vmem:[#allocation26_spill] sm:$0xff]  ;;  %v6955_v39 = vld [vmem:[#allocation33_spill] sm:$0xff]  ;;  %v1135_v38 = vrot.slane %v4596_v42, 1 }
  0xaf   : > { %v4632_v36 = vmul.f32 %v6953_v8, %v6932_v13  ;;  %v4636_v59 = vmul.f32 %v6954_v62, %v6932_v13  ;;  %v4640_v34 = vmul.f32 %v6932_v13, %v6955_v39  ;;  %v6956_v4 = vld [vmem:[#allocation35_spill] sm:$0xff]  ;;  %v6957_v24 = vld [vmem:[#allocation36_spill] sm:$0xff]  ;;  %v6958_v5 = vld [vmem:[#allocation37_spill] sm:$0xff]  ;;  %v1143_v28 = vrot.slane %v4616_v50, 1 }
  0xb0   : > { %v4644_v16 = vmul.f32 %v6932_v13, %v6956_v4  ;;  %v4648_v22 = vmul.f32 %v6932_v13, %v6957_v24  ;;  %v4652_v8 = vmul.f32 %v6932_v13, %v6958_v5  ;;  %v6959_v61 = vld [vmem:[#allocation27_spill] sm:$0xff]  ;;  %v6960_v27 = vld [vmem:[#allocation30_spill] sm:$0xff]  ;;  %v6961_v30 = vld [vmem:[#allocation40_spill] sm:$0xff]  ;;  %v1146_v10 = vrot.slane %v4624_v55, 1 }
  0xb1   : > { %v4656_v62 = vmul.f32 %v6959_v61, %v6932_v13  ;;  %v4660_v39 = vmul.f32 %v6960_v27, %v6932_v13  ;;  %v4664_v4 = vmul.f32 %v6932_v13, %v6961_v30  ;;  %v6962_v35 = vld [vmem:[#allocation41_spill] sm:$0xff]  ;;  %v6963_v49 = vld [vmem:[#allocation44_spill] sm:$0xff]  ;;  %v6965_v56 = vld [vmem:[#allocation34_spill] sm:$0xff]  ;;  %v1150_v29 = vrot.slane %v4632_v36, 1 }
  0xb2   : > { %v4668_v24 = vmul.f32 %v6932_v13, %v6962_v35  ;;  %v4672_v5 = vmul.f32 %v6932_v13, %v6963_v49  ;;  %v6964_v60 = vld [vmem:[#allocation45_spill] sm:$0xff]  ;;  %v4680_v27 = vmul.f32 %v6965_v56, %v6932_v13  ;;  %v6966_v3 = vld [vmem:[#allocation38_spill] sm:$0xff]  ;;  %v6967_v11 = vld [vmem:[#allocation48_spill] sm:$0xff]  ;;  %v4692_v49 = vmul.f32 %v6932_v13, %v6886_v1 }
  0xb3   : > { %v4676_v61 = vmul.f32 %v6932_v13, %v6964_v60  ;;  %v4684_v30 = vmul.f32 %v6966_v3, %v6932_v13  ;;  %v4688_v35 = vmul.f32 %v6932_v13, %v6967_v11  ;;  %v6968_v53 = vld [vmem:[#allocation50_spill] sm:$0xff]  ;;  %v6969_v6 = vld [vmem:[#allocation51_spill] sm:$0xff]  ;;  %v1118_v3 = vrot.slane %v1021_v26, 1  ;;  %v6971_v1 = vld [vmem:[#allocation52_spill] sm:$0xff] }
  0xb4   : > { %v4696_v60 = vmul.f32 %v6932_v13, %v6968_v53  ;;  %v4700_v56 = vmul.f32 %v6932_v13, %v6969_v6  ;;  %v6970_v19 = vld [vmem:[#allocation39_spill] sm:$0xff]  ;;  %v4708_v11 = vmul.f32 %v6889_v41, %v6932_v13  ;;  %v4712_v45 = vmul.f32 %v6932_v13, %v6971_v1  ;;  %v6972_v53 = vld [vmem:[#allocation53_spill] sm:$0xff]  ;;  %v6973_v6 = vld [vmem:[#allocation54_spill] sm:$0xff] }
  0xb5   : > { %v4704_v54 = vmul.f32 %v6970_v19, %v6932_v13  ;;  %v4716_v51 = vmul.f32 %v6932_v13, %v6972_v53  ;;  %v4720_v40 = vmul.f32 %v6932_v13, %v6973_v6  ;;  %v6974_v23 = vld [vmem:[#allocation55_spill] sm:$0xff]  ;;  %v4728_v41 = vmul.f32 %v6892_v32, %v6932_v13  ;;  %v6975_v19 = vld [vmem:[#allocation56_spill] sm:$0xff] }
  0xb6   : > { %v4724_v26 = vmul.f32 %v6932_v13, %v6974_v23  ;;  %v4732_v1 = vmul.f32 %v6893_v7, %v6932_v13  ;;  %v4736_v53 = vmul.f32 %v6932_v13, %v6975_v19  ;;  %v1121_v6 = vrot.slane %v4564_v20, 1 }
  0xb7   : > { %v4742_v23 = vsel %vm557_vm1, %v1115_v43, %v1116_v0  ;;  %v4745_v32 = vsel %vm557_vm1, %v1116_v0, %v1118_v3  ;;  %v1126_v7 = vrot.slane %v4576_v63, 1  ;;  %v1130_v13 = vrot.slane %v4584_v52, 1 }
  0xb8   : > { %v1133_v20 = vrot.slane %v4592_v37, 1  ;;  %v1136_v43 = vrot.slane %v4600_v31, 1  ;;  %v1138_v19 = vrot.slane %v4604_v14, 1  ;;  %v1140_v0 = vrot.slane %v4608_v15, 1 }
  0xb9   : > { %v1141_v3 = vrot.slane %v4612_v9, 1  ;;  %v1145_v63 = vrot.slane %v4620_v48, 1  ;;  %v1148_v52 = vrot.slane %v4628_v44, 1  ;;  %v1151_v37 = vrot.slane %v4636_v59, 1 }
  0xba   : > { %v1153_v31 = vrot.slane %v4640_v34, 1  ;;  %v1122_v14 = vsel %vm557_vm1, %v1120_v58, %v1121_v6  ;;  %v1124_v15 = vsel %vm557_vm1, %v1121_v6, %v1123_v18  ;;  %v1155_v9 = vrot.slane %v4644_v16, 1 }
  0xbb   : > { %v1156_v50 = vrot.slane %v4648_v22, 1  ;;  %v1127_v42 = vsel %vm557_vm1, %v1125_v17, %v1126_v7  ;;  %v1129_v55 = vsel %vm557_vm1, %v1126_v7, %v1128_v21  ;;  %v1132_v44 = vsel %vm557_vm1, %v1130_v13, %v1131_v47 }
  0xbc   : > { %v1134_v36 = vsel %vm557_vm1, %v1131_v47, %v1133_v20  ;;  %v1137_v59 = vsel %vm557_vm1, %v1135_v38, %v1136_v43  ;;  %v1139_v34 = vsel %vm557_vm1, %v1136_v43, %v1138_v19  ;;  %v1142_v58 = vsel %vm557_vm1, %v1140_v0, %v1141_v3 }
  0xbd   : > { %v1144_v18 = vsel %vm557_vm1, %v1141_v3, %v1143_v28  ;;  %v1147_v6 = vsel %vm557_vm1, %v1145_v63, %v1146_v10  ;;  %v1149_v22 = vsel %vm557_vm1, %v1146_v10, %v1148_v52  ;;  %v1152_v17 = vsel %vm557_vm1, %v1150_v29, %v1151_v37 }
  0xbe   : > { %v1154_v7 = vsel %vm557_vm1, %v1151_v37, %v1153_v31  ;;  %v1157_v21 = vsel %vm557_vm1, %v1155_v9, %v1156_v50  ;;  %v1158_v16 = vrot.slane %v4652_v8, 1  ;;  %v1160_v48 = vrot.slane %v4656_v62, 1 }
  0xbf   : > { %v1161_v19 = vrot.slane %v4660_v39, 1  ;;  %v1163_v13 = vrot.slane %v4664_v4, 1  ;;  %v1165_v47 = vrot.slane %v4668_v24, 1  ;;  %v1166_v20 = vrot.slane %v4672_v5, 1 }
  0xc0   : > { %v1168_v38 = vrot.slane %v4676_v61, 1  ;;  %v1170_v43 = vrot.slane %v4680_v27, 1  ;;  %v1171_v0 = vrot.slane %v4684_v30, 1  ;;  %v1173_v3 = vrot.slane %v4688_v35, 1 }
  0xc1   : > { %v1175_v8 = vrot.slane %v4692_v49, 1  ;;  %v1176_v62 = vrot.slane %v4696_v60, 1  ;;  %v1178_v39 = vrot.slane %v4700_v56, 1  ;;  %v1180_v4 = vrot.slane %v4704_v54, 1 }
  0xc2   : > { %v1181_v24 = vrot.slane %v4708_v11, 1  ;;  %v1183_v5 = vrot.slane %v4712_v45, 1  ;;  %v1185_v61 = vrot.slane %v4716_v51, 1  ;;  %v1186_v27 = vrot.slane %v4720_v40, 1 }
  0xc3   : > { %v1188_v30 = vrot.slane %v4724_v26, 1  ;;  %v1159_v35 = vsel %vm557_vm1, %v1156_v50, %v1158_v16  ;;  %v1190_v49 = vrot.slane %v4728_v41, 1  ;;  %v1191_v60 = vrot.slane %v4732_v1, 1 }
  0xc4   : > { %v1193_v56 = vrot.slane %v4736_v53, 1  ;;  %v1162_v54 = vsel %vm557_vm1, %v1160_v48, %v1161_v19  ;;  %v1164_v11 = vsel %vm557_vm1, %v1161_v19, %v1163_v13  ;;  %v1167_v45 = vsel %vm557_vm1, %v1165_v47, %v1166_v20  ;;  %v6976_v19 = vld [vmem:[#allocation67_spill] sm:$0xff] }
  0xc5   : > { %v1169_v51 = vsel %vm557_vm1, %v1166_v20, %v1168_v38  ;;  %v1172_v40 = vsel %vm557_vm1, %v1170_v43, %v1171_v0  ;;  %v1174_v26 = vsel %vm557_vm1, %v1171_v0, %v1173_v3  ;;  %v1177_v28 = vsel %vm557_vm1, %v1175_v8, %v1176_v62 }
  0xc6   : > { %v1179_v41 = vsel %vm557_vm1, %v1176_v62, %v1178_v39  ;;  %v1182_v1 = vsel %vm557_vm1, %v1180_v4, %v1181_v24  ;;  %v1184_v53 = vsel %vm557_vm1, %v1181_v24, %v1183_v5  ;;  %v1187_v63 = vsel %vm557_vm1, %v1185_v61, %v1186_v27  ;;  %v7011_v24 = vld [vmem:[#allocation83_spill] sm:$0xff]  ;;  %v7013_v61 = vld [vmem:[#allocation6_spill] sm:$0xff] }
  0xc7   : > { %v1189_v10 = vsel %vm557_vm1, %v1186_v27, %v1188_v30  ;;  %v1192_v52 = vsel %vm557_vm1, %v1190_v49, %v1191_v60  ;;  %v1194_v29 = vsel %vm557_vm1, %v1191_v60, %v1193_v56  ;;  %v4821_v37 = vadd.f32 %v4742_v23, %v4457_v25  ;;  %v6978_v25 = vld [vmem:[#allocation68_spill] sm:$0xff]  ;;  %v3270_v30 = vld [vmem:[%s6508_s1] sm:$0xff]  ;;  %v7017_v56 = vld [vmem:[#allocation5_spill] sm:$0xff] }
  0xc8   : > { %v4825_v31 = vadd.f32 %v4745_v32, %v4460_v2  ;;  %v4828_v9 = vadd.f32 %v1122_v14, %v4463_v33  ;;  %v4831_v50 = vadd.f32 %v1124_v15, %v4466_v12  ;;  %v4834_v16 = vadd.f32 %v1127_v42, %v4469_v57  ;;  %v6980_v32 = vld [vmem:[#allocation69_spill] sm:$0xff]  ;;  %v6982_v33 = vld [vmem:[#allocation70_spill] sm:$0xff]  ;;  %v6984_v12 = vld [vmem:[#allocation71_spill] sm:$0xff] }
  0xc9   : > { %v4837_v48 = vadd.f32 %v1129_v55, %v4472_v46  ;;  %v4840_v13 = vadd.f32 %v1132_v44, %v6976_v19  ;;  %v4843_v23 = vadd.f32 %v1134_v36, %v6978_v25  ;;  %v4846_v2 = vadd.f32 %v1137_v59, %v6980_v32  ;;  %v6986_v57 = vld [vmem:[#allocation72_spill] sm:$0xff]  ;;  %v6988_v46 = vld [vmem:[#allocation73_spill] sm:$0xff]  ;;  %v6990_v44 = vld [vmem:[#allocation3_spill] sm:$0xff] }
  0xca   : > { %v4849_v14 = vadd.f32 %v1139_v34, %v6982_v33  ;;  %v4852_v15 = vadd.f32 %v1142_v58, %v6984_v12  ;;  %v4855_v42 = vadd.f32 %v1144_v18, %v6986_v57  ;;  %v4858_v55 = vadd.f32 %v1147_v6, %v6988_v46  ;;  %v6992_v36 = vld [vmem:[#allocation74_spill] sm:$0xff]  ;;  %v6994_v59 = vld [vmem:[#allocation75_spill] sm:$0xff]  ;;  %v6996_v34 = vld [vmem:[#allocation76_spill] sm:$0xff] }
  0xcb   : > { %6977 = vst [vmem:[#allocation63_spill] sm:$0xff] %v4840_v13  ;;  %6979 = vst [vmem:[#allocation64_spill] sm:$0xff] %v4843_v23  ;;  %v4861_v47 = vadd.f32 %v1149_v22, %v6990_v44  ;;  %v4864_v20 = vadd.f32 %v1152_v17, %v6992_v36  ;;  %v4867_v38 = vadd.f32 %v1154_v7, %v6994_v59  ;;  %v6998_v58 = vld [vmem:[#allocation77_spill] sm:$0xff]  ;;  %v7000_v18 = vld [vmem:[#allocation78_spill] sm:$0xff] }
  0xcc   : > { %6981 = vst [vmem:[#allocation65_spill] sm:$0xff] %v4846_v2  ;;  %6983 = vst [vmem:[#allocation66_spill] sm:$0xff] %v4849_v14  ;;  %v4870_v43 = vadd.f32 %v1157_v21, %v6996_v34  ;;  %v4873_v0 = vadd.f32 %v1159_v35, %v6998_v58  ;;  %v4876_v3 = vadd.f32 %v1162_v54, %v7000_v18  ;;  %v7002_v6 = vld [vmem:[#allocation79_spill] sm:$0xff]  ;;  %v7004_v22 = vld [vmem:[#allocation80_spill] sm:$0xff] }
  0xcd   : > { %6985 = vst [vmem:[#allocation67_spill] sm:$0xff] %v4852_v15  ;;  %6987 = vst [vmem:[#allocation68_spill] sm:$0xff] %v4855_v42  ;;  %v4879_v8 = vadd.f32 %v1164_v11, %v7002_v6  ;;  %v4882_v62 = vadd.f32 %v1167_v45, %v7004_v22  ;;  %v7006_v17 = vld [vmem:[#allocation81_spill] sm:$0xff]  ;;  %v4890_v7 = vld [vmem:[%s6508_s1 + $0x8] ss:$0 sm:$0xff]  ;;  %v4896_v5 = vadd.f32 %v1174_v26, %v7011_v24 }
  0xce   : > { %6989 = vst [vmem:[#allocation69_spill] sm:$0xff] %v4858_v55  ;;  %6991 = vst [vmem:[#allocation70_spill] sm:$0xff] %v4861_v47  ;;  %v4885_v39 = vadd.f32 %v1169_v51, %v7006_v17  ;;  %v7009_v21 = vld [vmem:[#allocation82_spill] sm:$0xff]  ;;  %v4899_v27 = vadd.f32 %v1177_v28, %v7013_v61  ;;  %v4909_v54 = vadd.f32 %v1179_v41, %v7017_v56  ;;  %v7019_v11 = vld [vmem:[#allocation7_spill] sm:$0xff] }
  0xcf   : > { %6993 = vst [vmem:[#allocation71_spill] sm:$0xff] %v4864_v20  ;;  %6995 = vst [vmem:[#allocation72_spill] sm:$0xff] %v4867_v38  ;;  %v4893_v4 = vadd.f32 %v1172_v40, %v7009_v21  ;;  %v7015_v35 = vld [vmem:[#allocation2_spill] sm:$0xff]  ;;  %v4912_v45 = vadd.f32 %v1182_v1, %v7019_v11  ;;  %v7021_v51 = vld [vmem:[#allocation4_spill] sm:$0xff] }
  0xd0   : > { %6997 = vst [vmem:[#allocation73_spill] sm:$0xff] %v4870_v43  ;;  %6999 = vst [vmem:[#allocation3_spill] sm:$0xff] %v4873_v0  ;;  %v7016_v49 = vsub.s32 5, %v7015_v35  ;;  %v4915_v40 = vadd.f32 %v1184_v53, %v7021_v51  ;;  %v7023_v26 = vld [vmem:[#allocation59_spill] sm:$0xff]  ;;  %v7025_v19 = vld [vmem:[#allocation60_spill] sm:$0xff]  ;;  %v7031_v41 = vsub.s32 6, %v7015_v35 }
  0xd1   : > { %7001 = vst [vmem:[#allocation74_spill] sm:$0xff] %v4876_v3  ;;  %7003 = vst [vmem:[#allocation75_spill] sm:$0xff] %v4879_v8  ;;  %v4918_v28 = vadd.f32 %v1187_v63, %v7023_v26  ;;  %v4921_v25 = vadd.f32 %v1189_v10, %v7025_v19  ;;  %v7027_v32 = vld [vmem:[#allocation61_spill] sm:$0xff]  ;;  %v7029_v12 = vld [vmem:[#allocation62_spill] sm:$0xff]  ;;  %v7033_v1 = vsub.s32 7, %v7015_v35 }
  0xd2   : > { %7005 = vst [vmem:[#allocation76_spill] sm:$0xff] %v4882_v62  ;;  %7007 = vst [vmem:[#allocation77_spill] sm:$0xff] %v4885_v39  ;;  %v4906_v60 = vrot.slane %v3270_v30, %v7016_v49  ;;  %v4924_v33 = vadd.f32 %v1192_v52, %v7027_v32  ;;  %v4927_v57 = vadd.f32 %v1194_v29, %v7029_v12  ;;  %v7035_v63 = vld [vmem:[#allocation8_spill] sm:$0xff]  ;;  %v7037_v10 = vld [vmem:[#allocation10_spill] sm:$0xff] }
  0xd3   : > { %7008 = vst [vmem:[#allocation78_spill] sm:$0xff] %v4890_v7  ;;  %7010 = vst [vmem:[#allocation79_spill] sm:$0xff] %v4893_v4  ;;  %v4931_v46 = vrot.slane %v3270_v30, %v7031_v41  ;;  %v4935_v53 = vrot.slane %v3270_v30, %v7033_v1  ;;  %v4939_v44 = vmul.f32 %v7035_v63, %v4890_v7  ;;  %v7039_v52 = vld [vmem:[#allocation15_spill] sm:$0xff]  ;;  %v7041_v59 = vld [vmem:[#allocation9_spill] sm:$0xff] }
  0xd4   : > { %7012 = vst [vmem:[#allocation80_spill] sm:$0xff] %v4896_v5  ;;  %7014 = vst [vmem:[#allocation81_spill] sm:$0xff] %v4899_v27  ;;  %v4943_v36 = vmul.f32 %v7037_v10, %v4890_v7  ;;  %v4947_v29 = vmul.f32 %v4890_v7, %v7039_v52  ;;  %v1263_v34 = vmul.f32 %v4906_v60, %v7041_v59  ;;  %v7042_v58 = vld [vmem:[#allocation12_spill] sm:$0xff]  ;;  %v7045_v17 = vld [vmem:[#allocation17_spill] sm:$0xff] }
  0xd5   : > { %7018 = vst [vmem:[#allocation82_spill] sm:$0xff] %v4909_v54  ;;  %7020 = vst [vmem:[#allocation83_spill] sm:$0xff] %v4912_v45  ;;  %v1264_v18 = vmul.f32 %v4906_v60, %v7042_v58  ;;  %v7043_v6 = vld [vmem:[#allocation16_spill] sm:$0xff]  ;;  %v4959_v21 = vmul.f32 %v4890_v7, %v7045_v17  ;;  %v7047_v24 = vld [vmem:[#allocation13_spill] sm:$0xff]  ;;  %v4965_v30 = vmul.f32 %v7035_v63, %v4906_v60 }
  0xd6   : > { %7022 = vst [vmem:[#allocation6_spill] sm:$0xff] %v4915_v40  ;;  %7024 = vst [vmem:[#allocation5_spill] sm:$0xff] %v4918_v28  ;;  %v4955_v22 = vmul.f32 %v4890_v7, %v7043_v6  ;;  %v1265_v61 = vmul.f32 %v4906_v60, %v7047_v24  ;;  %v4969_v49 = vmul.f32 %v7037_v10, %v4906_v60  ;;  %v7048_v26 = vld [vmem:[#allocation19_spill] sm:$0xff]  ;;  %v7050_v41 = vld [vmem:[#allocation14_spill] sm:$0xff]  ;;  %v1359_v3 = vrot.slane %v1263_v34, 2 }
  0xd7   : > { %7026 = vst [vmem:[#allocation7_spill] sm:$0xff] %v4921_v25  ;;  %7028 = vst [vmem:[#allocation4_spill] sm:$0xff] %v4924_v33  ;;  %v4973_v56 = vmul.f32 %v4906_v60, %v7039_v52  ;;  %v4977_v11 = vmul.f32 %v4906_v60, %v7043_v6  ;;  %v4981_v51 = vmul.f32 %v4906_v60, %v7045_v17  ;;  %v7049_v32 = vld [vmem:[#allocation11_spill] sm:$0xff]  ;;  %v7051_v59 = vld [vmem:[#allocation20_spill] sm:$0xff]  ;;  %v1360_v0 = vrot.slane %v1264_v18, 2 }
  0xd8   : > { %7030 = vst [vmem:[#allocation59_spill] sm:$0xff] %v4927_v57  ;;  %7032 = vst [vmem:[#allocation60_spill] sm:$0xff] %v4931_v46  ;;  %v4985_v19 = vmul.f32 %v4906_v60, %v7048_v26  ;;  %v4989_v12 = vmul.f32 %v7049_v32, %v4906_v60  ;;  %v4993_v1 = vmul.f32 %v7050_v41, %v4906_v60  ;;  %v7052_v24 = vld [vmem:[#allocation21_spill] sm:$0xff]  ;;  %v7056_v26 = vld [vmem:[#allocation22_spill] sm:$0xff]  ;;  %v1364_v14 = vrot.slane %v4965_v30, 2 }
  0xd9   : > { %7034 = vst [vmem:[#allocation61_spill] sm:$0xff] %v4935_v53  ;;  %7036 = vst [vmem:[#allocation62_spill] sm:$0xff] %v4939_v44  ;;  %v4997_v58 = vmul.f32 %v4906_v60, %v7051_v59  ;;  %v5001_v35 = vmul.f32 %v4906_v60, %v7052_v24  ;;  %v7055_v44 = vld [vmem:[#allocation18_spill] sm:$0xff]  ;;  %v5017_v59 = vmul.f32 %v7056_v26, %v4906_v60  ;;  %v7057_v52 = vld [vmem:[#allocation28_spill] sm:$0xff]  ;;  %v1367_v2 = vrot.slane %v4973_v56, 2 }
  0xda   : > { %7038 = vst [vmem:[#allocation84_spill] sm:$0xff] %v4943_v36  ;;  %7040 = vst [vmem:[#allocation85_spill] sm:$0xff] %v4947_v29  ;;  %v7054_v29 = vld [vmem:[#allocation25_spill] sm:$0xff]  ;;  %v5013_v7 = vmul.f32 %v7055_v44, %v4906_v60  ;;  %v5021_v53 = vmul.f32 %v4906_v60, %v7057_v52  ;;  %v7059_v41 = vld [vmem:[#allocation31_spill] sm:$0xff]  ;;  %v1369_v23 = vrot.slane %v4977_v11, 2  ;;  %v1372_v13 = vrot.slane %v4985_v19, 2 }
  0xdb   : > { %7044 = vst [vmem:[#allocation9_spill] sm:$0xff] %v4955_v22  ;;  %7046 = vst [vmem:[#allocation12_spill] sm:$0xff] %v4959_v21  ;;  %v7053_v21 = vld [vmem:[#allocation24_spill] sm:$0xff]  ;;  %v5009_v36 = vmul.f32 %v4906_v60, %v7054_v29  ;;  %v7058_v24 = vld [vmem:[#allocation29_spill] sm:$0xff]  ;;  %v5029_v29 = vmul.f32 %v4906_v60, %v7059_v41  ;;  %v1375_v30 = vrot.slane %v4993_v1, 2  ;;  %v1379_v56 = vrot.slane %v5001_v35, 2 }
  0xdc   : > { %v5005_v22 = vmul.f32 %v4906_v60, %v7053_v21  ;;  %v5025_v21 = vmul.f32 %v4906_v60, %v7058_v24  ;;  %v7060_v32 = vld [vmem:[#allocation32_spill] sm:$0xff]  ;;  %v7061_v17 = vld [vmem:[#allocation23_spill] sm:$0xff]  ;;  %v7062_v6 = vld [vmem:[#allocation26_spill] sm:$0xff]  ;;  %v1387_v11 = vrot.slane %v5021_v53, 2 }
  0xdd   : > { %v5033_v44 = vmul.f32 %v4906_v60, %v7060_v32  ;;  %v5037_v26 = vmul.f32 %v7061_v17, %v4906_v60  ;;  %v5041_v52 = vmul.f32 %v7062_v6, %v4906_v60  ;;  %v7063_v10 = vld [vmem:[#allocation33_spill] sm:$0xff]  ;;  %v7064_v63 = vld [vmem:[#allocation35_spill] sm:$0xff]  ;;  %v7065_v46 = vld [vmem:[#allocation36_spill] sm:$0xff]  ;;  %v1390_v19 = vrot.slane %v5029_v29, 2 }
  0xde   : > { %v5045_v24 = vmul.f32 %v4906_v60, %v7063_v10  ;;  %v5049_v41 = vmul.f32 %v4906_v60, %v7064_v63  ;;  %v5053_v32 = vmul.f32 %v4906_v60, %v7065_v46  ;;  %v7066_v57 = vld [vmem:[#allocation37_spill] sm:$0xff]  ;;  %v7067_v33 = vld [vmem:[#allocation27_spill] sm:$0xff]  ;;  %v7068_v25 = vld [vmem:[#allocation30_spill] sm:$0xff] }
  0xdf   : > { %v5057_v17 = vmul.f32 %v4906_v60, %v7066_v57  ;;  %v5061_v6 = vmul.f32 %v7067_v33, %v4906_v60  ;;  %v5065_v10 = vmul.f32 %v7068_v25, %v4906_v60  ;;  %v7069_v28 = vld [vmem:[#allocation40_spill] sm:$0xff]  ;;  %v7070_v40 = vld [vmem:[#allocation41_spill] sm:$0xff]  ;;  %v7073_v27 = vld [vmem:[#allocation34_spill] sm:$0xff]  ;;  %v1394_v1 = vrot.slane %v5037_v26, 2 }
  0xe0   : > { %v5069_v63 = vmul.f32 %v4906_v60, %v7069_v28  ;;  %v5073_v46 = vmul.f32 %v4906_v60, %v7070_v40  ;;  %v7071_v45 = vld [vmem:[#allocation44_spill] sm:$0xff]  ;;  %v7072_v54 = vld [vmem:[#allocation45_spill] sm:$0xff]  ;;  %v5085_v25 = vmul.f32 %v7073_v27, %v4906_v60  ;;  %v7074_v5 = vld [vmem:[#allocation38_spill] sm:$0xff]  ;;  %v1395_v35 = vrot.slane %v5041_v52, 2 }
  0xe1   : > { %v5077_v57 = vmul.f32 %v4906_v60, %v7071_v45  ;;  %v5081_v33 = vmul.f32 %v4906_v60, %v7072_v54  ;;  %v5089_v28 = vmul.f32 %v7074_v5, %v4906_v60  ;;  %v7075_v4 = vld [vmem:[#allocation48_spill] sm:$0xff]  ;;  %v7076_v39 = vld [vmem:[#allocation49_spill] sm:$0xff]  ;;  %v7077_v62 = vld [vmem:[#allocation50_spill] sm:$0xff]  ;;  %v1362_v5 = vrot.slane %v1265_v61, 2 }
  0xe2   : > { %v5093_v40 = vmul.f32 %v4906_v60, %v7075_v4  ;;  %v5097_v45 = vmul.f32 %v4906_v60, %v7076_v39  ;;  %v5101_v54 = vmul.f32 %v4906_v60, %v7077_v62  ;;  %v7078_v8 = vld [vmem:[#allocation51_spill] sm:$0xff]  ;;  %v7080_v4 = vld [vmem:[#allocation42_spill] sm:$0xff]  ;;  %v7081_v39 = vld [vmem:[#allocation52_spill] sm:$0xff]  ;;  %v1400_v53 = vrot.slane %v5053_v32, 2 }
  0xe3   : > { %v5105_v27 = vmul.f32 %v4906_v60, %v7078_v8  ;;  %v7079_v43 = vld [vmem:[#allocation39_spill] sm:$0xff]  ;;  %v5113_v20 = vmul.f32 %v7080_v4, %v4906_v60  ;;  %v5117_v47 = vmul.f32 %v4906_v60, %v7081_v39  ;;  %v7082_v62 = vld [vmem:[#allocation53_spill] sm:$0xff]  ;;  %v7083_v8 = vld [vmem:[#allocation54_spill] sm:$0xff] }
  0xe4   : > { %v5109_v38 = vmul.f32 %v7079_v43, %v4906_v60  ;;  %v5121_v55 = vmul.f32 %v4906_v60, %v7082_v62  ;;  %v5125_v34 = vmul.f32 %v4906_v60, %v7083_v8  ;;  %v7084_v18 = vld [vmem:[#allocation55_spill] sm:$0xff]  ;;  %v7086_v42 = vld [vmem:[#allocation46_spill] sm:$0xff]  ;;  %v7087_v15 = vld [vmem:[#allocation56_spill] sm:$0xff]  ;;  %v1365_v8 = vrot.slane %v4969_v49, 2 }
  0xe5   : > { %v5129_v61 = vmul.f32 %v4906_v60, %v7084_v18  ;;  %v7085_v43 = vld [vmem:[#allocation43_spill] sm:$0xff]  ;;  %v5137_v39 = vmul.f32 %v7086_v42, %v4906_v60  ;;  %v5141_v62 = vmul.f32 %v4906_v60, %v7087_v15  ;;  %v5147_v18 = vsel %vm802_vm2, %v1359_v3, %v1360_v0 }
  0xe6   : > { %v5133_v4 = vmul.f32 %v7085_v43, %v4906_v60  ;;  %v5150_v43 = vsel %vm802_vm2, %v1360_v0, %v1362_v5  ;;  %v1370_v42 = vrot.slane %v4981_v51, 2  ;;  %v1374_v60 = vrot.slane %v4989_v12, 2 }
  0xe7   : > { %v1377_v49 = vrot.slane %v4997_v58, 2  ;;  %v1380_v3 = vrot.slane %v5005_v22, 2  ;;  %v1382_v15 = vrot.slane %v5009_v36, 2  ;;  %v1384_v0 = vrot.slane %v5013_v7, 2 }
  0xe8   : > { %v1385_v5 = vrot.slane %v5017_v59, 2  ;;  %v1389_v51 = vrot.slane %v5025_v21, 2  ;;  %v1392_v12 = vrot.slane %v5033_v44, 2  ;;  %v1397_v22 = vrot.slane %v5045_v24, 2 }
  0xe9   : > { %v1366_v36 = vsel %vm802_vm2, %v1364_v14, %v1365_v8  ;;  %v1368_v7 = vsel %vm802_vm2, %v1365_v8, %v1367_v2  ;;  %v1399_v59 = vrot.slane %v5049_v41, 2  ;;  %v1371_v21 = vsel %vm802_vm2, %v1369_v23, %v1370_v42 }
  0xea   : > { %v1373_v29 = vsel %vm802_vm2, %v1370_v42, %v1372_v13  ;;  %v1376_v44 = vsel %vm802_vm2, %v1374_v60, %v1375_v30  ;;  %v1378_v26 = vsel %vm802_vm2, %v1375_v30, %v1377_v49  ;;  %v1381_v52 = vsel %vm802_vm2, %v1379_v56, %v1380_v3 }
  0xeb   : > { %v1383_v58 = vsel %vm802_vm2, %v1380_v3, %v1382_v15  ;;  %v1386_v14 = vsel %vm802_vm2, %v1384_v0, %v1385_v5  ;;  %v1388_v2 = vsel %vm802_vm2, %v1385_v5, %v1387_v11  ;;  %v1391_v8 = vsel %vm802_vm2, %v1389_v51, %v1390_v19 }
  0xec   : > { %v1393_v32 = vsel %vm802_vm2, %v1390_v19, %v1392_v12  ;;  %v1396_v23 = vsel %vm802_vm2, %v1394_v1, %v1395_v35  ;;  %v1398_v13 = vsel %vm802_vm2, %v1395_v35, %v1397_v22  ;;  %v1401_v42 = vsel %vm802_vm2, %v1399_v59, %v1400_v53 }
  0xed   : > { %v1402_v41 = vrot.slane %v5057_v17, 2  ;;  %v1404_v24 = vrot.slane %v5061_v6, 2  ;;  %v1405_v15 = vrot.slane %v5065_v10, 2  ;;  %v1407_v60 = vrot.slane %v5069_v63, 2 }
  0xee   : > { %v1409_v30 = vrot.slane %v5073_v46, 2  ;;  %v1410_v49 = vrot.slane %v5077_v57, 2  ;;  %v1412_v56 = vrot.slane %v5081_v33, 2  ;;  %v1414_v3 = vrot.slane %v5085_v25, 2 }
  0xef   : > { %v1415_v0 = vrot.slane %v5089_v28, 2  ;;  %v1417_v5 = vrot.slane %v5093_v40, 2  ;;  %v1419_v17 = vrot.slane %v5097_v45, 2  ;;  %v1420_v6 = vrot.slane %v5101_v54, 2 }
  0xf0   : > { %v1422_v10 = vrot.slane %v5105_v27, 2  ;;  %v1424_v63 = vrot.slane %v5109_v38, 2  ;;  %v1425_v46 = vrot.slane %v5113_v20, 2  ;;  %v1427_v57 = vrot.slane %v5117_v47, 2 }
  0xf1   : > { %v1429_v33 = vrot.slane %v5121_v55, 2  ;;  %v1430_v25 = vrot.slane %v5125_v34, 2  ;;  %v1432_v28 = vrot.slane %v5129_v61, 2  ;;  %v1403_v40 = vsel %vm802_vm2, %v1400_v53, %v1402_v41 }
  0xf2   : > { %v1434_v45 = vrot.slane %v5133_v4, 2  ;;  %v1435_v54 = vrot.slane %v5137_v39, 2  ;;  %v1437_v27 = vrot.slane %v5141_v62, 2  ;;  %v1406_v38 = vsel %vm802_vm2, %v1404_v24, %v1405_v15 }
  0xf3   : > { %v1408_v20 = vsel %vm802_vm2, %v1405_v15, %v1407_v60  ;;  %v1411_v47 = vsel %vm802_vm2, %v1409_v30, %v1410_v49  ;;  %v1413_v55 = vsel %vm802_vm2, %v1410_v49, %v1412_v56  ;;  %v1416_v34 = vsel %vm802_vm2, %v1414_v3, %v1415_v0  ;;  %v7088_v15 = vld [vmem:[#allocation63_spill] sm:$0xff] }
  0xf4   : > { %v1418_v61 = vsel %vm802_vm2, %v1415_v0, %v1417_v5  ;;  %v1421_v11 = vsel %vm802_vm2, %v1419_v17, %v1420_v6  ;;  %v1423_v4 = vsel %vm802_vm2, %v1420_v6, %v1422_v10  ;;  %v1426_v39 = vsel %vm802_vm2, %v1424_v63, %v1425_v46 }
  0xf5   : > { %v1428_v62 = vsel %vm802_vm2, %v1425_v46, %v1427_v57  ;;  %v1431_v51 = vsel %vm802_vm2, %v1429_v33, %v1430_v25  ;;  %v1433_v19 = vsel %vm802_vm2, %v1430_v25, %v1432_v28  ;;  %v1436_v12 = vsel %vm802_vm2, %v1434_v45, %v1435_v54  ;;  %v7106_v57 = vld [vmem:[#allocation81_spill] sm:$0xff]  ;;  %v7108_v25 = vld [vmem:[#allocation82_spill] sm:$0xff] }
  0xf6   : > { %v1438_v1 = vsel %vm802_vm2, %v1435_v54, %v1437_v27  ;;  %v5226_v35 = vadd.f32 %v5147_v18, %v4821_v37  ;;  %v5230_v22 = vadd.f32 %v5150_v43, %v4825_v31  ;;  %v5233_v59 = vadd.f32 %v1366_v36, %v4828_v9  ;;  %v7089_v37 = vld [vmem:[#allocation64_spill] sm:$0xff]  ;;  %v7090_v31 = vld [vmem:[#allocation65_spill] sm:$0xff]  ;;  %v7091_v9 = vld [vmem:[#allocation66_spill] sm:$0xff] }
  0xf7   : > { %v5236_v53 = vadd.f32 %v1368_v7, %v4831_v50  ;;  %v5239_v41 = vadd.f32 %v1371_v21, %v4834_v16  ;;  %v5242_v24 = vadd.f32 %v1373_v29, %v4837_v48  ;;  %v5245_v60 = vadd.f32 %v1376_v44, %v7088_v15  ;;  %v7092_v50 = vld [vmem:[#allocation67_spill] sm:$0xff]  ;;  %v7093_v16 = vld [vmem:[#allocation68_spill] sm:$0xff]  ;;  %v7094_v48 = vld [vmem:[#allocation69_spill] sm:$0xff] }
  0xf8   : > { %v5248_v18 = vadd.f32 %v1378_v26, %v7089_v37  ;;  %v5251_v43 = vadd.f32 %v1381_v52, %v7090_v31  ;;  %v5254_v36 = vadd.f32 %v1383_v58, %v7091_v9  ;;  %v5257_v7 = vadd.f32 %v1386_v14, %v7092_v50  ;;  %v7095_v44 = vld [vmem:[#allocation70_spill] sm:$0xff]  ;;  %v7096_v26 = vld [vmem:[#allocation71_spill] sm:$0xff]  ;;  %v7097_v52 = vld [vmem:[#allocation72_spill] sm:$0xff] }
  0xf9   : > { %v5260_v21 = vadd.f32 %v1388_v2, %v7093_v16  ;;  %v5263_v29 = vadd.f32 %v1391_v8, %v7094_v48  ;;  %v5266_v30 = vadd.f32 %v1393_v32, %v7095_v44  ;;  %v5269_v49 = vadd.f32 %v1396_v23, %v7096_v26  ;;  %v7098_v58 = vld [vmem:[#allocation73_spill] sm:$0xff]  ;;  %v7099_v14 = vld [vmem:[#allocation3_spill] sm:$0xff]  ;;  %v7100_v2 = vld [vmem:[#allocation74_spill] sm:$0xff] }
  0xfa   : > { %v5272_v56 = vadd.f32 %v1398_v13, %v7097_v52  ;;  %v5275_v3 = vadd.f32 %v1401_v42, %v7098_v58  ;;  %v5278_v0 = vadd.f32 %v1403_v40, %v7099_v14  ;;  %v5281_v5 = vadd.f32 %v1406_v38, %v7100_v2  ;;  %v7101_v8 = vld [vmem:[#allocation75_spill] sm:$0xff]  ;;  %v7102_v32 = vld [vmem:[#allocation76_spill] sm:$0xff]  ;;  %v7103_v23 = vld [vmem:[#allocation77_spill] sm:$0xff] }
  0xfb   : > { %v5284_v17 = vadd.f32 %v1408_v20, %v7101_v8  ;;  %v5287_v6 = vadd.f32 %v1411_v47, %v7102_v32  ;;  %v5290_v10 = vadd.f32 %v1413_v55, %v7103_v23  ;;  %v7104_v13 = vld [vmem:[#allocation79_spill] sm:$0xff]  ;;  %v7105_v42 = vld [vmem:[#allocation80_spill] sm:$0xff]  ;;  %v5299_v33 = vadd.f32 %v1421_v11, %v7106_v57  ;;  %v7112_v54 = vld [vmem:[#allocation6_spill] sm:$0xff] }
  0xfc   : > { %v5293_v63 = vadd.f32 %v1416_v34, %v7104_v13  ;;  %v5296_v46 = vadd.f32 %v1418_v61, %v7105_v42  ;;  %v5302_v28 = vadd.f32 %v1423_v4, %v7108_v25  ;;  %v7110_v40 = vld [vmem:[#allocation83_spill] sm:$0xff]  ;;  %v5308_v27 = vadd.f32 %v1428_v62, %v7112_v54  ;;  %v7114_v38 = vld [vmem:[#allocation5_spill] sm:$0xff]  ;;  %v7118_v34 = vld [vmem:[#allocation4_spill] sm:$0xff] }
  0xfd   : > { %7107 = vst [vmem:[#allocation13_spill] sm:$0xff] %v5299_v33  ;;  %v5305_v45 = vadd.f32 %v1426_v39, %v7110_v40  ;;  %v5311_v20 = vadd.f32 %v1431_v51, %v7114_v38  ;;  %v7116_v47 = vld [vmem:[#allocation7_spill] sm:$0xff]  ;;  %v5317_v61 = vadd.f32 %v1436_v12, %v7118_v34  ;;  %v7122_v4 = vld [vmem:[#allocation60_spill] sm:$0xff]  ;;  %v7124_v39 = vld [vmem:[#allocation10_spill] sm:$0xff] }
  0xfe   : > { %7109 = vst [vmem:[#allocation63_spill] sm:$0xff] %v5302_v28  ;;  %7113 = vst [vmem:[#allocation65_spill] sm:$0xff] %v5308_v27  ;;  %v5314_v55 = vadd.f32 %v1433_v19, %v7116_v47  ;;  %v7120_v11 = vld [vmem:[#allocation59_spill] sm:$0xff]  ;;  %v7123_v37 = vld [vmem:[#allocation8_spill] sm:$0xff]  ;;  %v1508_v9 = vmul.f32 %v7124_v39, %v7122_v4 }
  0xff   : > { %7111 = vst [vmem:[#allocation64_spill] sm:$0xff] %v5305_v45  ;;  %7115 = vst [vmem:[#allocation66_spill] sm:$0xff] %v5311_v20  ;;  %v5320_v15 = vadd.f32 %v1438_v1, %v7120_v11  ;;  %v1507_v31 = vmul.f32 %v7123_v37, %v7122_v4  ;;  %v7125_v62 = vld [vmem:[#allocation16_spill] sm:$0xff]  ;;  %v7126_v51 = vld [vmem:[#allocation17_spill] sm:$0xff] }
 0x100   : > { %7117 = vst [vmem:[#allocation67_spill] sm:$0xff] %v5314_v55  ;;  %7119 = vst [vmem:[#allocation68_spill] sm:$0xff] %v5317_v61  ;;  %v1509_v50 = vmul.f32 %v7122_v4, %v7125_v62  ;;  %v1510_v16 = vmul.f32 %v7122_v4, %v7126_v51  ;;  %v7127_v19 = vld [vmem:[#allocation11_spill] sm:$0xff]  ;;  %v7128_v12 = vld [vmem:[#allocation14_spill] sm:$0xff] }
 0x101   : > { %7121 = vst [vmem:[#allocation69_spill] sm:$0xff] %v5320_v15  ;;  %v1511_v48 = vmul.f32 %v7127_v19, %v7122_v4  ;;  %v1512_v44 = vmul.f32 %v7128_v12, %v7122_v4  ;;  %v7129_v1 = vld [vmem:[#allocation21_spill] sm:$0xff]  ;;  %v7130_v52 = vld [vmem:[#allocation24_spill] sm:$0xff]  ;;  %v7131_v14 = vld [vmem:[#allocation18_spill] sm:$0xff] }
 0x102   : > { %v1513_v26 = vmul.f32 %v7122_v4, %v7129_v1  ;;  %v1514_v58 = vmul.f32 %v7122_v4, %v7130_v52  ;;  %v1515_v2 = vmul.f32 %v7131_v14, %v7122_v4  ;;  %v7132_v8 = vld [vmem:[#allocation22_spill] sm:$0xff]  ;;  %v7133_v23 = vld [vmem:[#allocation29_spill] sm:$0xff]  ;;  %v7134_v42 = vld [vmem:[#allocation31_spill] sm:$0xff] }
 0x103   : > { %v1516_v32 = vmul.f32 %v7132_v8, %v7122_v4  ;;  %v1517_v13 = vmul.f32 %v7122_v4, %v7133_v23  ;;  %v1518_v57 = vmul.f32 %v7122_v4, %v7134_v42  ;;  %v7135_v25 = vld [vmem:[#allocation23_spill] sm:$0xff]  ;;  %v7136_v54 = vld [vmem:[#allocation26_spill] sm:$0xff]  ;;  %v7138_v11 = vld [vmem:[#allocation36_spill] sm:$0xff] }
 0x104   : > { %v1519_v40 = vmul.f32 %v7135_v25, %v7122_v4  ;;  %v1520_v38 = vmul.f32 %v7136_v54, %v7122_v4  ;;  %v7137_v47 = vld [vmem:[#allocation35_spill] sm:$0xff]  ;;  %v1522_v14 = vmul.f32 %v7122_v4, %v7138_v11  ;;  %v7140_v23 = vld [vmem:[#allocation30_spill] sm:$0xff]  ;;  %v7141_v12 = vld [vmem:[#allocation41_spill] sm:$0xff] }
 0x105   : > { %v1521_v34 = vmul.f32 %v7122_v4, %v7137_v47  ;;  %v7139_v8 = vld [vmem:[#allocation27_spill] sm:$0xff]  ;;  %v1524_v1 = vmul.f32 %v7140_v23, %v7122_v4  ;;  %v1525_v42 = vmul.f32 %v7122_v4, %v7141_v12  ;;  %v7142_v19 = vld [vmem:[#allocation44_spill] sm:$0xff]  ;;  %v7143_v54 = vld [vmem:[#allocation34_spill] sm:$0xff] }
 0x106   : > { %v1523_v52 = vmul.f32 %v7139_v8, %v7122_v4  ;;  %v1526_v25 = vmul.f32 %v7122_v4, %v7142_v19  ;;  %v1527_v51 = vmul.f32 %v7143_v54, %v7122_v4  ;;  %v7144_v47 = vld [vmem:[#allocation38_spill] sm:$0xff]  ;;  %v7145_v39 = vld [vmem:[#allocation49_spill] sm:$0xff]  ;;  %v7147_v23 = vld [vmem:[#allocation39_spill] sm:$0xff] }
 0x107   : > { %v1528_v62 = vmul.f32 %v7144_v47, %v7122_v4  ;;  %v1529_v11 = vmul.f32 %v7122_v4, %v7145_v39  ;;  %v7146_v37 = vld [vmem:[#allocation50_spill] sm:$0xff]  ;;  %v1531_v15 = vmul.f32 %v7147_v23, %v7122_v4  ;;  %v7149_v55 = vld [vmem:[#allocation53_spill] sm:$0xff]  ;;  %v7151_v47 = vld [vmem:[#allocation43_spill] sm:$0xff] }
 0x108   : > { %v1530_v8 = vmul.f32 %v7122_v4, %v7146_v37  ;;  %v7148_v12 = vld [vmem:[#allocation42_spill] sm:$0xff]  ;;  %v1533_v19 = vmul.f32 %v7122_v4, %v7149_v55  ;;  %v1535_v27 = vmul.f32 %v7151_v47, %v7122_v4  ;;  %v7153_v28 = vld [vmem:[#allocation57_spill] sm:$0xff]  ;;  %v5390_v55 = vadd.f32 %v1508_v9, %v5230_v22 }
 0x109   : > { %v1532_v61 = vmul.f32 %v7148_v12, %v7122_v4  ;;  %v7150_v20 = vld [vmem:[#allocation54_spill] sm:$0xff]  ;;  %v1537_v37 = vmul.f32 %v7122_v4, %v7153_v28  ;;  %v5387_v12 = vadd.f32 %v1507_v31, %v5226_v35  ;;  %v5396_v47 = vadd.f32 %v1510_v16, %v5236_v53 }
 0x10a   : > { %v1534_v54 = vmul.f32 %v7122_v4, %v7150_v20  ;;  %v7152_v39 = vld [vmem:[#allocation46_spill] sm:$0xff]  ;;  %v5393_v20 = vadd.f32 %v1509_v50, %v5233_v59  ;;  %v5402_v28 = vadd.f32 %v1512_v44, %v5242_v24  ;;  %v5408_v35 = vadd.f32 %v1514_v58, %v5248_v18  ;;  %v7192_v58 = vld [vmem:[#allocation15_spill] sm:$0xff] }
 0x10b   : > { %v1536_v45 = vmul.f32 %v7152_v39, %v7122_v4  ;;  %v7154_v33 = vld [vmem:[#allocation58_spill] sm:$0xff]  ;;  %v5399_v39 = vadd.f32 %v1511_v48, %v5239_v41  ;;  %v5411_v22 = vadd.f32 %v1515_v2, %v5251_v43  ;;  %v5414_v59 = vadd.f32 %v1516_v32, %v5254_v36 }
 0x10c   : > { %v1538_v23 = vmul.f32 %v7122_v4, %v7154_v33  ;;  %v5405_v4 = vadd.f32 %v1513_v26, %v5245_v60  ;;  %7156 = vst [vmem:[#allocation71_spill] sm:$0xff] %v5408_v35  ;;  %v5417_v53 = vadd.f32 %v1517_v13, %v5257_v7  ;;  %v5420_v41 = vadd.f32 %v1518_v57, %v5260_v21 }
 0x10d   : > { %7157 = vst [vmem:[#allocation72_spill] sm:$0xff] %v5411_v22  ;;  %7158 = vst [vmem:[#allocation73_spill] sm:$0xff] %v5414_v59  ;;  %v5423_v24 = vadd.f32 %v1519_v40, %v5263_v29  ;;  %v5426_v60 = vadd.f32 %v1520_v38, %v5266_v30  ;;  %v5429_v18 = vadd.f32 %v1521_v34, %v5269_v49  ;;  %v7200_v34 = vld [vmem:[#allocation24_spill] sm:$0xff] }
 0x10e   : > { %7155 = vst [vmem:[#allocation70_spill] sm:$0xff] %v5405_v4  ;;  %7159 = vst [vmem:[#allocation3_spill] sm:$0xff] %v5417_v53  ;;  %v5432_v43 = vadd.f32 %v1522_v14, %v5272_v56  ;;  %v5435_v36 = vadd.f32 %v1523_v52, %v5275_v3  ;;  %v5438_v7 = vadd.f32 %v1524_v1, %v5278_v0  ;;  %v7173_v0 = vld [vmem:[#allocation13_spill] sm:$0xff]  ;;  %v7190_v1 = vld [vmem:[#allocation8_spill] sm:$0xff] }
 0x10f   : > { %7160 = vst [vmem:[#allocation74_spill] sm:$0xff] %v5420_v41  ;;  %7161 = vst [vmem:[#allocation75_spill] sm:$0xff] %v5423_v24  ;;  %v5441_v21 = vadd.f32 %v1525_v42, %v5281_v5  ;;  %v5444_v29 = vadd.f32 %v1526_v25, %v5284_v17  ;;  %v5447_v30 = vadd.f32 %v1527_v51, %v5287_v6  ;;  %v7175_v5 = vld [vmem:[#allocation63_spill] sm:$0xff]  ;;  %v7177_v17 = vld [vmem:[#allocation64_spill] sm:$0xff] }
 0x110   : > { %7162 = vst [vmem:[#allocation76_spill] sm:$0xff] %v5426_v60  ;;  %7163 = vst [vmem:[#allocation77_spill] sm:$0xff] %v5429_v18  ;;  %v5450_v49 = vadd.f32 %v1528_v62, %v5290_v10  ;;  %v5453_v56 = vadd.f32 %v1529_v11, %v5293_v63  ;;  %v5456_v3 = vadd.f32 %v1530_v8, %v5296_v46  ;;  %v7179_v6 = vld [vmem:[#allocation65_spill] sm:$0xff]  ;;  %v7181_v10 = vld [vmem:[#allocation66_spill] sm:$0xff] }
 0x111   : > { %7164 = vst [vmem:[#allocation79_spill] sm:$0xff] %v5432_v43  ;;  %7165 = vst [vmem:[#allocation80_spill] sm:$0xff] %v5435_v36  ;;  %v5459_v31 = vadd.f32 %v1531_v15, %v7173_v0  ;;  %v5462_v9 = vadd.f32 %v1532_v61, %v7175_v5  ;;  %v5465_v50 = vadd.f32 %v1533_v19, %v7177_v17  ;;  %v7183_v63 = vld [vmem:[#allocation67_spill] sm:$0xff]  ;;  %v7185_v46 = vld [vmem:[#allocation68_spill] sm:$0xff] }
 0x112   : > { %7166 = vst [vmem:[#allocation81_spill] sm:$0xff] %v5438_v7  ;;  %7167 = vst [vmem:[#allocation82_spill] sm:$0xff] %v5441_v21  ;;  %v5468_v51 = vadd.f32 %v1534_v54, %v7179_v6  ;;  %v5471_v62 = vadd.f32 %v1535_v27, %v7181_v10  ;;  %v5474_v16 = vadd.f32 %v1536_v45, %v7183_v63  ;;  %v7187_v15 = vld [vmem:[#allocation69_spill] sm:$0xff]  ;;  %v7191_v19 = vld [vmem:[#allocation10_spill] sm:$0xff] }
 0x113   : > { %7168 = vst [vmem:[#allocation83_spill] sm:$0xff] %v5444_v29  ;;  %7169 = vst [vmem:[#allocation6_spill] sm:$0xff] %v5447_v30  ;;  %v5477_v48 = vadd.f32 %v1537_v37, %v7185_v46  ;;  %v5480_v44 = vadd.f32 %v1538_v23, %v7187_v15  ;;  %v7189_v61 = vld [vmem:[#allocation61_spill] sm:$0xff]  ;;  %v7193_v27 = vld [vmem:[#allocation16_spill] sm:$0xff] }
 0x114   : > { %7170 = vst [vmem:[#allocation5_spill] sm:$0xff] %v5450_v49  ;;  %7171 = vst [vmem:[#allocation7_spill] sm:$0xff] %v5453_v56  ;;  %v1575_v26 = vmul.f32 %v7190_v1, %v7189_v61  ;;  %v1576_v52 = vmul.f32 %v7191_v19, %v7189_v61  ;;  %v1577_v14 = vmul.f32 %v7189_v61, %v7192_v58  ;;  %v7194_v45 = vld [vmem:[#allocation17_spill] sm:$0xff]  ;;  %v7195_v8 = vld [vmem:[#allocation19_spill] sm:$0xff] }
 0x115   : > { %7172 = vst [vmem:[#allocation4_spill] sm:$0xff] %v5456_v3  ;;  %7174 = vst [vmem:[#allocation59_spill] sm:$0xff] %v5459_v31  ;;  %v5490_v2 = vmul.f32 %v7189_v61, %v7193_v27  ;;  %v5494_v37 = vmul.f32 %v7189_v61, %v7194_v45  ;;  %v5498_v32 = vmul.f32 %v7189_v61, %v7195_v8  ;;  %v7196_v23 = vld [vmem:[#allocation11_spill] sm:$0xff]  ;;  %v7197_v42 = vld [vmem:[#allocation14_spill] sm:$0xff] }
 0x116   : > { %7176 = vst [vmem:[#allocation60_spill] sm:$0xff] %v5462_v9  ;;  %7178 = vst [vmem:[#allocation13_spill] sm:$0xff] %v5465_v50  ;;  %v5502_v13 = vmul.f32 %v7196_v23, %v7189_v61  ;;  %v5506_v57 = vmul.f32 %v7197_v42, %v7189_v61  ;;  %v7198_v25 = vld [vmem:[#allocation20_spill] sm:$0xff]  ;;  %v7199_v54 = vld [vmem:[#allocation21_spill] sm:$0xff]  ;;  %v5518_v11 = vmul.f32 %v7189_v61, %v7200_v34  ;;  %v1671_v7 = vrot.slane %v1575_v26, 1 }
 0x117   : > { %7180 = vst [vmem:[#allocation63_spill] sm:$0xff] %v5468_v51  ;;  %7182 = vst [vmem:[#allocation64_spill] sm:$0xff] %v5471_v62  ;;  %v5510_v40 = vmul.f32 %v7189_v61, %v7198_v25  ;;  %v5514_v38 = vmul.f32 %v7189_v61, %v7199_v54  ;;  %v7201_v0 = vld [vmem:[#allocation25_spill] sm:$0xff]  ;;  %v7202_v17 = vld [vmem:[#allocation18_spill] sm:$0xff]  ;;  %v1672_v36 = vrot.slane %v1576_v52, 1  ;;  %v1677_v22 = vrot.slane %v5494_v37, 1 }
 0x118   : > { %7184 = vst [vmem:[#allocation65_spill] sm:$0xff] %v5474_v16  ;;  %7186 = vst [vmem:[#allocation66_spill] sm:$0xff] %v5477_v48  ;;  %v5522_v5 = vmul.f32 %v7189_v61, %v7201_v0  ;;  %v5526_v6 = vmul.f32 %v7202_v17, %v7189_v61  ;;  %v7203_v10 = vld [vmem:[#allocation22_spill] sm:$0xff]  ;;  %v7204_v46 = vld [vmem:[#allocation28_spill] sm:$0xff]  ;;  %v1682_v4 = vrot.slane %v5506_v57, 1 }
 0x119   : > { %7188 = vst [vmem:[#allocation67_spill] sm:$0xff] %v5480_v44  ;;  %v5530_v63 = vmul.f32 %v7203_v10, %v7189_v61  ;;  %v5534_v15 = vmul.f32 %v7189_v61, %v7204_v46  ;;  %v7205_v1 = vld [vmem:[#allocation29_spill] sm:$0xff]  ;;  %v7206_v58 = vld [vmem:[#allocation31_spill] sm:$0xff]  ;;  %v7207_v45 = vld [vmem:[#allocation32_spill] sm:$0xff]  ;;  %v5673_v35 = vsel %vm557_vm1, %v1671_v7, %v1672_v36 }
 0x11a   : > { %v5538_v19 = vmul.f32 %v7189_v61, %v7205_v1  ;;  %v5542_v27 = vmul.f32 %v7189_v61, %v7206_v58  ;;  %v5546_v17 = vmul.f32 %v7189_v61, %v7207_v45  ;;  %v7208_v0 = vld [vmem:[#allocation23_spill] sm:$0xff]  ;;  %v7209_v34 = vld [vmem:[#allocation26_spill] sm:$0xff]  ;;  %v7210_v54 = vld [vmem:[#allocation33_spill] sm:$0xff]  ;;  %v1691_v37 = vrot.slane %v5526_v6, 1 }
 0x11b   : > { %v5550_v10 = vmul.f32 %v7208_v0, %v7189_v61  ;;  %v5554_v46 = vmul.f32 %v7209_v34, %v7189_v61  ;;  %v5558_v1 = vmul.f32 %v7189_v61, %v7210_v54  ;;  %v7211_v25 = vld [vmem:[#allocation35_spill] sm:$0xff]  ;;  %v7212_v42 = vld [vmem:[#allocation36_spill] sm:$0xff]  ;;  %v7213_v23 = vld [vmem:[#allocation37_spill] sm:$0xff]  ;;  %v1692_v7 = vrot.slane %v5530_v63, 1 }
 0x11c   : > { %v5562_v58 = vmul.f32 %v7189_v61, %v7211_v25  ;;  %v5566_v45 = vmul.f32 %v7189_v61, %v7212_v42  ;;  %v5570_v0 = vmul.f32 %v7189_v61, %v7213_v23  ;;  %v7214_v8 = vld [vmem:[#allocation27_spill] sm:$0xff]  ;;  %v7215_v44 = vld [vmem:[#allocation30_spill] sm:$0xff]  ;;  %v7216_v48 = vld [vmem:[#allocation40_spill] sm:$0xff] }
 0x11d   : > { %v5574_v34 = vmul.f32 %v7214_v8, %v7189_v61  ;;  %v5578_v54 = vmul.f32 %v7215_v44, %v7189_v61  ;;  %v5582_v25 = vmul.f32 %v7189_v61, %v7216_v48  ;;  %v7217_v16 = vld [vmem:[#allocation41_spill] sm:$0xff]  ;;  %v7218_v62 = vld [vmem:[#allocation44_spill] sm:$0xff]  ;;  %v7220_v50 = vld [vmem:[#allocation34_spill] sm:$0xff]  ;;  %v1701_v57 = vrot.slane %v5550_v10, 1 }
 0x11e   : > { %v5586_v42 = vmul.f32 %v7189_v61, %v7217_v16  ;;  %v5590_v23 = vmul.f32 %v7189_v61, %v7218_v62  ;;  %v7219_v51 = vld [vmem:[#allocation45_spill] sm:$0xff]  ;;  %v5598_v44 = vmul.f32 %v7220_v50, %v7189_v61  ;;  %v7221_v9 = vld [vmem:[#allocation38_spill] sm:$0xff]  ;;  %v7222_v31 = vld [vmem:[#allocation48_spill] sm:$0xff]  ;;  %v1709_v6 = vrot.slane %v5570_v0, 1 }
 0x11f   : > { %v5594_v8 = vmul.f32 %v7189_v61, %v7219_v51  ;;  %v5602_v48 = vmul.f32 %v7221_v9, %v7189_v61  ;;  %v5606_v16 = vmul.f32 %v7189_v61, %v7222_v31  ;;  %v7223_v3 = vld [vmem:[#allocation49_spill] sm:$0xff]  ;;  %v7224_v56 = vld [vmem:[#allocation50_spill] sm:$0xff]  ;;  %v7225_v49 = vld [vmem:[#allocation51_spill] sm:$0xff] }
 0x120   : > { %v5610_v62 = vmul.f32 %v7189_v61, %v7223_v3  ;;  %v5614_v51 = vmul.f32 %v7189_v61, %v7224_v56  ;;  %v5618_v50 = vmul.f32 %v7189_v61, %v7225_v49  ;;  %v7226_v30 = vld [vmem:[#allocation39_spill] sm:$0xff]  ;;  %v7227_v29 = vld [vmem:[#allocation42_spill] sm:$0xff]  ;;  %v7228_v21 = vld [vmem:[#allocation52_spill] sm:$0xff]  ;;  %v1674_v56 = vrot.slane %v1577_v14, 1 }
 0x121   : > { %v5622_v9 = vmul.f32 %v7226_v30, %v7189_v61  ;;  %v5626_v31 = vmul.f32 %v7227_v29, %v7189_v61  ;;  %v5630_v3 = vmul.f32 %v7189_v61, %v7228_v21  ;;  %v7229_v43 = vld [vmem:[#allocation53_spill] sm:$0xff]  ;;  %v7230_v49 = vld [vmem:[#allocation54_spill] sm:$0xff]  ;;  %v7231_v30 = vld [vmem:[#allocation55_spill] sm:$0xff] }
 0x122   : > { %v5634_v18 = vmul.f32 %v7189_v61, %v7229_v43  ;;  %v5638_v60 = vmul.f32 %v7189_v61, %v7230_v49  ;;  %v5642_v24 = vmul.f32 %v7189_v61, %v7231_v30  ;;  %v7232_v29 = vld [vmem:[#allocation43_spill] sm:$0xff]  ;;  %v7233_v26 = vld [vmem:[#allocation46_spill] sm:$0xff]  ;;  %v7234_v14 = vld [vmem:[#allocation56_spill] sm:$0xff]  ;;  %v5662_v30 = vmul.f32 %v7189_v61, %v7154_v33 }
 0x123   : > { %v5646_v41 = vmul.f32 %v7232_v29, %v7189_v61  ;;  %v5650_v52 = vmul.f32 %v7233_v26, %v7189_v61  ;;  %v5654_v43 = vmul.f32 %v7189_v61, %v7234_v14  ;;  %v7235_v21 = vld [vmem:[#allocation57_spill] sm:$0xff]  ;;  %v7236_v53 = vld [vmem:[#allocation47_spill] sm:$0xff]  ;;  %v1676_v26 = vrot.slane %v5490_v2, 1 }
 0x124   : > { %v5658_v49 = vmul.f32 %v7189_v61, %v7235_v21  ;;  %v7237_v59 = vunpack.c.l.bf16 %v7236_v53  ;;  %v1679_v14 = vrot.slane %v5498_v32, 1  ;;  %v5676_v21 = vsel %vm557_vm1, %v1672_v36, %v1674_v56 }
 0x125   : > { %v1681_v33 = vrot.slane %v5502_v13, 1  ;;  %v1684_v53 = vrot.slane %v5510_v40, 1  ;;  %v1689_v2 = vrot.slane %v5522_v5, 1  ;;  %v1694_v32 = vrot.slane %v5534_v15, 1 }
 0x126   : > { %v5667_v29 = vmul.f32 %v7189_v61, %v7237_v59  ;;  %v1686_v59 = vrot.slane %v5514_v38, 1  ;;  %v1687_v61 = vrot.slane %v5518_v11, 1  ;;  %v1696_v36 = vrot.slane %v5538_v19, 1 }
 0x127   : > { %v1697_v56 = vrot.slane %v5542_v27, 1  ;;  %v1699_v13 = vrot.slane %v5546_v17, 1  ;;  %v1702_v40 = vrot.slane %v5554_v46, 1  ;;  %v1704_v38 = vrot.slane %v5558_v1, 1 }
 0x128   : > { %v1706_v11 = vrot.slane %v5562_v58, 1  ;;  %v1707_v5 = vrot.slane %v5566_v45, 1  ;;  %v1678_v63 = vsel %vm557_vm1, %v1676_v26, %v1677_v22  ;;  %v1680_v15 = vsel %vm557_vm1, %v1677_v22, %v1679_v14 }
 0x129   : > { %v1711_v19 = vrot.slane %v5574_v34, 1  ;;  %v1712_v17 = vrot.slane %v5578_v54, 1  ;;  %v1683_v10 = vsel %vm557_vm1, %v1681_v33, %v1682_v4  ;;  %v1685_v46 = vsel %vm557_vm1, %v1682_v4, %v1684_v53 }
 0x12a   : > { %v1688_v1 = vsel %vm557_vm1, %v1686_v59, %v1687_v61  ;;  %v1690_v58 = vsel %vm557_vm1, %v1687_v61, %v1689_v2  ;;  %v1693_v27 = vsel %vm557_vm1, %v1691_v37, %v1692_v7  ;;  %v1695_v0 = vsel %vm557_vm1, %v1692_v7, %v1694_v32 }
 0x12b   : > { %v1698_v45 = vsel %vm557_vm1, %v1696_v36, %v1697_v56  ;;  %v1700_v22 = vsel %vm557_vm1, %v1697_v56, %v1699_v13  ;;  %v1703_v34 = vsel %vm557_vm1, %v1701_v57, %v1702_v40  ;;  %v1705_v54 = vsel %vm557_vm1, %v1702_v40, %v1704_v38 }
 0x12c   : > { %v1708_v33 = vsel %vm557_vm1, %v1706_v11, %v1707_v5  ;;  %v1710_v4 = vsel %vm557_vm1, %v1707_v5, %v1709_v6  ;;  %v1713_v53 = vsel %vm557_vm1, %v1711_v19, %v1712_v17  ;;  %v1714_v26 = vrot.slane %v5582_v25, 1 }
 0x12d   : > { %v1716_v14 = vrot.slane %v5586_v42, 1  ;;  %v1717_v59 = vrot.slane %v5590_v23, 1  ;;  %v1719_v61 = vrot.slane %v5594_v8, 1  ;;  %v1721_v2 = vrot.slane %v5598_v44, 1 }
 0x12e   : > { %v1722_v37 = vrot.slane %v5602_v48, 1  ;;  %v1724_v7 = vrot.slane %v5606_v16, 1  ;;  %v1726_v32 = vrot.slane %v5610_v62, 1  ;;  %v1727_v36 = vrot.slane %v5614_v51, 1 }
 0x12f   : > { %v1729_v56 = vrot.slane %v5618_v50, 1  ;;  %v1731_v25 = vrot.slane %v5622_v9, 1  ;;  %v1732_v42 = vrot.slane %v5626_v31, 1  ;;  %v1734_v23 = vrot.slane %v5630_v3, 1 }
 0x130   : > { %v1736_v8 = vrot.slane %v5634_v18, 1  ;;  %v1737_v44 = vrot.slane %v5638_v60, 1  ;;  %v1739_v48 = vrot.slane %v5642_v24, 1  ;;  %v1741_v16 = vrot.slane %v5646_v41, 1 }
 0x131   : > { %v1742_v62 = vrot.slane %v5650_v52, 1  ;;  %v1744_v51 = vrot.slane %v5654_v43, 1  ;;  %v1715_v50 = vsel %vm557_vm1, %v1712_v17, %v1714_v26  ;;  %v1746_v9 = vrot.slane %v5658_v49, 1 }
 0x132   : > { %v1747_v31 = vrot.slane %v5662_v30, 1  ;;  %v1749_v3 = vrot.slane %v5667_v29, 1  ;;  %v1718_v18 = vsel %vm557_vm1, %v1716_v14, %v1717_v59  ;;  %v1720_v60 = vsel %vm557_vm1, %v1717_v59, %v1719_v61  ;;  %v7238_v59 = vld [vmem:[#allocation70_spill] sm:$0xff] }
 0x133   : > { %v1723_v24 = vsel %vm557_vm1, %v1721_v2, %v1722_v37  ;;  %v1725_v41 = vsel %vm557_vm1, %v1722_v37, %v1724_v7  ;;  %v1728_v52 = vsel %vm557_vm1, %v1726_v32, %v1727_v36  ;;  %v1730_v43 = vsel %vm557_vm1, %v1727_v36, %v1729_v56 }
 0x134   : > { %v1733_v13 = vsel %vm557_vm1, %v1731_v25, %v1732_v42  ;;  %v1735_v49 = vsel %vm557_vm1, %v1732_v42, %v1734_v23  ;;  %v1738_v30 = vsel %vm557_vm1, %v1736_v8, %v1737_v44  ;;  %v1740_v29 = vsel %vm557_vm1, %v1737_v44, %v1739_v48  ;;  %v7266_v48 = vld [vmem:[#allocation59_spill] sm:$0xff] }
 0x135   : > { %v1743_v57 = vsel %vm557_vm1, %v1741_v16, %v1742_v62  ;;  %v1745_v40 = vsel %vm557_vm1, %v1742_v62, %v1744_v51  ;;  %v1748_v38 = vsel %vm557_vm1, %v1746_v9, %v1747_v31  ;;  %v1750_v11 = vsel %vm557_vm1, %v1747_v31, %v1749_v3  ;;  %v7268_v62 = vld [vmem:[#allocation60_spill] sm:$0xff]  ;;  %v7272_v31 = vld [vmem:[#allocation63_spill] sm:$0xff] }
 0x136   : > { %v5752_v5 = vadd.f32 %v5673_v35, %v5387_v12  ;;  %v5756_v6 = vadd.f32 %v5676_v21, %v5390_v55  ;;  %v5759_v19 = vadd.f32 %v1678_v63, %v5393_v20  ;;  %v5762_v17 = vadd.f32 %v1680_v15, %v5396_v47  ;;  %v7239_v12 = vld [vmem:[#allocation71_spill] sm:$0xff]  ;;  %v7240_v55 = vld [vmem:[#allocation72_spill] sm:$0xff]  ;;  %v7241_v20 = vld [vmem:[#allocation73_spill] sm:$0xff] }
 0x137   : > { %v5765_v26 = vadd.f32 %v1683_v10, %v5399_v39  ;;  %v5768_v14 = vadd.f32 %v1685_v46, %v5402_v28  ;;  %v5771_v61 = vadd.f32 %v1688_v1, %v7238_v59  ;;  %v5774_v35 = vadd.f32 %v1690_v58, %v7239_v12  ;;  %v7242_v47 = vld [vmem:[#allocation3_spill] sm:$0xff]  ;;  %v7243_v39 = vld [vmem:[#allocation74_spill] sm:$0xff]  ;;  %v7245_v1 = vld [vmem:[#allocation76_spill] sm:$0xff] }
 0x138   : > { %v5777_v21 = vadd.f32 %v1693_v27, %v7240_v55  ;;  %v5780_v63 = vadd.f32 %v1695_v0, %v7241_v20  ;;  %v5783_v15 = vadd.f32 %v1698_v45, %v7242_v47  ;;  %v5786_v10 = vadd.f32 %v1700_v22, %v7243_v39  ;;  %v7244_v28 = vld [vmem:[#allocation75_spill] sm:$0xff]  ;;  %v7246_v58 = vld [vmem:[#allocation77_spill] sm:$0xff]  ;;  %v7250_v0 = vld [vmem:[#allocation80_spill] sm:$0xff] }
 0x139   : > { %v5789_v46 = vadd.f32 %v1703_v34, %v7244_v28  ;;  %v5792_v2 = vadd.f32 %v1705_v54, %v7245_v1  ;;  %v5795_v37 = vadd.f32 %v1708_v33, %v7246_v58  ;;  %v7248_v27 = vld [vmem:[#allocation79_spill] sm:$0xff]  ;;  %v5801_v32 = vadd.f32 %v1713_v53, %v7250_v0  ;;  %v7252_v45 = vld [vmem:[#allocation81_spill] sm:$0xff]  ;;  %v7254_v22 = vld [vmem:[#allocation82_spill] sm:$0xff] }
 0x13a   : > { %v5798_v7 = vadd.f32 %v1710_v4, %v7248_v27  ;;  %v5804_v36 = vadd.f32 %v1715_v50, %v7252_v45  ;;  %v5807_v56 = vadd.f32 %v1718_v18, %v7254_v22  ;;  %v7256_v34 = vld [vmem:[#allocation83_spill] sm:$0xff]  ;;  %v7258_v54 = vld [vmem:[#allocation6_spill] sm:$0xff]  ;;  %v7260_v33 = vld [vmem:[#allocation5_spill] sm:$0xff]  ;;  %v5825_v16 = vadd.f32 %v1733_v13, %v7266_v48 }
 0x13b   : > { %7247 = vst [vmem:[#allocation68_spill] sm:$0xff] %v5795_v37  ;;  %7251 = vst [vmem:[#allocation61_spill] sm:$0xff] %v5801_v32  ;;  %v5810_v25 = vadd.f32 %v1720_v60, %v7256_v34  ;;  %v5813_v42 = vadd.f32 %v1723_v24, %v7258_v54  ;;  %v5816_v23 = vadd.f32 %v1725_v41, %v7260_v33  ;;  %v7262_v4 = vld [vmem:[#allocation7_spill] sm:$0xff]  ;;  %v7264_v53 = vld [vmem:[#allocation4_spill] sm:$0xff] }
 0x13c   : > { %7249 = vst [vmem:[#allocation69_spill] sm:$0xff] %v5798_v7  ;;  %7253 = vst [vmem:[#allocation8_spill] sm:$0xff] %v5804_v36  ;;  %v5819_v8 = vadd.f32 %v1728_v52, %v7262_v4  ;;  %v5822_v44 = vadd.f32 %v1730_v43, %v7264_v53  ;;  %v5828_v51 = vadd.f32 %v1735_v49, %v7268_v62  ;;  %v7270_v50 = vld [vmem:[#allocation13_spill] sm:$0xff]  ;;  %v7274_v18 = vld [vmem:[#allocation64_spill] sm:$0xff] }
 0x13d   : > { %7255 = vst [vmem:[#allocation10_spill] sm:$0xff] %v5807_v56  ;;  %7257 = vst [vmem:[#allocation15_spill] sm:$0xff] %v5810_v25  ;;  %v5831_v9 = vadd.f32 %v1738_v30, %v7270_v50  ;;  %v5834_v3 = vadd.f32 %v1740_v29, %v7272_v31  ;;  %v5837_v60 = vadd.f32 %v1743_v57, %v7274_v18  ;;  %v7276_v24 = vld [vmem:[#allocation65_spill] sm:$0xff]  ;;  %v7278_v52 = vld [vmem:[#allocation66_spill] sm:$0xff] }
 0x13e   : > { %7259 = vst [vmem:[#allocation16_spill] sm:$0xff] %v5813_v42  ;;  %7261 = vst [vmem:[#allocation17_spill] sm:$0xff] %v5816_v23  ;;  %v5840_v41 = vadd.f32 %v1745_v40, %v7276_v24  ;;  %v5843_v43 = vadd.f32 %v1748_v38, %v7278_v52  ;;  %v7280_v13 = vld [vmem:[#allocation67_spill] sm:$0xff]  ;;  %v7283_v12 = vld [vmem:[#allocation78_spill] sm:$0xff] }
 0x13f   : > { %7263 = vst [vmem:[#allocation70_spill] sm:$0xff] %v5819_v8  ;;  %7265 = vst [vmem:[#allocation71_spill] sm:$0xff] %v5822_v44  ;;  %v5846_v59 = vadd.f32 %v1750_v11, %v7280_v13  ;;  %v7282_v49 = vld [vmem:[#allocation19_spill] sm:$0xff]  ;;  %v7285_v57 = vld [vmem:[#allocation14_spill] sm:$0xff] }
 0x140   : > { %7267 = vst [vmem:[#allocation72_spill] sm:$0xff] %v5825_v16  ;;  %7269 = vst [vmem:[#allocation73_spill] sm:$0xff] %v5828_v51  ;;  %v5850_v55 = vmul.f32 %v7283_v12, %v7282_v49  ;;  %v7284_v30 = vld [vmem:[#allocation11_spill] sm:$0xff]  ;;  %v5858_v20 = vmul.f32 %v7285_v57, %v7283_v12  ;;  %v7286_v40 = vld [vmem:[#allocation20_spill] sm:$0xff] }
 0x141   : > { %7271 = vst [vmem:[#allocation3_spill] sm:$0xff] %v5831_v9  ;;  %7273 = vst [vmem:[#allocation74_spill] sm:$0xff] %v5834_v3  ;;  %v5854_v29 = vmul.f32 %v7284_v30, %v7283_v12  ;;  %v1827_v47 = vmul.f32 %v7283_v12, %v7286_v40  ;;  %v7287_v38 = vld [vmem:[#allocation21_spill] sm:$0xff]  ;;  %v7288_v11 = vld [vmem:[#allocation24_spill] sm:$0xff] }
 0x142   : > { %7275 = vst [vmem:[#allocation75_spill] sm:$0xff] %v5837_v60  ;;  %7277 = vst [vmem:[#allocation76_spill] sm:$0xff] %v5840_v41  ;;  %v1828_v39 = vmul.f32 %v7283_v12, %v7287_v38  ;;  %v5866_v28 = vmul.f32 %v7283_v12, %v7288_v11  ;;  %v7289_v1 = vld [vmem:[#allocation25_spill] sm:$0xff]  ;;  %v7290_v27 = vld [vmem:[#allocation18_spill] sm:$0xff] }
 0x143   : > { %7279 = vst [vmem:[#allocation77_spill] sm:$0xff] %v5843_v43  ;;  %7281 = vst [vmem:[#allocation79_spill] sm:$0xff] %v5846_v59  ;;  %v5870_v58 = vmul.f32 %v7283_v12, %v7289_v1  ;;  %v5874_v0 = vmul.f32 %v7290_v27, %v7283_v12  ;;  %v7291_v45 = vld [vmem:[#allocation22_spill] sm:$0xff]  ;;  %v7292_v34 = vld [vmem:[#allocation28_spill] sm:$0xff] }
 0x144   : > { %v5878_v22 = vmul.f32 %v7291_v45, %v7283_v12  ;;  %v5882_v54 = vmul.f32 %v7283_v12, %v7292_v34  ;;  %v7293_v33 = vld [vmem:[#allocation29_spill] sm:$0xff]  ;;  %v7294_v53 = vld [vmem:[#allocation31_spill] sm:$0xff]  ;;  %v7295_v62 = vld [vmem:[#allocation32_spill] sm:$0xff] }
 0x145   : > { %v5886_v4 = vmul.f32 %v7283_v12, %v7293_v33  ;;  %v5890_v48 = vmul.f32 %v7283_v12, %v7294_v53  ;;  %v5894_v50 = vmul.f32 %v7283_v12, %v7295_v62  ;;  %v7296_v31 = vld [vmem:[#allocation23_spill] sm:$0xff]  ;;  %v7297_v24 = vld [vmem:[#allocation26_spill] sm:$0xff]  ;;  %v7298_v13 = vld [vmem:[#allocation33_spill] sm:$0xff] }
 0x146   : > { %v5898_v18 = vmul.f32 %v7296_v31, %v7283_v12  ;;  %v5902_v52 = vmul.f32 %v7297_v24, %v7283_v12  ;;  %v5906_v49 = vmul.f32 %v7283_v12, %v7298_v13  ;;  %v7299_v30 = vld [vmem:[#allocation35_spill] sm:$0xff]  ;;  %v7300_v40 = vld [vmem:[#allocation36_spill] sm:$0xff]  ;;  %v7301_v11 = vld [vmem:[#allocation37_spill] sm:$0xff] }
 0x147   : > { %v5910_v57 = vmul.f32 %v7283_v12, %v7299_v30  ;;  %v5914_v38 = vmul.f32 %v7283_v12, %v7300_v40  ;;  %v5918_v1 = vmul.f32 %v7283_v12, %v7301_v11  ;;  %v7302_v27 = vld [vmem:[#allocation27_spill] sm:$0xff]  ;;  %v7303_v34 = vld [vmem:[#allocation30_spill] sm:$0xff]  ;;  %v7304_v53 = vld [vmem:[#allocation40_spill] sm:$0xff] }
 0x148   : > { %v5922_v45 = vmul.f32 %v7302_v27, %v7283_v12  ;;  %v5926_v33 = vmul.f32 %v7303_v34, %v7283_v12  ;;  %v5930_v62 = vmul.f32 %v7283_v12, %v7304_v53  ;;  %v7305_v31 = vld [vmem:[#allocation41_spill] sm:$0xff]  ;;  %v7306_v13 = vld [vmem:[#allocation44_spill] sm:$0xff]  ;;  %v7308_v27 = vld [vmem:[#allocation34_spill] sm:$0xff] }
 0x149   : > { %v5934_v24 = vmul.f32 %v7283_v12, %v7305_v31  ;;  %v5938_v30 = vmul.f32 %v7283_v12, %v7306_v13  ;;  %v7307_v40 = vld [vmem:[#allocation45_spill] sm:$0xff]  ;;  %v5946_v34 = vmul.f32 %v7308_v27, %v7283_v12  ;;  %v7309_v59 = vld [vmem:[#allocation38_spill] sm:$0xff]  ;;  %v7310_v43 = vld [vmem:[#allocation48_spill] sm:$0xff] }
 0x14a   : > { %v5942_v11 = vmul.f32 %v7283_v12, %v7307_v40  ;;  %v5950_v53 = vmul.f32 %v7309_v59, %v7283_v12  ;;  %v5954_v31 = vmul.f32 %v7283_v12, %v7310_v43  ;;  %v7311_v41 = vld [vmem:[#allocation49_spill] sm:$0xff]  ;;  %v7312_v60 = vld [vmem:[#allocation50_spill] sm:$0xff]  ;;  %v7313_v3 = vld [vmem:[#allocation51_spill] sm:$0xff] }
 0x14b   : > { %v5958_v13 = vmul.f32 %v7283_v12, %v7311_v41  ;;  %v5962_v40 = vmul.f32 %v7283_v12, %v7312_v60  ;;  %v5966_v27 = vmul.f32 %v7283_v12, %v7313_v3  ;;  %v7314_v9 = vld [vmem:[#allocation39_spill] sm:$0xff]  ;;  %v7315_v51 = vld [vmem:[#allocation42_spill] sm:$0xff]  ;;  %v7317_v16 = vld [vmem:[#allocation52_spill] sm:$0xff] }
 0x14c   : > { %v5970_v59 = vmul.f32 %v7314_v9, %v7283_v12  ;;  %v5974_v43 = vmul.f32 %v7315_v51, %v7283_v12  ;;  %v5978_v41 = vmul.f32 %v7283_v12, %v7317_v16  ;;  %v7319_v44 = vld [vmem:[#allocation53_spill] sm:$0xff]  ;;  %v7321_v8 = vld [vmem:[#allocation62_spill] sm:$0xff]  ;;  %v7322_v3 = vld [vmem:[#allocation84_spill] sm:$0xff] }
 0x14d   : > { %v5982_v60 = vmul.f32 %v7283_v12, %v7319_v44  ;;  %v1915_v23 = vrot.slane %v7321_v8, 2  ;;  %v1916_v42 = vrot.slane %v7322_v3, 2  ;;  %v7323_v25 = vld [vmem:[#allocation85_spill] sm:$0xff]  ;;  %v7324_v9 = vld [vmem:[#allocation54_spill] sm:$0xff]  ;;  %v7326_v51 = vld [vmem:[#allocation55_spill] sm:$0xff] }
 0x14e   : > { %7316 = vst [vmem:[#allocation80_spill] sm:$0xff] %v5974_v43  ;;  %7318 = vst [vmem:[#allocation81_spill] sm:$0xff] %v5978_v41  ;;  %v1918_v56 = vrot.slane %v7323_v25, 2  ;;  %v5989_v36 = vmul.f32 %v7283_v12, %v7324_v9  ;;  %v5993_v32 = vmul.f32 %v7283_v12, %v7326_v51  ;;  %v7328_v16 = vld [vmem:[#allocation43_spill] sm:$0xff]  ;;  %v7330_v44 = vld [vmem:[#allocation46_spill] sm:$0xff]  ;;  %v1923_v41 = vrot.slane %v5850_v55, 2 }
 0x14f   : > { %7320 = vst [vmem:[#allocation82_spill] sm:$0xff] %v5982_v60  ;;  %v5997_v7 = vmul.f32 %v7328_v16, %v7283_v12  ;;  %v6001_v37 = vmul.f32 %v7330_v44, %v7283_v12  ;;  %v7332_v8 = vld [vmem:[#allocation9_spill] sm:$0xff]  ;;  %v7333_v60 = vld [vmem:[#allocation12_spill] sm:$0xff]  ;;  %v1925_v9 = vrot.slane %v5854_v29, 2  ;;  %v1928_v51 = vrot.slane %v1827_v47, 2 }
 0x150   : > { %7325 = vst [vmem:[#allocation83_spill] sm:$0xff] %v5989_v36  ;;  %7327 = vst [vmem:[#allocation6_spill] sm:$0xff] %v5993_v32  ;;  %v1920_v3 = vrot.slane %v7332_v8, 2  ;;  %v1921_v25 = vrot.slane %v7333_v60, 2  ;;  %v1926_v36 = vrot.slane %v5858_v20, 2  ;;  %v1930_v32 = vrot.slane %v1828_v39, 2 }
 0x151   : > { %7329 = vst [vmem:[#allocation5_spill] sm:$0xff] %v5997_v7  ;;  %7331 = vst [vmem:[#allocation7_spill] sm:$0xff] %v6001_v37  ;;  %v1931_v43 = vrot.slane %v5866_v28, 2  ;;  %v7334_v16 = vld [vmem:[#allocation56_spill] sm:$0xff]  ;;  %v7336_v44 = vld [vmem:[#allocation57_spill] sm:$0xff]  ;;  %v1917_v60 = vsel %vm802_vm2, %v1915_v23, %v1916_v42  ;;  %v1919_v55 = vsel %vm802_vm2, %v1916_v42, %v1918_v56  ;;  %v1933_v29 = vrot.slane %v5870_v58, 2 }
 0x152   : > { %v6011_v7 = vmul.f32 %v7283_v12, %v7334_v16  ;;  %v6015_v37 = vmul.f32 %v7283_v12, %v7336_v44  ;;  %v1935_v20 = vrot.slane %v5874_v0, 2  ;;  %v1936_v47 = vrot.slane %v5878_v22, 2  ;;  %v7337_v28 = vld [vmem:[#allocation58_spill] sm:$0xff]  ;;  %v7338_v16 = vld [vmem:[#allocation47_spill] sm:$0xff] }
 0x153   : > { %v1938_v39 = vrot.slane %v5882_v54, 2  ;;  %v6025_v8 = vmul.f32 %v7283_v12, %v7337_v28  ;;  %v1922_v23 = vsel %vm802_vm2, %v1920_v3, %v1921_v25  ;;  %v1924_v56 = vsel %vm802_vm2, %v1921_v25, %v1923_v41 }
 0x154   : > { %7335 = vst [vmem:[#allocation4_spill] sm:$0xff] %v6011_v7  ;;  %v7339_v7 = vunpack.c.l.bf16 %v7338_v16  ;;  %v1927_v42 = vsel %vm802_vm2, %v1925_v9, %v1926_v36  ;;  %v1929_v58 = vsel %vm802_vm2, %v1926_v36, %v1928_v51  ;;  %v1932_v0 = vsel %vm802_vm2, %v1930_v32, %v1931_v43 }
 0x155   : > { %v2027_v22 = vadd.f32 %v1917_v60, %v5752_v5  ;;  %v1940_v54 = vrot.slane %v5886_v4, 2  ;;  %v1941_v28 = vrot.slane %v5890_v48, 2  ;;  %v1943_v16 = vrot.slane %v5894_v50, 2 }
 0x156   : > { %v6030_v44 = vmul.f32 %v7283_v12, %v7339_v7  ;;  %v2028_v7 = vadd.f32 %v1919_v55, %v5756_v6  ;;  %v6045_v12 = vld [vmem:[%s6509_s2] ss:$0 sm:$0xff]  ;;  %v1934_v41 = vsel %vm802_vm2, %v1931_v43, %v1933_v29  ;;  %v1937_v36 = vsel %vm802_vm2, %v1935_v20, %v1936_v47 }
 0x157   : > { %v1939_v32 = vsel %vm802_vm2, %v1936_v47, %v1938_v39  ;;  %v2029_v5 = vadd.f32 %v1922_v23, %v5759_v19  ;;  %v1945_v4 = vrot.slane %v5898_v18, 2  ;;  %v1946_v48 = vrot.slane %v5902_v52, 2 }
 0x158   : > { %v1948_v50 = vrot.slane %v5906_v49, 2  ;;  %v2030_v6 = vadd.f32 %v1924_v56, %v5762_v17  ;;  %v1950_v3 = vrot.slane %v5910_v57, 2  ;;  %v1951_v25 = vrot.slane %v5914_v38, 2 }
 0x159   : > { %v2031_v43 = vadd.f32 %v1927_v42, %v5765_v26  ;;  %v6059_v9 = vadd.f32 %v6045_v12, %v2027_v22  ;;  %v1942_v51 = vsel %vm802_vm2, %v1940_v54, %v1941_v28  ;;  %v1953_v19 = vrot.slane %v5918_v1, 2 }
 0x15a   : > { %v2032_v18 = vadd.f32 %v1929_v58, %v5768_v14  ;;  %v6065_v52 = vadd.f32 %v6045_v12, %v2028_v7  ;;  %v1944_v17 = vsel %vm802_vm2, %v1941_v28, %v1943_v16  ;;  %v1955_v49 = vrot.slane %v5922_v45, 2 }
 0x15b   : > { %v1956_v57 = vrot.slane %v5926_v33, 2  ;;  %v6071_v26 = vadd.f32 %v6045_v12, %v2029_v5  ;;  %v1947_v38 = vsel %vm802_vm2, %v1945_v4, %v1946_v48  ;;  %v1958_v60 = vrot.slane %v5930_v62, 2 }
 0x15c   : > { %v2033_v1 = vadd.f32 %v1932_v0, %v5771_v61  ;;  %v6077_v14 = vadd.f32 %v6045_v12, %v2030_v6  ;;  %v1949_v55 = vsel %vm802_vm2, %v1946_v48, %v1948_v50  ;;  %v1952_v29 = vsel %vm802_vm2, %v1950_v3, %v1951_v25 }
 0x15d   : > { %v6082_v45 = vadd.f32 %v6045_v12, %v2031_v43  ;;  %v2798_v33 = vmul.f32 -1.442695, %v6059_v9  ;;  %v6086_v20 = vsel %vm802_vm2, %v1951_v25, %v1953_v19  ;;  %v2034_v47 = vadd.f32 %v1934_v41, %v5774_v35  ;;  %v7340_v43 = vld [vmem:[#allocation80_spill] sm:$0xff]  ;;  %v7341_v19 = vld [vmem:[#allocation81_spill] sm:$0xff] }
 0x15e   : > { %v6090_v62 = vadd.f32 %v6045_v12, %v2032_v18  ;;  %v2799_v61 = vmul.f32 -1.442695, %v6065_v52  ;;  %v6094_v39 = vsel %vm802_vm2, %v1955_v49, %v1956_v57  ;;  %v1960_v23 = vrot.slane %v5934_v24, 2 }
 0x15f   : > { %v1961_v56 = vrot.slane %v5938_v30, 2  ;;  %v2800_v42 = vmul.f32 -1.442695, %v6071_v26  ;;  %v6100_v58 = vsel %vm802_vm2, %v1956_v57, %v1958_v60  ;;  %v2035_v0 = vadd.f32 %v1937_v36, %v5777_v21 }
 0x160   : > { %v6104_v35 = vadd.f32 %v6045_v12, %v2033_v1  ;;  %v2801_v22 = vmul.f32 -1.442695, %v6077_v14  ;;  %v1963_v54 = vrot.slane %v5942_v11, 2  ;;  %v2036_v28 = vadd.f32 %v1939_v32, %v5780_v63 }
 0x161   : > { %3134 = vpow2.f32 %v2798_v33  ;;  %v2802_v24 = vmul.f32 -1.442695, %v6082_v45  ;;  %v2037_v30 = vadd.f32 %v1942_v51, %v5783_v15  ;;  %v6112_v16 = vadd.f32 %v6045_v12, %v2034_v47  ;;  %v7343_v47 = vld [vmem:[#allocation68_spill] sm:$0xff] }
 0x162   : > { %3136 = vpow2.f32 %v2799_v61  ;;  %v2803_v21 = vmul.f32 -1.442695, %v6090_v62  ;;  %v6116_v7 = vsel %vm802_vm2, %v1960_v23, %v1961_v56  ;;  %v1965_v41 = vrot.slane %v5946_v34, 2 }
 0x163   : > { %v2038_v11 = vadd.f32 %v1944_v17, %v5786_v10  ;;  %3138 = vpow2.f32 %v2800_v42  ;;  %v2039_v63 = vadd.f32 %v1947_v38, %v5789_v46  ;;  %v6122_v36 = vadd.f32 %v6045_v12, %v2035_v0  ;;  %v7344_v0 = vld [vmem:[#allocation83_spill] sm:$0xff] }
 0x164   : > { %3140 = vpow2.f32 %v2801_v22  ;;  %v2804_v15 = vmul.f32 -1.442695, %v6104_v35  ;;  %v1966_v32 = vrot.slane %v5950_v53, 2  ;;  %v2040_v5 = vadd.f32 %v1949_v55, %v5792_v2  ;;  %v7342_v55 = vld [vmem:[#allocation82_spill] sm:$0xff] }
 0x165   : > { %v6128_v4 = vadd.f32 %v6045_v12, %v2036_v28  ;;  %3142 = vpow2.f32 %v2802_v24  ;;  %v1968_v34 = vrot.slane %v5954_v31, 2  ;;  %v6132_v10 = vadd.f32 %v6045_v12, %v2037_v30  ;;  %v7345_v30 = vld [vmem:[#allocation69_spill] sm:$0xff] }
 0x166   : > { %3144 = vpow2.f32 %v2803_v21  ;;  %v2805_v46 = vmul.f32 -1.442695, %v6112_v16  ;;  %v1970_v48 = vrot.slane %v5958_v13, 2  ;;  %v1971_v50 = vrot.slane %v5962_v40, 2 }
 0x167   : > { %v1973_v53 = vrot.slane %v5966_v27, 2  ;;  %v6139_v2 = vadd.f32 %v6045_v12, %v2038_v11  ;;  %v6142_v6 = vsel %vm802_vm2, %v1961_v56, %v1963_v54  ;;  %v6145_v31 = vadd.f32 %v6045_v12, %v2039_v63  ;;  %v7346_v11 = vld [vmem:[#allocation6_spill] sm:$0xff] }
 0x168   : > { %3146 = vpow2.f32 %v2804_v15  ;;  %v2806_v3 = vmul.f32 -1.442695, %v6122_v36  ;;  %v1975_v25 = vrot.slane %v5970_v59, 2  ;;  %v1976_v13 = vrot.slane %v7340_v43, 2  ;;  %v7347_v15 = vld [vmem:[#allocation5_spill] sm:$0xff] }
 0x169   : > { %v6151_v40 = vadd.f32 %v6045_v12, %v2040_v5  ;;  %v2807_v27 = vmul.f32 -1.442695, %v6128_v4  ;;  %v6155_v51 = vsel %vm802_vm2, %v1965_v41, %v1966_v32  ;;  %v1978_v18 = vrot.slane %v7341_v19, 2 }
 0x16a   : > { %3148 = vpow2.f32 %v2805_v46  ;;  %v2808_v17 = vmul.f32 -1.442695, %v6132_v10  ;;  %v6160_v57 = vsel %vm802_vm2, %v1966_v32, %v1968_v34  ;;  %v6163_v59 = vsel %vm802_vm2, %v1970_v48, %v1971_v50  ;;  %v7348_v46 = vld [vmem:[#allocation61_spill] sm:$0xff] }
 0x16b   : > { %v3135_v49 = vpop.eup %3134  ;;  %v6166_v38 = vsel %vm802_vm2, %v1971_v50, %v1973_v53  ;;  %v2809_v60 = vmul.f32 -1.442695, %v6139_v2  ;;  %v1980_v33 = vrot.slane %v7342_v55, 2  ;;  %v2041_v61 = vadd.f32 %v1952_v29, %v7343_v47 }
 0x16c   : > { %v3137_v1 = vpop.eup %3136  ;;  %3150 = vpow2.f32 %v2806_v3  ;;  %v2810_v23 = vmul.f32 -1.442695, %v6145_v31  ;;  %v6173_v42 = vsel %vm802_vm2, %v1975_v25, %v1976_v13  ;;  %v1981_v22 = vrot.slane %v7344_v0, 2  ;;  %v7349_v3 = vld [vmem:[#allocation7_spill] sm:$0xff] }
 0x16d   : > { %v3139_v56 = vpop.eup %3138  ;;  %3152 = vpow2.f32 %v2807_v27  ;;  %v2811_v54 = vmul.f32 -1.442695, %v6151_v40  ;;  %v6178_v24 = vsel %vm802_vm2, %v1976_v13, %v1978_v18  ;;  %v2042_v21 = vadd.f32 %v6086_v20, %v7345_v30  ;;  %v7350_v27 = vld [vmem:[#allocation8_spill] sm:$0xff] }
 0x16e   : > { %v3141_v28 = vpop.eup %3140  ;;  %3154 = vpow2.f32 %v2808_v17  ;;  %v2194_v29 = vadd.f32 1.0, %v3135_v49  ;;  %v1983_v63 = vrot.slane %v7346_v11, 2  ;;  %v1985_v32 = vrot.slane %v7347_v15, 2  ;;  %v7351_v17 = vld [vmem:[#allocation4_spill] sm:$0xff] }
 0x16f   : > { %v3143_v41 = vpop.eup %3142  ;;  %3156 = vpow2.f32 %v2809_v60  ;;  %v2195_v5 = vadd.f32 1.0, %v3137_v1  ;;  %v2043_v48 = vadd.f32 %v6094_v39, %v7348_v46  ;;  %v6187_v50 = vadd.f32 %v6045_v12, %v2041_v61  ;;  %v7354_v11 = vld [vmem:[#allocation16_spill] sm:$0xff] }
 0x170   : > { %v3145_v34 = vpop.eup %3144  ;;  %3158 = vpow2.f32 %v2810_v23  ;;  %v2196_v53 = vadd.f32 1.0, %v3139_v56  ;;  %v6190_v20 = vsel %vm802_vm2, %v1980_v33, %v1981_v22  ;;  %v1986_v25 = vrot.slane %v7349_v3, 2  ;;  %v7352_v33 = vld [vmem:[#allocation10_spill] sm:$0xff] }
 0x171   : > { %3160 = vpow2.f32 %v2811_v54  ;;  %v2197_v43 = vadd.f32 1.0, %v3141_v28  ;;  %v2044_v19 = vadd.f32 %v6100_v58, %v7350_v27  ;;  %v6196_v18 = vadd.f32 %v6045_v12, %v2042_v21  ;;  %v7353_v54 = vld [vmem:[#allocation15_spill] sm:$0xff] }
 0x172   : > { %v3147_v13 = vpop.eup %3146  ;;  %v2198_v39 = vadd.f32 1.0, %v3143_v41  ;;  %3162 = vrcp.f32 %v2194_v29  ;;  %v1988_v49 = vrot.slane %v7351_v17, 2  ;;  %v1990_v60 = vrot.slane %v6015_v37, 2  ;;  %v7357_v17 = vld [vmem:[#allocation71_spill] sm:$0xff] }
 0x173   : > { %v2199_v1 = vadd.f32 1.0, %v3145_v34  ;;  %3164 = vrcp.f32 %v2195_v5  ;;  %v2045_v47 = vadd.f32 %v6116_v7, %v7352_v33  ;;  %v6203_v61 = vadd.f32 %v6045_v12, %v2043_v48  ;;  %v7355_v48 = vld [vmem:[#allocation17_spill] sm:$0xff] }
 0x174   : > { %v3149_v55 = vpop.eup %3148  ;;  %v2812_v58 = vmul.f32 -1.442695, %v6187_v50  ;;  %3166 = vrcp.f32 %v2196_v53  ;;  %v6207_v23 = vsel %vm802_vm2, %v1981_v22, %v1983_v63  ;;  %v1991_v56 = vrot.slane %v6025_v8, 2 }
 0x175   : > { %v2200_v0 = vadd.f32 1.0, %v3147_v13  ;;  %3168 = vrcp.f32 %v2197_v43  ;;  %v2046_v28 = vadd.f32 %v6142_v6, %v7353_v54  ;;  %v6213_v30 = vadd.f32 %v6045_v12, %v2044_v19 }
 0x176   : > { %v3151_v37 = vpop.eup %3150  ;;  %v2813_v7 = vmul.f32 -1.442695, %v6196_v18  ;;  %3170 = vrcp.f32 %v2198_v39  ;;  %v6217_v29 = vsel %vm802_vm2, %v1985_v32, %v1986_v25  ;;  %v1993_v22 = vrot.slane %v6030_v44, 2 }
 0x177   : > { %v3153_v21 = vpop.eup %3152  ;;  %v2201_v41 = vadd.f32 1.0, %v3149_v55  ;;  %3172 = vrcp.f32 %v2199_v1  ;;  %v2047_v63 = vadd.f32 %v6155_v51, %v7354_v11  ;;  %v6223_v6 = vadd.f32 %v6045_v12, %v2045_v47  ;;  %v7358_v55 = vld [vmem:[#allocation72_spill] sm:$0xff] }
 0x178   : > { %v3155_v8 = vpop.eup %3154  ;;  %3174 = vpow2.f32 %v2812_v58  ;;  %v2814_v15 = vmul.f32 -1.442695, %v6203_v61  ;;  %v6227_v34 = vsel %vm802_vm2, %v1986_v25, %v1988_v49  ;;  %v6230_v32 = vsel %vm802_vm2, %v1990_v60, %v1991_v56  ;;  %v7356_v25 = vld [vmem:[#allocation70_spill] sm:$0xff] }
 0x179   : > { %v3157_v5 = vpop.eup %3156  ;;  %v2202_v44 = vadd.f32 1.0, %v3151_v37  ;;  %3176 = vrcp.f32 %v2200_v0  ;;  %v2048_v53 = vadd.f32 %v6160_v57, %v7355_v48  ;;  %v6235_v51 = vadd.f32 %v6045_v12, %v2046_v28  ;;  %v7360_v48 = vld [vmem:[#allocation3_spill] sm:$0xff] }
 0x17a   : > { %v3159_v46 = vpop.eup %3158  ;;  %3178 = vpow2.f32 %v2813_v7  ;;  %v2815_v3 = vmul.f32 -1.442695, %v6213_v30  ;;  %v6239_v13 = vsel %vm802_vm2, %v1991_v56, %v1993_v22  ;;  %v2049_v27 = vadd.f32 %v6163_v59, %v7356_v25 }
 0x17b   : > { %v3161_v43 = vpop.eup %3160  ;;  %v2203_v19 = vadd.f32 1.0, %v3153_v21  ;;  %3180 = vrcp.f32 %v2201_v41  ;;  %v2050_v49 = vadd.f32 %v6166_v38, %v7357_v17  ;;  %v6246_v57 = vadd.f32 %v6045_v12, %v2047_v63  ;;  %v7359_v41 = vld [vmem:[#allocation73_spill] sm:$0xff] }
 0x17c   : > { %v3163_v39 = vpop.eup %3162  ;;  %3182 = vpow2.f32 %v2814_v15  ;;  %v2816_v60 = vmul.f32 -1.442695, %v6223_v6  ;;  %v2051_v33 = vadd.f32 %v6173_v42, %v7358_v55  ;;  %v2204_v47 = vadd.f32 1.0, %v3155_v8 }
 0x17d   : > { %v3165_v1 = vpop.eup %3164  ;;  %3184 = vrcp.f32 %v2202_v44  ;;  %v6252_v59 = vmul.f32 %v3163_v39, %v6059_v9  ;;  %v6255_v56 = vadd.f32 %v6045_v12, %v2048_v53  ;;  %v2817_v38 = vmul.f32 -1.442695, %v6235_v51  ;;  %v7361_v39 = vld [vmem:[#allocation74_spill] sm:$0xff] }
 0x17e   : > { %v3167_v58 = vpop.eup %3166  ;;  %3186 = vpow2.f32 %v2815_v3  ;;  %v6259_v0 = vmul.f32 %v3165_v1, %v6065_v52  ;;  %v6262_v54 = vadd.f32 %v6045_v12, %v2049_v27  ;;  %v2205_v42 = vadd.f32 1.0, %v3157_v5 }
 0x17f   : > { %v3169_v37 = vpop.eup %3168  ;;  %3188 = vrcp.f32 %v2203_v19  ;;  %v6265_v28 = vmul.f32 %v3167_v58, %v6071_v26  ;;  %v2818_v7 = vmul.f32 -1.442695, %v6246_v57  ;;  %v2052_v8 = vadd.f32 %v6178_v24, %v7359_v41 }
 0x180   : > { %v3171_v9 = vpop.eup %3170  ;;  %3190 = vpow2.f32 %v2816_v60  ;;  %v6269_v21 = vmul.f32 %v3169_v37, %v6077_v14  ;;  %v2322_v52 = vadd.f32 %v6259_v0, %v6252_v59  ;;  %v6276_v11 = vadd.f32 %v6045_v12, %v2050_v49 }
 0x181   : > { %v3173_v22 = vpop.eup %3172  ;;  %v2206_v63 = vadd.f32 1.0, %v3159_v46  ;;  %3192 = vrcp.f32 %v2204_v47  ;;  %v2819_v15 = vmul.f32 -1.442695, %v6255_v56  ;;  %v6280_v5 = vmul.f32 %v3171_v9, %v6082_v45 }
 0x182   : > { %v3175_v26 = vpop.eup %3174  ;;  %3194 = vpow2.f32 %v2817_v38  ;;  %v2323_v14 = vadd.f32 %v2322_v52, %v6265_v28  ;;  %v2053_v53 = vadd.f32 %v6190_v20, %v7360_v48  ;;  %v6286_v24 = vadd.f32 %v6045_v12, %v2051_v33  ;;  %v7362_v33 = vld [vmem:[#allocation75_spill] sm:$0xff] }
 0x183   : > { %v3177_v44 = vpop.eup %3176  ;;  %v2207_v3 = vadd.f32 1.0, %v3161_v43  ;;  %3196 = vrcp.f32 %v2205_v42  ;;  %v2820_v25 = vmul.f32 -1.442695, %v6262_v54  ;;  %v6290_v27 = vmul.f32 %v3173_v22, %v6090_v62 }
 0x184   : > { %v3179_v46 = vpop.eup %3178  ;;  %3198 = vpow2.f32 %v2818_v7  ;;  %v2324_v45 = vadd.f32 %v2323_v14, %v6269_v21  ;;  %v2054_v17 = vadd.f32 %v6207_v23, %v7361_v39  ;;  %v6296_v20 = vadd.f32 %v6045_v12, %v2052_v8  ;;  %v7363_v7 = vld [vmem:[#allocation76_spill] sm:$0xff] }
 0x185   : > { %v3181_v19 = vpop.eup %3180  ;;  %v2208_v49 = vadd.f32 1.0, %v3175_v26  ;;  %3200 = vrcp.f32 %v2206_v63  ;;  %v2821_v60 = vmul.f32 -1.442695, %v6276_v11  ;;  %v6300_v1 = vmul.f32 %v3177_v44, %v6104_v35 }
 0x186   : > { %v3183_v43 = vpop.eup %3182  ;;  %3202 = vpow2.f32 %v2819_v15  ;;  %v2325_v62 = vadd.f32 %v2324_v45, %v6280_v5  ;;  %v2055_v47 = vadd.f32 %v6217_v29, %v7362_v33  ;;  %v6306_v23 = vadd.f32 %v6045_v12, %v2053_v53  ;;  %v7364_v15 = vld [vmem:[#allocation77_spill] sm:$0xff] }
 0x187   : > { %v3185_v55 = vpop.eup %3184  ;;  %v2209_v58 = vadd.f32 1.0, %v3179_v46  ;;  %3204 = vrcp.f32 %v2207_v3  ;;  %v2822_v37 = vmul.f32 -1.442695, %v6286_v24  ;;  %v6310_v42 = vmul.f32 %v3181_v19, %v6112_v16 }
 0x188   : > { %v3187_v38 = vpop.eup %3186  ;;  %3206 = vpow2.f32 %v2820_v25  ;;  %v2326_v35 = vadd.f32 %v2325_v62, %v6290_v27  ;;  %v2056_v52 = vadd.f32 %v6227_v34, %v7363_v7  ;;  %v6316_v29 = vadd.f32 %v6045_v12, %v2054_v17  ;;  %v7365_v25 = vld [vmem:[#allocation79_spill] sm:$0xff] }
 0x189   : > { %v3189_v9 = vpop.eup %3188  ;;  %v2210_v22 = vadd.f32 1.0, %v3183_v43  ;;  %3208 = vrcp.f32 %v2208_v49  ;;  %v2823_v8 = vmul.f32 -1.442695, %v6296_v20  ;;  %v6320_v63 = vmul.f32 %v3185_v55, %v6122_v36 }
 0x18a   : > { %v3191_v41 = vpop.eup %3190  ;;  %3210 = vpow2.f32 %v2821_v60  ;;  %v2327_v16 = vadd.f32 %v2326_v35, %v6300_v1  ;;  %v2057_v14 = vadd.f32 %v6230_v32, %v7364_v15  ;;  %v6326_v34 = vadd.f32 %v6045_v12, %v2055_v47 }
 0x18b   : > { %v3193_v26 = vpop.eup %3192  ;;  %v2211_v44 = vadd.f32 1.0, %v3187_v38  ;;  %3212 = vrcp.f32 %v2209_v58  ;;  %v2824_v53 = vmul.f32 -1.442695, %v6306_v23  ;;  %v6330_v3 = vmul.f32 %v3189_v9, %v6128_v4 }
 0x18c   : > { %v3195_v48 = vpop.eup %3194  ;;  %3214 = vpow2.f32 %v2822_v37  ;;  %v2328_v36 = vadd.f32 %v2327_v16, %v6310_v42  ;;  %v2058_v45 = vadd.f32 %v6239_v13, %v7365_v25  ;;  %v6336_v32 = vadd.f32 %v6045_v12, %v2056_v52 }
 0x18d   : > { %v3197_v46 = vpop.eup %3196  ;;  %v2212_v19 = vadd.f32 1.0, %v3191_v41  ;;  %3216 = vrcp.f32 %v2210_v22  ;;  %v2825_v17 = vmul.f32 -1.442695, %v6316_v29  ;;  %v6340_v49 = vmul.f32 %v3193_v26, %v6132_v10 }
 0x18e   : > { %v3199_v39 = vpop.eup %3198  ;;  %3218 = vpow2.f32 %v2823_v8  ;;  %v2329_v4 = vadd.f32 %v2328_v36, %v6320_v63  ;;  %v6344_v60 = vadd.f32 %v6045_v12, %v2057_v14  ;;  %v2213_v62 = vadd.f32 1.0, %v3195_v48 }
 0x18f   : > { %v3201_v43 = vpop.eup %3200  ;;  %3220 = vrcp.f32 %v2211_v44  ;;  %v2826_v55 = vmul.f32 -1.442695, %v6326_v34  ;;  %v6348_v33 = vmul.f32 %v3197_v46, %v6139_v2  ;;  %v6352_v10 = vadd.f32 %v6045_v12, %v2058_v45 }
 0x190   : > { %v3203_v13 = vpop.eup %3202  ;;  %3222 = vpow2.f32 %v2824_v53  ;;  %v2330_v47 = vadd.f32 %v2329_v4, %v6330_v3  ;;  %v2214_v38 = vadd.f32 1.0, %v3199_v39  ;;  %v2827_v35 = vmul.f32 -1.442695, %v6336_v32 }
 0x191   : > { %v3205_v58 = vpop.eup %3204  ;;  %3224 = vrcp.f32 %v2212_v19  ;;  %v6356_v9 = vmul.f32 %v3201_v43, %v6145_v31  ;;  %v2215_v2 = vadd.f32 1.0, %v3203_v13  ;;  %v2828_v41 = vmul.f32 -1.442695, %v6344_v60 }
 0x192   : > { %v3207_v37 = vpop.eup %3206  ;;  %3226 = vpow2.f32 %v2825_v17  ;;  %v2331_v7 = vadd.f32 %v2330_v47, %v6340_v49  ;;  %v6361_v12 = vmul.f32 %v3205_v58, %v6151_v40  ;;  %v2829_v31 = vmul.f32 -1.442695, %v6352_v10 }
 0x193   : > { %v3209_v52 = vpop.eup %3208  ;;  %3228 = vrcp.f32 %v2213_v62  ;;  %v2216_v26 = vadd.f32 1.0, %v3207_v37 }
 0x194   : > { %v3211_v22 = vpop.eup %3210  ;;  %3230 = vpow2.f32 %v2826_v55  ;;  %v2332_v8 = vadd.f32 %v2331_v7, %v6348_v33  ;;  %v6366_v14 = vmul.f32 %v3209_v52, %v6187_v50 }
 0x195   : > { %v3213_v16 = vpop.eup %3212  ;;  %3232 = vrcp.f32 %v2214_v38  ;;  %v2217_v53 = vadd.f32 1.0, %v3211_v22 }
 0x196   : > { %v3215_v15 = vpop.eup %3214  ;;  %3234 = vpow2.f32 %v2827_v35  ;;  %v2333_v44 = vadd.f32 %v2332_v8, %v6356_v9  ;;  %v6370_v40 = vmul.f32 %v3213_v16, %v6196_v18 }
 0x197   : > { %v3217_v48 = vpop.eup %3216  ;;  %3236 = vrcp.f32 %v2215_v2  ;;  %v2218_v45 = vadd.f32 1.0, %v3215_v15 }
 0x198   : > { %v3219_v36 = vpop.eup %3218  ;;  %3238 = vpow2.f32 %v2828_v41  ;;  %v2334_v46 = vadd.f32 %v2333_v44, %v6361_v12  ;;  %v6374_v50 = vmul.f32 %v3217_v48, %v6203_v61 }
 0x199   : > { %v3221_v25 = vpop.eup %3220  ;;  %3240 = vrcp.f32 %v2216_v26  ;;  %v2219_v4 = vadd.f32 1.0, %v3219_v36 }
 0x19a   : > { %v3223_v19 = vpop.eup %3222  ;;  %3242 = vpow2.f32 %v2829_v31  ;;  %v2335_v39 = vadd.f32 %v2334_v46, %v6366_v14  ;;  %v6378_v62 = vmul.f32 %v3221_v25, %v6213_v30 }
 0x19b   : > { %v3225_v17 = vpop.eup %3224  ;;  %3244 = vrcp.f32 %v2217_v53  ;;  %v2220_v55 = vadd.f32 1.0, %v3223_v19 }
 0x19c   : > { %v3227_v43 = vpop.eup %3226  ;;  %v2336_v18 = vadd.f32 %v2335_v39, %v6370_v40  ;;  %3246 = vrcp.f32 %v2218_v45  ;;  %v6382_v58 = vmul.f32 %v3225_v17, %v6223_v6 }
 0x19d   : > { %v3229_v13 = vpop.eup %3228  ;;  %v2221_v37 = vadd.f32 1.0, %v3227_v43  ;;  %3248 = vrcp.f32 %v2219_v4 }
 0x19e   : > { %v3231_v47 = vpop.eup %3230  ;;  %v2337_v61 = vadd.f32 %v2336_v18, %v6374_v50  ;;  %v6386_v7 = vmul.f32 %v3229_v13, %v6235_v51  ;;  %3250 = vrcp.f32 %v2220_v55 }
 0x19f   : > { %v3233_v38 = vpop.eup %3232  ;;  %v2222_v2 = vadd.f32 1.0, %v3231_v47  ;;  %3252 = vrcp.f32 %v2221_v37 }
 0x1a0   : > { %v3235_v35 = vpop.eup %3234  ;;  %v2338_v30 = vadd.f32 %v2337_v61, %v6378_v62  ;;  %v6390_v41 = vmul.f32 %v3233_v38, %v6246_v57 }
 0x1a1   : > { %v3237_v52 = vpop.eup %3236  ;;  %v2223_v16 = vadd.f32 1.0, %v3235_v35  ;;  %3254 = vrcp.f32 %v2222_v2 }
 0x1a2   : > { %v3239_v22 = vpop.eup %3238  ;;  %v2339_v6 = vadd.f32 %v2338_v30, %v6382_v58  ;;  %v6394_v15 = vmul.f32 %v3237_v52, %v6255_v56 }
 0x1a3   : > { %v3241_v8 = vpop.eup %3240  ;;  %v2224_v44 = vadd.f32 1.0, %v3239_v22  ;;  %3256 = vrcp.f32 %v2223_v16 }
 0x1a4   : > { %v3243_v26 = vpop.eup %3242  ;;  %v2340_v51 = vadd.f32 %v2339_v6, %v6386_v7  ;;  %v6398_v48 = vmul.f32 %v3241_v8, %v6262_v54 }
 0x1a5   : > { %v3245_v31 = vpop.eup %3244  ;;  %v2225_v36 = vadd.f32 1.0, %v3243_v26  ;;  %3258 = vrcp.f32 %v2224_v44 }
 0x1a6   : > { %v2341_v57 = vadd.f32 %v2340_v51, %v6390_v41  ;;  %v3247_v53 = vpop.eup %3246  ;;  %v6402_v46 = vmul.f32 %v3245_v31, %v6276_v11 }
 0x1a7   : > { %v3249_v56 = vpop.eup %3248  ;;  %v6406_v45 = vmul.f32 %v3247_v53, %v6286_v24  ;;  %3260 = vrcp.f32 %v2225_v36 }
 0x1a8   : > { %v2342_v25 = vadd.f32 %v2341_v57, %v6394_v15  ;;  %v3251_v39 = vpop.eup %3250  ;;  %v6410_v54 = vmul.f32 %v3249_v56, %v6296_v20 }
 0x1a9   : > { %v3253_v4 = vpop.eup %3252  ;;  %v6414_v11 = vmul.f32 %v3251_v39, %v6306_v23  ;;  %v2456_v39 = vld [vmem:[%s6513_s6] sm:$0x1] }
 0x1aa   : > { %v2343_v19 = vadd.f32 %v2342_v25, %v6398_v48  ;;  %v6418_v13 = vmul.f32 %v3253_v4, %v6316_v29 }
 0x1ab   : > { %v3255_v18 = vpop.eup %3254 }
 0x1ac   : > { %v2344_v17 = vadd.f32 %v2343_v19, %v6402_v46  ;;  %v6422_v47 = vmul.f32 %v3255_v18, %v6326_v34 }
 0x1ad   : > { %v3257_v55 = vpop.eup %3256 }
 0x1ae   : > { %v2345_v43 = vadd.f32 %v2344_v17, %v6406_v45  ;;  %v6426_v38 = vmul.f32 %v3257_v55, %v6336_v32 }
 0x1af   : > { %v3259_v61 = vpop.eup %3258 }
 0x1b0   : > { %v2346_v24 = vadd.f32 %v2345_v43, %v6410_v54  ;;  %v6430_v35 = vmul.f32 %v3259_v61, %v6344_v60  ;;  %v2455_v60 = vld [vmem:[%s6512_s5] sm:$0xff] }
 0x1b1   : > { %v3261_v37 = vpop.eup %3260  ;;  %3094 = vmatpush3.msra.mxu1 %v2455_v60  ;;  %v7366_v61 = vld [vmem:[#allocation2_spill] sm:$0xff] }
 0x1b2   : > { %v2347_v20 = vadd.f32 %v2346_v24, %v6414_v11  ;;  %v6434_v30 = vmul.f32 %v3261_v37, %v6352_v10  ;;  %v2377_v10 = vld [vmem:[%s6511_s4] sm:$0x1] }
 0x1b4   : > { %v2348_v23 = vadd.f32 %v2347_v20, %v6418_v13 }
 0x1b6   : > { %v2349_v29 = vadd.f32 %v2348_v23, %v6422_v47  ;;  %v7367_v23 = vsub.s32 0, %v7366_v61 }
 0x1b8   : > { %v2350_v34 = vadd.f32 %v2349_v29, %v6426_v38 }
 0x1ba   : > { %v2351_v52 = vadd.f32 %v2350_v34, %v6430_v35 }
 0x1bc   : > { %v2352_v2 = vadd.f32 %v2351_v52, %v6434_v30 }
 0x1be   : > { %v2353_v22 = vrot.slane %v2352_v2, 4 }
 0x1c0   : > { %v2354_v32 = vadd.f32 %v2353_v22, %v2352_v2 }
 0x1c2   : > { %v2355_v6 = vrot.slane %v2354_v32, 2 }
 0x1c4   : > { %v2356_v8 = vadd.f32 %v2355_v6, %v2354_v32 }
 0x1c6   : > { %v2357_v16 = vrot.slane %v2356_v8, 1 }
 0x1c8   : > { %v2358_v26 = vadd.f32 %v2357_v16, %v2356_v8 }
 0x1ca   : > { %v2360_v51 = vmul.f32 0.00390625, %v2358_v26 }
 0x1cc   : > { %3091 = vmatmul.mubr.f32.vlgmr.msra.gmra.mrb[0].mxu0 %v2360_v51 }
 0x29f   : > { %v2444_v31 = vpop.f32.mrb[0].mxu0 }
 0x2a0   : > { %v2445_v44 = vadd.f32 %v2444_v31, %v2377_v10  ;;  %v3092_v57 = vpop.f32.mrb[1].mxu0 }
 0x2a2   : > { %v2830_v53 = vmul.f32 -1.442695, %v2445_v44 }
 0x2a4   : > { %3262 = vpow2.f32 %v2830_v53 }
 0x2ae   : > { %v3263_v36 = vpop.eup %3262 }
 0x2af   : > { %v2451_v25 = vadd.f32 1.0, %v3263_v36 }
 0x2b1   : > { %3264 = vrcp.f32 %v2451_v25 }
 0x2bb   : > { %v3265_v56 = vpop.eup %3264 }
 0x2bc   : > { %v2454_v19 = vmul.f32 %v3265_v56, %v2445_v44 }
 0x2be   : > { %3096 = vmatmul.mubr.msk.f32.vlgmr.msra.gmra.mrb[0].mxu1 %vm2457_vm3, %v2454_v19 }
 0x391   : > { %v2527_v17 = vpop.f32.mrb[0].mxu1 }
 0x392   : > { %v2528_v4 = vadd.f32 %v2527_v17, %v2456_v39  ;;  %v3097_v43 = vpop.f32.mrb[1].mxu1 }
 0x394   : > { %v2832_v18 = vmul.f32 -1.442695, %v2528_v4 }
 0x396   : > { %3266 = vpow2.f32 %v2832_v18 }
 0x3a0   : > { %v3267_v24 = vpop.eup %3266 }
 0x3a1   : > { %v2534_v55 = vadd.f32 1.0, %v3267_v24 }
 0x3a3   : > { %3268 = vrcp.f32 %v2534_v55 }
 0x3ad   : > { %v3269_v20 = vpop.eup %3268 }
 0x3ae   : > { %v2540_v37 = vrot.slane %v3269_v20, %v7367_v23 }
 0x3b0   : > { %v2541_v29 = vmul.f32 %v2540_v37, %v6252_v59  ;;  %v2542_v34 = vmul.f32 %v2540_v37, %v6259_v0  ;;  %v2543_v52 = vmul.f32 %v2540_v37, %v6265_v28  ;;  %v2544_v2 = vmul.f32 %v2540_v37, %v6269_v21 }
 0x3b1   : > { %v2545_v22 = vmul.f32 %v2540_v37, %v6280_v5  ;;  %v2546_v32 = vmul.f32 %v2540_v37, %v6290_v27  ;;  %v2547_v6 = vmul.f32 %v2540_v37, %v6300_v1  ;;  %v2548_v8 = vmul.f32 %v2540_v37, %v6310_v42 }
 0x3b2   : > { %v2549_v16 = vmul.f32 %v2540_v37, %v6320_v63  ;;  %v2550_v26 = vmul.f32 %v2540_v37, %v6330_v3  ;;  %v2551_v59 = vmul.f32 %v2540_v37, %v6340_v49  ;;  %v2552_v0 = vmul.f32 %v2540_v37, %v6348_v33 }
 0x3b3   : > { %v2553_v28 = vmul.f32 %v2540_v37, %v6356_v9  ;;  %v2554_v21 = vmul.f32 %v2540_v37, %v6361_v12  ;;  %v2555_v5 = vmul.f32 %v2540_v37, %v6366_v14  ;;  %v2556_v27 = vmul.f32 %v2540_v37, %v6370_v40 }
 0x3b4   : > { %v2557_v1 = vmul.f32 %v2540_v37, %v6374_v50  ;;  %v2558_v42 = vmul.f32 %v2540_v37, %v6378_v62  ;;  %v2559_v63 = vmul.f32 %v2540_v37, %v6382_v58  ;;  %v2560_v3 = vmul.f32 %v2540_v37, %v6386_v7 }
 0x3b5   : > { %v2561_v49 = vmul.f32 %v2540_v37, %v6390_v41  ;;  %v2562_v33 = vmul.f32 %v2540_v37, %v6394_v15  ;;  %v2563_v9 = vmul.f32 %v2540_v37, %v6398_v48  ;;  %v2564_v12 = vmul.f32 %v2540_v37, %v6402_v46 }
 0x3b6   : > { %v2565_v14 = vmul.f32 %v2540_v37, %v6406_v45  ;;  %v2566_v40 = vmul.f32 %v2540_v37, %v6410_v54  ;;  %v2567_v50 = vmul.f32 %v2540_v37, %v6414_v11  ;;  %v2568_v62 = vmul.f32 %v2540_v37, %v6418_v13 }
 0x3b7   : > { %v2569_v58 = vmul.f32 %v2540_v37, %v6422_v47  ;;  %v2570_v7 = vmul.f32 %v2540_v37, %v6426_v38  ;;  %v2571_v41 = vmul.f32 %v2540_v37, %v6430_v35  ;;  %v2572_v15 = vmul.f32 %v2540_v37, %v6434_v30 }
 0x3b8   : > { %v2939_v48 = vpack.c.bf16 %v2542_v34, %v2541_v29  ;;  %v2944_v46 = vpack.c.bf16 %v2544_v2, %v2543_v52  ;;  %v2949_v45 = vpack.c.bf16 %v2546_v32, %v2545_v22  ;;  %v2954_v54 = vpack.c.bf16 %v2548_v8, %v2547_v6 }
 0x3b9   : > { %v2959_v11 = vpack.c.bf16 %v2550_v26, %v2549_v16  ;;  %v2964_v13 = vpack.c.bf16 %v2552_v0, %v2551_v59  ;;  %v2969_v51 = vpack.c.bf16 %v2554_v21, %v2553_v28  ;;  %v2974_v60 = vpack.c.bf16 %v2556_v27, %v2555_v5 }
 0x3ba   : > { %2940 = vst [vmem:[%s6482_s13] sm:$0xff] %v2939_v48   ;;  %3024 = vst [vmem:[%s6482_s13 + $0x8] sm:$0xff] %v2944_v46   ;;  %v2979_v47 = vpack.c.bf16 %v2558_v42, %v2557_v1  ;;  %v2984_v38 = vpack.c.bf16 %v2560_v3, %v2559_v63  ;;  %v2989_v35 = vpack.c.bf16 %v2562_v33, %v2561_v49 }
 0x3bb   : > { %3025 = vst [vmem:[%s6482_s13 + $0x10] sm:$0xff] %v2949_v45   ;;  %3026 = vst [vmem:[%s6482_s13 + $0x18] sm:$0xff] %v2954_v54   ;;  %v2994_v30 = vpack.c.bf16 %v2564_v12, %v2563_v9  ;;  %v2999_v10 = vpack.c.bf16 %v2566_v40, %v2565_v14  ;;  %v3004_v31 = vpack.c.bf16 %v2568_v62, %v2567_v50 }
 0x3bc   : > { %3027 = vst [vmem:[%s6482_s13 + $0x20] sm:$0xff] %v2959_v11   ;;  %3028 = vst [vmem:[%s6482_s13 + $0x28] sm:$0xff] %v2964_v13   ;;  %v3009_v44 = vpack.c.bf16 %v2570_v7, %v2569_v58  ;;  %v3014_v57 = vpack.c.bf16 %v2572_v15, %v2571_v41 }
 0x3bd   : > { %3029 = vst [vmem:[%s6482_s13 + $0x30] sm:$0xff] %v2969_v51   ;;  %3030 = vst [vmem:[%s6482_s13 + $0x38] sm:$0xff] %v2974_v60  }
 0x3be   : > { %3031 = vst [vmem:[%s6482_s13 + $0x40] sm:$0xff] %v2979_v47   ;;  %3032 = vst [vmem:[%s6482_s13 + $0x48] sm:$0xff] %v2984_v38  }
 0x3bf   : > { %3033 = vst [vmem:[%s6482_s13 + $0x50] sm:$0xff] %v2989_v35   ;;  %3034 = vst [vmem:[%s6482_s13 + $0x58] sm:$0xff] %v2994_v30  }
 0x3c0   : > { %3035 = vst [vmem:[%s6482_s13 + $0x60] sm:$0xff] %v2999_v10   ;;  %3036 = vst [vmem:[%s6482_s13 + $0x68] sm:$0xff] %v3004_v31  }
 0x3c1   : > { %3037 = vst [vmem:[%s6482_s13 + $0x70] sm:$0xff] %v3009_v44   ;;  %3038 = vst [vmem:[%s6482_s13 + $0x78] sm:$0xff] %v3014_v57  }
 0x3c2 PF: > { %s17_s24 = sadd.s32 1, %s3277_s24  }
 0x3c3   : > { %p14_p4 = scmp.ge.s32.totalorder %s17_s24, 4  }
 0x3c5   :  { %16 = sbr.rel (!%p14_p4) target bundleno = 1 (0x1), region = 78 }

</bundles_post_ra>
